<compile_context>
chip_gen: v6e
topology: v6e:2x2x1
jax: 0.10.0
libtpu: 0.0.40
codegen_flags: <defaults>
</compile_context>

<pallas_src>
import jax
import jax.numpy as jnp
from jax import lax
from jax.experimental import pallas as pl
from jax.experimental.pallas import tpu as pltpu

LANES = 128           # every channel-like dim is zero-padded to a full lane reg
NEG_INF = -1e30       # additive softmax mask for padded class lanes
_VMEM = pl.BlockSpec(memory_space=pltpu.MemorySpace.VMEM)


def _round_up(n, m):
    return (n + m - 1) // m * m


def _pad_to(a, shape):
    return jnp.pad(a, [(0, t - s) for s, t in zip(a.shape, shape)])


# --------------------------- fused Pallas kernel ---------------------------

def _make_fused_kernel(N, Hp1, Wp1, Hp2, Wp2, B1, M2, P1R):
    """All sizes are static Python ints.

    Layouts inside the kernel:
      conv1 patches : (4*B1, K1p)  rows grouped as [(di,dj) block][n, ip, jp]
      conv1 out     : (4*B1, 128)  channels in lanes
      pool1 grid    : (P1R, 128)   rows = n*Hp1*Wp1 + ih*Wp1 + iw
      conv2 out     : (M2, 128)    rows = n*Hp1*Wp1 + oh*Wp1 + ow (full grid,
                                   only oh<H2, ow<W2 rows are valid)
    """
    G2 = Hp1 * Wp1

    def kernel(p_ref, w1_ref, b1_ref, s1_ref, h1_ref,
               w2_ref, b2_ref, s2_ref, h2_ref,
               wf1_ref, bf1_ref, wf2_ref, bf2_ref,
               out_ref, pool1_scr, y2_scr):
        f32 = jnp.float32

        # ---- conv1 (im2col matmul) + bias + ReLU + BN affine ----------------
        a = jnp.dot(p_ref[...], w1_ref[...], preferred_element_type=f32)
        a = jnp.maximum(a + b1_ref[...], 0.0) * s1_ref[...] + h1_ref[...]

        # ---- maxpool#1: rows come pre-grouped in 4 (di,dj) blocks of B1 rows
        p1 = jnp.maximum(jnp.maximum(a[0:B1], a[B1:2 * B1]),
                         jnp.maximum(a[2 * B1:3 * B1], a[3 * B1:4 * B1]))
        pool1_scr[0:B1, :] = p1
        if P1R > B1:   # keep shifted-read region deterministic & finite
            pool1_scr[B1:P1R, :] = jnp.zeros((P1R - B1, LANES), f32)

        # ---- conv2: in-kernel im2col = 9 shifted row-slices of the pool1 grid
        acc = jnp.zeros((M2, LANES), f32)
        for ki in range(3):
            for kj in range(3):
                shift = ki * Wp1 + kj
                xs = pool1_scr[pl.ds(shift, M2), :]
                acc = acc + jnp.dot(xs, w2_ref[ki * 3 + kj],
                                    preferred_element_type=f32)
        y2 = jnp.maximum(acc + b2_ref[...], 0.0) * s2_ref[...] + h2_ref[...]
        y2_scr[...] = y2

        # ---- maxpool#2 + NCHW-compatible flatten (channels stay in lanes) ---
        img_feats = []
        for n in range(N):
            chunks = []
            for op in range(Hp2):
                for oq in range(Wp2):
                    base = n * G2 + (2 * op) * Wp1 + 2 * oq
                    v = jnp.maximum(
                        jnp.maximum(y2_scr[pl.ds(base, 1), :],
                                    y2_scr[pl.ds(base + 1, 1), :]),
                        jnp.maximum(y2_scr[pl.ds(base + Wp1, 1), :],
                                    y2_scr[pl.ds(base + Wp1 + 1, 1), :]))
                    chunks.append(v)                       # (1, 128)
            img_feats.append(jnp.concatenate(chunks, axis=1))   # (1, S*128)
        feats = jnp.concatenate(img_feats, axis=0)              # (N, S*128)

        # ---- fc1 + ReLU + fc2 + masked softmax ------------------------------
        h = jnp.dot(feats, wf1_ref[...], preferred_element_type=f32) + bf1_ref[...]
        h = jnp.maximum(h, 0.0)
        logits = jnp.dot(h, wf2_ref[...], preferred_element_type=f32) + bf2_ref[...]
        m = jnp.max(logits, axis=-1, keepdims=True)
        e = jnp.exp(logits - m)                    # padded lanes -> exp(-1e30) = 0
        denom = jnp.sum(e, axis=-1, keepdims=True)
        out_ref[...] = e * pl.reciprocal(denom, approx=True)

    return kernel


# ------------------------------- JAX wrappers -------------------------------

def _conv1_pool_patches(x, Hp1, Wp1, B1, K1p):
    """im2col for conv1 with rows grouped by the 2x2 pool offset (di, dj).

    Row (b, n, ip, jp) with b = di*2+dj covers conv1 output (2*ip+di, 2*jp+dj),
    so MaxPool#1 becomes a max over the 4 contiguous B1-row blocks in-kernel.
    Column order matches PyTorch's (Cin, kh, kw) weight flattening, padded to K1p.
    """
    N, Cin, _, _ = x.shape
    G1 = N * Hp1 * Wp1
    blocks = []
    for di in range(2):
        for dj in range(2):
            cols = []
            for ki in range(3):
                for kj in range(3):
                    si, sj = di + ki, dj + kj
                    sub = x[:, :, si:si + 2 * Hp1 - 1:2, sj:sj + 2 * Wp1 - 1:2]
                    cols.append(sub.transpose(0, 2, 3, 1).reshape(G1, Cin))
            blk = jnp.stack(cols, axis=-1).reshape(G1, Cin * 9)
            blocks.append(_pad_to(blk, (B1, K1p)))
    return jnp.concatenate(blocks, axis=0)


def prepare_params(p, eps=1e-5):
    """One-time (outside the hot path) weight prep: fold BN running stats into
    (scale, shift), pad channel dims to 128 lanes, reorder into kernel layouts."""
    f32 = jnp.float32
    c1, c2 = p['w1'].shape[0], p['w2'].shape[0]            # 6, 16

    def bn(gamma, beta, mean, var):
        scale = gamma / jnp.sqrt(var + eps)
        return scale, beta - mean * scale

    s1, h1 = bn(p['g1'], p['be1'], p['m1'], p['v1'])
    s2, h2 = bn(p['g2'], p['be2'], p['m2'], p['v2'])

    K1 = p['w1'].shape[1] * 9
    w1 = _pad_to(p['w1'].reshape(c1, K1).T, (_round_up(K1, 32), LANES))

    # conv2 weight as 9 (Cin_pad, Cout_pad) slabs, one per (ki, kj)
    w2 = p['w2'].transpose(2, 3, 1, 0).reshape(9, p['w2'].shape[1], c2)
    w2 = _pad_to(w2, (9, LANES, LANES))

    def vec(v):
        return _pad_to(v.astype(f32), (LANES,)).reshape(1, LANES)

    # fc1: torch-flatten feature index c*S+s  ->  lane index s*128 + c
    S = p['fc1_w'].shape[0] // c2
    hid = p['fc1_w'].shape[1]
    wf1 = p['fc1_w'].reshape(c2, S, hid).transpose(1, 0, 2)
    wf1 = _pad_to(wf1, (S, LANES, hid)).reshape(S * LANES, hid)

    n_cls = p['fc2_w'].shape[1]
    wf2 = _pad_to(p['fc2_w'], (hid, LANES))
    bf2 = jnp.concatenate(
        [p['fc2_b'].astype(f32), jnp.full((LANES - n_cls,), NEG_INF, f32)]
    ).reshape(1, LANES)

    return dict(
        w1=w1, b1=vec(p['b1']), s1=vec(s1), h1=vec(h1),
        w2=w2, b2=vec(p['b2']), s2=vec(s2), h2=vec(h2),
        wf1=wf1, bf1=p['fc1_b'].astype(f32).reshape(1, hid), wf2=wf2, bf2=bf2,
    )


def classifier_forward(x, kp, num_classes=10):
    """Full ClassifierModule forward as one fused Pallas kernel."""
    N, _, H, W = x.shape
    H1, W1 = H - 2, W - 2                       # conv1 output
    Hp1, Wp1 = H1 // 2, W1 // 2                 # pool1 output grid
    H2, W2 = Hp1 - 2, Wp1 - 2                   # conv2 output
    Hp2, Wp2 = H2 // 2, W2 // 2                 # pool2 output grid

    G1 = N * Hp1 * Wp1
    B1 = _round_up(G1, 8)                       # rows per (di,dj) pooling block
    K1p = kp['w1'].shape[0]
    # rows of the full-grid conv2 result that cover every valid output position
    M2 = _round_up((N - 1) * Hp1 * Wp1 + (H2 - 1) * Wp1 + W2, 8)
    P1R = _round_up(max(B1, M2 + 2 * Wp1 + 2), 8)

    patches = _conv1_pool_patches(x, Hp1, Wp1, B1, K1p)
    kernel = _make_fused_kernel(N, Hp1, Wp1, Hp2, Wp2, B1, M2, P1R)

    out = pl.pallas_call(
        kernel,
        out_shape=jax.ShapeDtypeStruct((N, LANES), jnp.float32),
        in_specs=[_VMEM] * 13,
        out_specs=_VMEM,
        scratch_shapes=[pltpu.VMEM((P1R, LANES), jnp.float32),
                        pltpu.VMEM((M2, LANES), jnp.float32)],
        # NOTE(v7x): for real batch sizes, add grid=(num_row_tiles,) over N and
        # dimension_semantics=("parallel",) so both TensorCores share the work;
        # size VMEM scratch against v7x's 64 MiB, not 128 MiB.
    )(patches, kp['w1'], kp['b1'], kp['s1'], kp['h1'],
      kp['w2'], kp['b2'], kp['s2'], kp['h2'],
      kp['wf1'], kp['bf1'], kp['wf2'], kp['bf2'])

    return out[:, :num_classes]                 # drop lane padding (lane-dense store)


# ---------------------------- reference & params ----------------------------

def reference_forward(x, p, eps=1e-5):
    """Pure-JAX reference of the PyTorch module (inference-mode BatchNorm)."""
    hi = lax.Precision.HIGHEST

    def block(y, w, b, g, be, m, v):
        y = lax.conv_general_dilated(y, w, (1, 1), 'VALID',
                                     dimension_numbers=('NCHW', 'OIHW', 'NCHW'),
                                     precision=hi)
        y = jnp.maximum(y + b[None, :, None, None], 0.0)
        scale = g / jnp.sqrt(v + eps)
        shift = be - m * scale
        y = y * scale[None, :, None, None] + shift[None, :, None, None]
        n, c, hh, ww = y.shape
        hp, wp = hh // 2, ww // 2
        return y[:, :, :2 * hp, :2 * wp].reshape(n, c, hp, 2, wp, 2).max(axis=(3, 5))

    y = block(x, p['w1'], p['b1'], p['g1'], p['be1'], p['m1'], p['v1'])
    y = block(y, p['w2'], p['b2'], p['g2'], p['be2'], p['m2'], p['v2'])
    f = y.reshape(y.shape[0], -1)
    h = jnp.maximum(jnp.dot(f, p['fc1_w'], precision=hi) + p['fc1_b'], 0.0)
    logits = jnp.dot(h, p['fc2_w'], precision=hi) + p['fc2_b']
    return jax.nn.softmax(logits, axis=-1)


def init_params(key, flat_features):
    # fc weights stored as (in, out) and used as x @ W (transpose of torch's
    # Linear storage) -- consistent between kernel and reference here.
    ks = jax.random.split(key, 16)
    f32 = jnp.float32

    def u(k, shape, scale):
        return (jax.random.uniform(k, shape, f32) * 2.0 - 1.0) * scale

    return {
        'w1': u(ks[0], (6, 3, 3, 3), 0.2), 'b1': u(ks[1], (6,), 0.1),
        'g1': 1.0 + u(ks[2], (6,), 0.1), 'be1': u(ks[3], (6,), 0.05),
        'm1': u(ks[4], (6,), 0.05), 'v1': 1.0 + 0.1 * jax.random.uniform(ks[5], (6,), f32),
        'w2': u(ks[6], (16, 6, 3, 3), 0.15), 'b2': u(ks[7], (16,), 0.1),
        'g2': 1.0 + u(ks[8], (16,), 0.1), 'be2': u(ks[9], (16,), 0.05),
        'm2': u(ks[10], (16,), 0.05), 'v2': 1.0 + 0.1 * jax.random.uniform(ks[11], (16,), f32),
        'fc1_w': u(ks[12], (flat_features, 128), 0.1), 'fc1_b': u(ks[13], (128,), 0.05),
        'fc2_w': u(ks[14], (128, 10), 0.1), 'fc2_b': u(ks[15], (10,), 0.05),
    }


if __name__ == "__main__":
    key = jax.random.PRNGKey(0)
    kx, kprm = jax.random.split(key)

    # conv(3x3): 16->14, pool ->7, conv ->5, pool ->2  => flatten 16*2*2 = 64
    x = jax.random.normal(kx, (2, 3, 16, 16), jnp.float32)
    params = init_params(kprm, flat_features=16 * 2 * 2)

    kernel_params = prepare_params(params)          # one-time layout/pad prep
    fwd = jax.jit(classifier_forward)
    out = jax.block_until_ready(fwd(x, kernel_params))

    ref = reference_forward(x, params)
    assert out.shape == (2, 10), out.shape
    row_sums = jnp.sum(out, axis=-1)
    assert bool(jnp.all(jnp.abs(row_sums - 1.0) < 5e-3)), row_sums
    assert bool(jnp.allclose(out, ref, atol=5e-3)), (out, ref)
    print("KERNEL_OK")
</pallas_src>

<mosaic_0001>
module attributes {stable_mosaic.version = 11 : i64} {
  func.func @kernel(%arg0: memref<416x32xf32, #tpu.memory_space<vmem>>, %arg1: memref<32x128xf32, #tpu.memory_space<vmem>>, %arg2: memref<1x128xf32, #tpu.memory_space<vmem>>, %arg3: memref<1x128xf32, #tpu.memory_space<vmem>>, %arg4: memref<1x128xf32, #tpu.memory_space<vmem>>, %arg5: memref<9x128x128xf32, #tpu.memory_space<vmem>>, %arg6: memref<1x128xf32, #tpu.memory_space<vmem>>, %arg7: memref<1x128xf32, #tpu.memory_space<vmem>>, %arg8: memref<1x128xf32, #tpu.memory_space<vmem>>, %arg9: memref<512x128xf32, #tpu.memory_space<vmem>>, %arg10: memref<1x128xf32, #tpu.memory_space<vmem>>, %arg11: memref<128x128xf32, #tpu.memory_space<vmem>>, %arg12: memref<1x128xf32, #tpu.memory_space<vmem>>, %arg13: memref<2x128xf32, #tpu.memory_space<vmem>>, %arg14: memref<104x128xf32, #tpu.memory_space<vmem>>, %arg15: memref<88x128xf32, #tpu.memory_space<vmem>>) attributes {dimension_semantics = [], scalar_prefetch = 0 : i64, scratch_operands = 2 : i64, tpu.core_type = #tpu.core_type<tc>} {
    %c0 = arith.constant 0 : index
    %c0_0 = arith.constant 0 : index
    %0 = vector.load %arg0[%c0, %c0_0] : memref<416x32xf32, #tpu.memory_space<vmem>>, vector<416x32xf32>
    %c0_1 = arith.constant 0 : index
    %c0_2 = arith.constant 0 : index
    %1 = vector.load %arg1[%c0_1, %c0_2] : memref<32x128xf32, #tpu.memory_space<vmem>>, vector<32x128xf32>
    %cst = arith.constant dense<0.000000e+00> : vector<416x128xf32>
    %2 = tpu.matmul %0, %1, %cst {dimension_numbers = #tpu.dot_dimension_numbers<[1], [0], [0], [1], [0, 0, 1, 1], [], []>} : vector<416x32xf32>, vector<32x128xf32>, vector<416x128xf32> -> vector<416x128xf32>
    %c0_3 = arith.constant 0 : index
    %c0_4 = arith.constant 0 : index
    %3 = vector.load %arg2[%c0_3, %c0_4] : memref<1x128xf32, #tpu.memory_space<vmem>>, vector<1x128xf32>
    %4 = vector.broadcast %3 : vector<1x128xf32> to vector<416x128xf32>
    %5 = arith.addf %2, %4 : vector<416x128xf32>
    %cst_5 = arith.constant 0.000000e+00 : f32
    %6 = vector.broadcast %cst_5 : f32 to vector<416x128xf32>
    %7 = arith.maximumf %5, %6 : vector<416x128xf32>
    %c0_6 = arith.constant 0 : index
    %c0_7 = arith.constant 0 : index
    %8 = vector.load %arg3[%c0_6, %c0_7] : memref<1x128xf32, #tpu.memory_space<vmem>>, vector<1x128xf32>
    %9 = vector.broadcast %8 : vector<1x128xf32> to vector<416x128xf32>
    %10 = arith.mulf %7, %9 : vector<416x128xf32>
    %c0_8 = arith.constant 0 : index
    %c0_9 = arith.constant 0 : index
    %11 = vector.load %arg4[%c0_8, %c0_9] : memref<1x128xf32, #tpu.memory_space<vmem>>, vector<1x128xf32>
    %12 = vector.broadcast %11 : vector<1x128xf32> to vector<416x128xf32>
    %13 = arith.addf %10, %12 : vector<416x128xf32>
    %14 = vector.extract_strided_slice %13 {offsets = [0, 0], sizes = [104, 128], strides = [1, 1]} : vector<416x128xf32> to vector<104x128xf32>
    %15 = vector.extract_strided_slice %13 {offsets = [104, 0], sizes = [104, 128], strides = [1, 1]} : vector<416x128xf32> to vector<104x128xf32>
    %16 = arith.maximumf %14, %15 : vector<104x128xf32>
    %17 = vector.extract_strided_slice %13 {offsets = [208, 0], sizes = [104, 128], strides = [1, 1]} : vector<416x128xf32> to vector<104x128xf32>
    %18 = vector.extract_strided_slice %13 {offsets = [312, 0], sizes = [104, 128], strides = [1, 1]} : vector<416x128xf32> to vector<104x128xf32>
    %19 = arith.maximumf %17, %18 : vector<104x128xf32>
    %20 = arith.maximumf %16, %19 : vector<104x128xf32>
    %c0_10 = arith.constant 0 : index
    %c0_11 = arith.constant 0 : index
    %21 = vector.load %arg14[%c0_10, %c0_11] : memref<104x128xf32, #tpu.memory_space<vmem>>, vector<104x128xf32>
    tpu.vector_store %arg14[%c0_10, %c0_11], %20 {strides = array<i32>} : memref<104x128xf32, #tpu.memory_space<vmem>>, vector<104x128xf32>,
    %cst_12 = arith.constant 0.000000e+00 : f32
    %22 = vector.broadcast %cst_12 : f32 to vector<88x128xf32>
    %c0_13 = arith.constant 0 : index
    %c0_14 = arith.constant 0 : index
    %23 = vector.load %arg14[%c0_13, %c0_14] : memref<104x128xf32, #tpu.memory_space<vmem>>, vector<88x128xf32>
    %c0_15 = arith.constant 0 : index
    %c0_16 = arith.constant 0 : index
    %c0_17 = arith.constant 0 : index
    %24 = vector.load %arg5[%c0_15, %c0_16, %c0_17] : memref<9x128x128xf32, #tpu.memory_space<vmem>>, vector<1x128x128xf32>
    %25 = vector.shape_cast %24 : vector<1x128x128xf32> to vector<128x128xf32>
    %cst_18 = arith.constant dense<0.000000e+00> : vector<88x128xf32>
    %26 = tpu.matmul %23, %25, %cst_18 {dimension_numbers = #tpu.dot_dimension_numbers<[1], [0], [0], [1], [0, 0, 1, 1], [], []>} : vector<88x128xf32>, vector<128x128xf32>, vector<88x128xf32> -> vector<88x128xf32>
    %27 = arith.addf %22, %26 : vector<88x128xf32>
    %c1 = arith.constant 1 : index
    %c0_19 = arith.constant 0 : index
    %28 = vector.load %arg14[%c1, %c0_19] : memref<104x128xf32, #tpu.memory_space<vmem>>, vector<88x128xf32>
    %c1_20 = arith.constant 1 : index
    %c0_21 = arith.constant 0 : index
    %c0_22 = arith.constant 0 : index
    %29 = vector.load %arg5[%c1_20, %c0_21, %c0_22] : memref<9x128x128xf32, #tpu.memory_space<vmem>>, vector<1x128x128xf32>
    %30 = vector.shape_cast %29 : vector<1x128x128xf32> to vector<128x128xf32>
    %cst_23 = arith.constant dense<0.000000e+00> : vector<88x128xf32>
    %31 = tpu.matmul %28, %30, %cst_23 {dimension_numbers = #tpu.dot_dimension_numbers<[1], [0], [0], [1], [0, 0, 1, 1], [], []>} : vector<88x128xf32>, vector<128x128xf32>, vector<88x128xf32> -> vector<88x128xf32>
    %32 = arith.addf %27, %31 : vector<88x128xf32>
    %c2 = arith.constant 2 : index
    %c0_24 = arith.constant 0 : index
    %33 = vector.load %arg14[%c2, %c0_24] : memref<104x128xf32, #tpu.memory_space<vmem>>, vector<88x128xf32>
    %c2_25 = arith.constant 2 : index
    %c0_26 = arith.constant 0 : index
    %c0_27 = arith.constant 0 : index
    %34 = vector.load %arg5[%c2_25, %c0_26, %c0_27] : memref<9x128x128xf32, #tpu.memory_space<vmem>>, vector<1x128x128xf32>
    %35 = vector.shape_cast %34 : vector<1x128x128xf32> to vector<128x128xf32>
    %cst_28 = arith.constant dense<0.000000e+00> : vector<88x128xf32>
    %36 = tpu.matmul %33, %35, %cst_28 {dimension_numbers = #tpu.dot_dimension_numbers<[1], [0], [0], [1], [0, 0, 1, 1], [], []>} : vector<88x128xf32>, vector<128x128xf32>, vector<88x128xf32> -> vector<88x128xf32>
    %37 = arith.addf %32, %36 : vector<88x128xf32>
    %c7 = arith.constant 7 : index
    %c0_29 = arith.constant 0 : index
    %38 = vector.load %arg14[%c7, %c0_29] : memref<104x128xf32, #tpu.memory_space<vmem>>, vector<88x128xf32>
    %c3 = arith.constant 3 : index
    %c0_30 = arith.constant 0 : index
    %c0_31 = arith.constant 0 : index
    %39 = vector.load %arg5[%c3, %c0_30, %c0_31] : memref<9x128x128xf32, #tpu.memory_space<vmem>>, vector<1x128x128xf32>
    %40 = vector.shape_cast %39 : vector<1x128x128xf32> to vector<128x128xf32>
    %cst_32 = arith.constant dense<0.000000e+00> : vector<88x128xf32>
    %41 = tpu.matmul %38, %40, %cst_32 {dimension_numbers = #tpu.dot_dimension_numbers<[1], [0], [0], [1], [0, 0, 1, 1], [], []>} : vector<88x128xf32>, vector<128x128xf32>, vector<88x128xf32> -> vector<88x128xf32>
    %42 = arith.addf %37, %41 : vector<88x128xf32>
    %c8 = arith.constant 8 : index
    %c0_33 = arith.constant 0 : index
    %43 = vector.load %arg14[%c8, %c0_33] : memref<104x128xf32, #tpu.memory_space<vmem>>, vector<88x128xf32>
    %c4 = arith.constant 4 : index
    %c0_34 = arith.constant 0 : index
    %c0_35 = arith.constant 0 : index
    %44 = vector.load %arg5[%c4, %c0_34, %c0_35] : memref<9x128x128xf32, #tpu.memory_space<vmem>>, vector<1x128x128xf32>
    %45 = vector.shape_cast %44 : vector<1x128x128xf32> to vector<128x128xf32>
    %cst_36 = arith.constant dense<0.000000e+00> : vector<88x128xf32>
    %46 = tpu.matmul %43, %45, %cst_36 {dimension_numbers = #tpu.dot_dimension_numbers<[1], [0], [0], [1], [0, 0, 1, 1], [], []>} : vector<88x128xf32>, vector<128x128xf32>, vector<88x128xf32> -> vector<88x128xf32>
    %47 = arith.addf %42, %46 : vector<88x128xf32>
    %c9 = arith.constant 9 : index
    %c0_37 = arith.constant 0 : index
    %48 = vector.load %arg14[%c9, %c0_37] : memref<104x128xf32, #tpu.memory_space<vmem>>, vector<88x128xf32>
    %c5 = arith.constant 5 : index
    %c0_38 = arith.constant 0 : index
    %c0_39 = arith.constant 0 : index
    %49 = vector.load %arg5[%c5, %c0_38, %c0_39] : memref<9x128x128xf32, #tpu.memory_space<vmem>>, vector<1x128x128xf32>
    %50 = vector.shape_cast %49 : vector<1x128x128xf32> to vector<128x128xf32>
    %cst_40 = arith.constant dense<0.000000e+00> : vector<88x128xf32>
    %51 = tpu.matmul %48, %50, %cst_40 {dimension_numbers = #tpu.dot_dimension_numbers<[1], [0], [0], [1], [0, 0, 1, 1], [], []>} : vector<88x128xf32>, vector<128x128xf32>, vector<88x128xf32> -> vector<88x128xf32>
    %52 = arith.addf %47, %51 : vector<88x128xf32>
    %c14 = arith.constant 14 : index
    %c0_41 = arith.constant 0 : index
    %53 = vector.load %arg14[%c14, %c0_41] : memref<104x128xf32, #tpu.memory_space<vmem>>, vector<88x128xf32>
    %c6 = arith.constant 6 : index
    %c0_42 = arith.constant 0 : index
    %c0_43 = arith.constant 0 : index
    %54 = vector.load %arg5[%c6, %c0_42, %c0_43] : memref<9x128x128xf32, #tpu.memory_space<vmem>>, vector<1x128x128xf32>
    %55 = vector.shape_cast %54 : vector<1x128x128xf32> to vector<128x128xf32>
    %cst_44 = arith.constant dense<0.000000e+00> : vector<88x128xf32>
    %56 = tpu.matmul %53, %55, %cst_44 {dimension_numbers = #tpu.dot_dimension_numbers<[1], [0], [0], [1], [0, 0, 1, 1], [], []>} : vector<88x128xf32>, vector<128x128xf32>, vector<88x128xf32> -> vector<88x128xf32>
    %57 = arith.addf %52, %56 : vector<88x128xf32>
    %c15 = arith.constant 15 : index
    %c0_45 = arith.constant 0 : index
    %58 = vector.load %arg14[%c15, %c0_45] : memref<104x128xf32, #tpu.memory_space<vmem>>, vector<88x128xf32>
    %c7_46 = arith.constant 7 : index
    %c0_47 = arith.constant 0 : index
    %c0_48 = arith.constant 0 : index
    %59 = vector.load %arg5[%c7_46, %c0_47, %c0_48] : memref<9x128x128xf32, #tpu.memory_space<vmem>>, vector<1x128x128xf32>
    %60 = vector.shape_cast %59 : vector<1x128x128xf32> to vector<128x128xf32>
    %cst_49 = arith.constant dense<0.000000e+00> : vector<88x128xf32>
    %61 = tpu.matmul %58, %60, %cst_49 {dimension_numbers = #tpu.dot_dimension_numbers<[1], [0], [0], [1], [0, 0, 1, 1], [], []>} : vector<88x128xf32>, vector<128x128xf32>, vector<88x128xf32> -> vector<88x128xf32>
    %62 = arith.addf %57, %61 : vector<88x128xf32>
    %c16 = arith.constant 16 : index
    %c0_50 = arith.constant 0 : index
    %63 = vector.load %arg14[%c16, %c0_50] : memref<104x128xf32, #tpu.memory_space<vmem>>, vector<88x128xf32>
    %c8_51 = arith.constant 8 : index
    %c0_52 = arith.constant 0 : index
    %c0_53 = arith.constant 0 : index
    %64 = vector.load %arg5[%c8_51, %c0_52, %c0_53] : memref<9x128x128xf32, #tpu.memory_space<vmem>>, vector<1x128x128xf32>
    %65 = vector.shape_cast %64 : vector<1x128x128xf32> to vector<128x128xf32>
    %cst_54 = arith.constant dense<0.000000e+00> : vector<88x128xf32>
    %66 = tpu.matmul %63, %65, %cst_54 {dimension_numbers = #tpu.dot_dimension_numbers<[1], [0], [0], [1], [0, 0, 1, 1], [], []>} : vector<88x128xf32>, vector<128x128xf32>, vector<88x128xf32> -> vector<88x128xf32>
    %67 = arith.addf %62, %66 : vector<88x128xf32>
    %c0_55 = arith.constant 0 : index
    %c0_56 = arith.constant 0 : index
    %68 = vector.load %arg6[%c0_55, %c0_56] : memref<1x128xf32, #tpu.memory_space<vmem>>, vector<1x128xf32>
    %69 = vector.broadcast %68 : vector<1x128xf32> to vector<88x128xf32>
    %70 = arith.addf %67, %69 : vector<88x128xf32>
    %cst_57 = arith.constant 0.000000e+00 : f32
    %71 = vector.broadcast %cst_57 : f32 to vector<88x128xf32>
    %72 = arith.maximumf %70, %71 : vector<88x128xf32>
    %c0_58 = arith.constant 0 : index
    %c0_59 = arith.constant 0 : index
    %73 = vector.load %arg7[%c0_58, %c0_59] : memref<1x128xf32, #tpu.memory_space<vmem>>, vector<1x128xf32>
    %74 = vector.broadcast %73 : vector<1x128xf32> to vector<88x128xf32>
    %75 = arith.mulf %72, %74 : vector<88x128xf32>
    %c0_60 = arith.constant 0 : index
    %c0_61 = arith.constant 0 : index
    %76 = vector.load %arg8[%c0_60, %c0_61] : memref<1x128xf32, #tpu.memory_space<vmem>>, vector<1x128xf32>
    %77 = vector.broadcast %76 : vector<1x128xf32> to vector<88x128xf32>
    %78 = arith.addf %75, %77 : vector<88x128xf32>
    %c0_62 = arith.constant 0 : index
    %c0_63 = arith.constant 0 : index
    %79 = vector.load %arg15[%c0_62, %c0_63] : memref<88x128xf32, #tpu.memory_space<vmem>>, vector<88x128xf32>
    tpu.vector_store %arg15[%c0_62, %c0_63], %78 {strides = array<i32>} : memref<88x128xf32, #tpu.memory_space<vmem>>, vector<88x128xf32>,
    %c0_64 = arith.constant 0 : index
    %c0_65 = arith.constant 0 : index
    %80 = vector.load %arg15[%c0_64, %c0_65] : memref<88x128xf32, #tpu.memory_space<vmem>>, vector<1x128xf32>
    %c1_66 = arith.constant 1 : index
    %c0_67 = arith.constant 0 : index
    %81 = vector.load %arg15[%c1_66, %c0_67] : memref<88x128xf32, #tpu.memory_space<vmem>>, vector<1x128xf32>
    %82 = arith.maximumf %80, %81 : vector<1x128xf32>
    %c7_68 = arith.constant 7 : index
    %c0_69 = arith.constant 0 : index
    %83 = vector.load %arg15[%c7_68, %c0_69] : memref<88x128xf32, #tpu.memory_space<vmem>>, vector<1x128xf32>
    %c8_70 = arith.constant 8 : index
    %c0_71 = arith.constant 0 : index
    %84 = vector.load %arg15[%c8_70, %c0_71] : memref<88x128xf32, #tpu.memory_space<vmem>>, vector<1x128xf32>
    %85 = arith.maximumf %83, %84 : vector<1x128xf32>
    %86 = arith.maximumf %82, %85 : vector<1x128xf32>
    %c2_72 = arith.constant 2 : index
    %c0_73 = arith.constant 0 : index
    %87 = vector.load %arg15[%c2_72, %c0_73] : memref<88x128xf32, #tpu.memory_space<vmem>>, vector<1x128xf32>
    %c3_74 = arith.constant 3 : index
    %c0_75 = arith.constant 0 : index
    %88 = vector.load %arg15[%c3_74, %c0_75] : memref<88x128xf32, #tpu.memory_space<vmem>>, vector<1x128xf32>
    %89 = arith.maximumf %87, %88 : vector<1x128xf32>
    %c9_76 = arith.constant 9 : index
    %c0_77 = arith.constant 0 : index
    %90 = vector.load %arg15[%c9_76, %c0_77] : memref<88x128xf32, #tpu.memory_space<vmem>>, vector<1x128xf32>
    %c10 = arith.constant 10 : index
    %c0_78 = arith.constant 0 : index
    %91 = vector.load %arg15[%c10, %c0_78] : memref<88x128xf32, #tpu.memory_space<vmem>>, vector<1x128xf32>
    %92 = arith.maximumf %90, %91 : vector<1x128xf32>
    %93 = arith.maximumf %89, %92 : vector<1x128xf32>
    %c14_79 = arith.constant 14 : index
    %c0_80 = arith.constant 0 : index
    %94 = vector.load %arg15[%c14_79, %c0_80] : memref<88x128xf32, #tpu.memory_space<vmem>>, vector<1x128xf32>
    %c15_81 = arith.constant 15 : index
    %c0_82 = arith.constant 0 : index
    %95 = vector.load %arg15[%c15_81, %c0_82] : memref<88x128xf32, #tpu.memory_space<vmem>>, vector<1x128xf32>
    %96 = arith.maximumf %94, %95 : vector<1x128xf32>
    %c21 = arith.constant 21 : index
    %c0_83 = arith.constant 0 : index
    %97 = vector.load %arg15[%c21, %c0_83] : memref<88x128xf32, #tpu.memory_space<vmem>>, vector<1x128xf32>
    %c22 = arith.constant 22 : index
    %c0_84 = arith.constant 0 : index
    %98 = vector.load %arg15[%c22, %c0_84] : memref<88x128xf32, #tpu.memory_space<vmem>>, vector<1x128xf32>
    %99 = arith.maximumf %97, %98 : vector<1x128xf32>
    %100 = arith.maximumf %96, %99 : vector<1x128xf32>
    %c16_85 = arith.constant 16 : index
    %c0_86 = arith.constant 0 : index
    %101 = vector.load %arg15[%c16_85, %c0_86] : memref<88x128xf32, #tpu.memory_space<vmem>>, vector<1x128xf32>
    %c17 = arith.constant 17 : index
    %c0_87 = arith.constant 0 : index
    %102 = vector.load %arg15[%c17, %c0_87] : memref<88x128xf32, #tpu.memory_space<vmem>>, vector<1x128xf32>
    %103 = arith.maximumf %101, %102 : vector<1x128xf32>
    %c23 = arith.constant 23 : index
    %c0_88 = arith.constant 0 : index
    %104 = vector.load %arg15[%c23, %c0_88] : memref<88x128xf32, #tpu.memory_space<vmem>>, vector<1x128xf32>
    %c24 = arith.constant 24 : index
    %c0_89 = arith.constant 0 : index
    %105 = vector.load %arg15[%c24, %c0_89] : memref<88x128xf32, #tpu.memory_space<vmem>>, vector<1x128xf32>
    %106 = arith.maximumf %104, %105 : vector<1x128xf32>
    %107 = arith.maximumf %103, %106 : vector<1x128xf32>
    %108 = tpu.concatenate %86, %93, %100, %107 in 1 : vector<1x128xf32>, vector<1x128xf32>, vector<1x128xf32>, vector<1x128xf32> -> vector<1x512xf32>
    %c49 = arith.constant 49 : index
    %c0_90 = arith.constant 0 : index
    %109 = vector.load %arg15[%c49, %c0_90] : memref<88x128xf32, #tpu.memory_space<vmem>>, vector<1x128xf32>
    %c50 = arith.constant 50 : index
    %c0_91 = arith.constant 0 : index
    %110 = vector.load %arg15[%c50, %c0_91] : memref<88x128xf32, #tpu.memory_space<vmem>>, vector<1x128xf32>
    %111 = arith.maximumf %109, %110 : vector<1x128xf32>
    %c56 = arith.constant 56 : index
    %c0_92 = arith.constant 0 : index
    %112 = vector.load %arg15[%c56, %c0_92] : memref<88x128xf32, #tpu.memory_space<vmem>>, vector<1x128xf32>
    %c57 = arith.constant 57 : index
    %c0_93 = arith.constant 0 : index
    %113 = vector.load %arg15[%c57, %c0_93] : memref<88x128xf32, #tpu.memory_space<vmem>>, vector<1x128xf32>
    %114 = arith.maximumf %112, %113 : vector<1x128xf32>
    %115 = arith.maximumf %111, %114 : vector<1x128xf32>
    %c51 = arith.constant 51 : index
    %c0_94 = arith.constant 0 : index
    %116 = vector.load %arg15[%c51, %c0_94] : memref<88x128xf32, #tpu.memory_space<vmem>>, vector<1x128xf32>
    %c52 = arith.constant 52 : index
    %c0_95 = arith.constant 0 : index
    %117 = vector.load %arg15[%c52, %c0_95] : memref<88x128xf32, #tpu.memory_space<vmem>>, vector<1x128xf32>
    %118 = arith.maximumf %116, %117 : vector<1x128xf32>
    %c58 = arith.constant 58 : index
    %c0_96 = arith.constant 0 : index
    %119 = vector.load %arg15[%c58, %c0_96] : memref<88x128xf32, #tpu.memory_space<vmem>>, vector<1x128xf32>
    %c59 = arith.constant 59 : index
    %c0_97 = arith.constant 0 : index
    %120 = vector.load %arg15[%c59, %c0_97] : memref<88x128xf32, #tpu.memory_space<vmem>>, vector<1x128xf32>
    %121 = arith.maximumf %119, %120 : vector<1x128xf32>
    %122 = arith.maximumf %118, %121 : vector<1x128xf32>
    %c63 = arith.constant 63 : index
    %c0_98 = arith.constant 0 : index
    %123 = vector.load %arg15[%c63, %c0_98] : memref<88x128xf32, #tpu.memory_space<vmem>>, vector<1x128xf32>
    %c64 = arith.constant 64 : index
    %c0_99 = arith.constant 0 : index
    %124 = vector.load %arg15[%c64, %c0_99] : memref<88x128xf32, #tpu.memory_space<vmem>>, vector<1x128xf32>
    %125 = arith.maximumf %123, %124 : vector<1x128xf32>
    %c70 = arith.constant 70 : index
    %c0_100 = arith.constant 0 : index
    %126 = vector.load %arg15[%c70, %c0_100] : memref<88x128xf32, #tpu.memory_space<vmem>>, vector<1x128xf32>
    %c71 = arith.constant 71 : index
    %c0_101 = arith.constant 0 : index
    %127 = vector.load %arg15[%c71, %c0_101] : memref<88x128xf32, #tpu.memory_space<vmem>>, vector<1x128xf32>
    %128 = arith.maximumf %126, %127 : vector<1x128xf32>
    %129 = arith.maximumf %125, %128 : vector<1x128xf32>
    %c65 = arith.constant 65 : index
    %c0_102 = arith.constant 0 : index
    %130 = vector.load %arg15[%c65, %c0_102] : memref<88x128xf32, #tpu.memory_space<vmem>>, vector<1x128xf32>
    %c66 = arith.constant 66 : index
    %c0_103 = arith.constant 0 : index
    %131 = vector.load %arg15[%c66, %c0_103] : memref<88x128xf32, #tpu.memory_space<vmem>>, vector<1x128xf32>
    %132 = arith.maximumf %130, %131 : vector<1x128xf32>
    %c72 = arith.constant 72 : index
    %c0_104 = arith.constant 0 : index
    %133 = vector.load %arg15[%c72, %c0_104] : memref<88x128xf32, #tpu.memory_space<vmem>>, vector<1x128xf32>
    %c73 = arith.constant 73 : index
    %c0_105 = arith.constant 0 : index
    %134 = vector.load %arg15[%c73, %c0_105] : memref<88x128xf32, #tpu.memory_space<vmem>>, vector<1x128xf32>
    %135 = arith.maximumf %133, %134 : vector<1x128xf32>
    %136 = arith.maximumf %132, %135 : vector<1x128xf32>
    %137 = tpu.concatenate %115, %122, %129, %136 in 1 : vector<1x128xf32>, vector<1x128xf32>, vector<1x128xf32>, vector<1x128xf32> -> vector<1x512xf32>
    %138 = tpu.concatenate %108, %137 in 0 : vector<1x512xf32>, vector<1x512xf32> -> vector<2x512xf32>
    %c0_106 = arith.constant 0 : index
    %c0_107 = arith.constant 0 : index
    %139 = vector.load %arg9[%c0_106, %c0_107] : memref<512x128xf32, #tpu.memory_space<vmem>>, vector<512x128xf32>
    %cst_108 = arith.constant dense<0.000000e+00> : vector<2x128xf32>
    %140 = tpu.matmul %138, %139, %cst_108 {dimension_numbers = #tpu.dot_dimension_numbers<[1], [0], [0], [1], [0, 0, 1, 1], [], []>} : vector<2x512xf32>, vector<512x128xf32>, vector<2x128xf32> -> vector<2x128xf32>
    %c0_109 = arith.constant 0 : index
    %c0_110 = arith.constant 0 : index
    %141 = vector.load %arg10[%c0_109, %c0_110] : memref<1x128xf32, #tpu.memory_space<vmem>>, vector<1x128xf32>
    %142 = vector.broadcast %141 : vector<1x128xf32> to vector<2x128xf32>
    %143 = arith.addf %140, %142 : vector<2x128xf32>
    %cst_111 = arith.constant 0.000000e+00 : f32
    %144 = vector.broadcast %cst_111 : f32 to vector<2x128xf32>
    %145 = arith.maximumf %143, %144 : vector<2x128xf32>
    %c0_112 = arith.constant 0 : index
    %c0_113 = arith.constant 0 : index
    %146 = vector.load %arg11[%c0_112, %c0_113] : memref<128x128xf32, #tpu.memory_space<vmem>>, vector<128x128xf32>
    %cst_114 = arith.constant dense<0.000000e+00> : vector<2x128xf32>
    %147 = tpu.matmul %145, %146, %cst_114 {dimension_numbers = #tpu.dot_dimension_numbers<[1], [0], [0], [1], [0, 0, 1, 1], [], []>} : vector<2x128xf32>, vector<128x128xf32>, vector<2x128xf32> -> vector<2x128xf32>
    %c0_115 = arith.constant 0 : index
    %c0_116 = arith.constant 0 : index
    %148 = vector.load %arg12[%c0_115, %c0_116] : memref<1x128xf32, #tpu.memory_space<vmem>>, vector<1x128xf32>
    %149 = vector.broadcast %148 : vector<1x128xf32> to vector<2x128xf32>
    %150 = arith.addf %147, %149 : vector<2x128xf32>
    %cst_117 = arith.constant dense<0xFF800000> : vector<2xf32>
    %151 = vector.multi_reduction <maximumf>, %150, %cst_117 [1] : vector<2x128xf32> to vector<2xf32>
    %152 = vector.shape_cast %151 : vector<2xf32> to vector<2x1xf32>
    %153 = vector.broadcast %152 : vector<2x1xf32> to vector<2x128xf32>
    %154 = arith.subf %150, %153 : vector<2x128xf32>
    %155 = math.exp %154 : vector<2x128xf32>
    %cst_118 = arith.constant dense<0.000000e+00> : vector<2xf32>
    %156 = vector.multi_reduction <add>, %155, %cst_118 [1] : vector<2x128xf32> to vector<2xf32>
    %157 = vector.shape_cast %156 : vector<2xf32> to vector<2x1xf32>
    %158 = tpu.reciprocal %157 {approx = true} : vector<2x1xf32> -> vector<2x1xf32>
    %159 = vector.broadcast %158 : vector<2x1xf32> to vector<2x128xf32>
    %160 = arith.mulf %155, %159 : vector<2x128xf32>
    %c0_119 = arith.constant 0 : index
    %c0_120 = arith.constant 0 : index
    %161 = vector.load %arg13[%c0_119, %c0_120] : memref<2x128xf32, #tpu.memory_space<vmem>>, vector<2x128xf32>
    tpu.vector_store %arg13[%c0_119, %c0_120], %160 {strides = array<i32>} : memref<2x128xf32, #tpu.memory_space<vmem>>, vector<2x128xf32>,
    return
  }
}

</mosaic_0001>

<bundles_post_ra>
// kernel: classifier_forward.1
= control target key start
LH: loop header
LB: loop body
LE: loop exit
PB: predicated region body
PF: predicated region fallthrough
CT: control target
= control target key end

     0   :  { %vm108_vm0 = vcmask 261120   ;;  %s6032_s0 = inlined_call_operand.vmem [shape: f32[416,32], index: 0, kind: input, shape index: {}]   ;;  %s6033_s1 = inlined_call_operand.vmem [shape: f32[32,128], index: 1, kind: input, shape index: {}]   ;;  %s6034_s2 = inlined_call_operand.vmem [shape: f32[1,128], index: 2, kind: input, shape index: {}]   ;;  %s6035_s3 = inlined_call_operand.vmem [shape: f32[1,128], index: 3, kind: input, shape index: {}]   ;;  %s6036_s4 = inlined_call_operand.vmem [shape: f32[1,128], index: 4, kind: input, shape index: {}]   ;;  %s6037_s5 = inlined_call_operand.vmem [shape: f32[9,128,128], index: 5, kind: input, shape index: {}]   ;;  %s6038_s6 = inlined_call_operand.vmem [shape: f32[1,128], index: 6, kind: input, shape index: {}]   ;;  %s6039_s7 = inlined_call_operand.vmem [shape: f32[1,128], index: 7, kind: input, shape index: {}]   ;;  %s6040_s8 = inlined_call_operand.vmem [shape: f32[1,128], index: 8, kind: input, shape index: {}]   ;;  %s6041_s9 = inlined_call_operand.vmem [shape: f32[512,128], index: 9, kind: input, shape index: {}]   ;;  %s6042_s10 = inlined_call_operand.vmem [shape: f32[1,128], index: 10, kind: input, shape index: {}]   ;;  %s6043_s11 = inlined_call_operand.vmem [shape: f32[128,128], index: 11, kind: input, shape index: {}]   ;;  %s6044_s12 = inlined_call_operand.vmem [shape: f32[1,128], index: 12, kind: input, shape index: {}]   ;;  %s6045_s13 = inlined_call_operand.hbm [shape: f32[2,128], index: 13, kind: output, shape index: {}]  }
   0x1   :  { %v100_v0 = vld [vmem:[%s6033_s1 + $0x18] sm:$0xff]  ;;  %v99_v1 = vld [vmem:[%s6033_s1 + $0x10] sm:$0xff]  ;;  %v45_v2 = vld [vmem:[%s6032_s0] sm:$0xff] }
   0x2   :  { %3275 = vmatprep.subr.mxu0 %v100_v0  ;;  %v98_v3 = vld [vmem:[%s6033_s1 + $0x8] sm:$0xff]  ;;  %3283 = vmatprep.mubr.msk.f32.mxu0 %vm108_vm0, %v45_v2  ;;  %v97_v4 = vld [vmem:[%s6033_s1] sm:$0xff]  ;;  %v47_v6 = vld [vmem:[%s6032_s0 + $0x10] sm:$0xff] }
   0x3   :  { %3276 = vmatpush3.msra.mxu0 %v100_v0  ;;  %v46_v5 = vld [vmem:[%s6032_s0 + $0x8] sm:$0xff]  ;;  %v48_v7 = vld [vmem:[%s6032_s0 + $0x18] sm:$0xff]  ;;  %v49_v8 = vld [vmem:[%s6032_s0 + $0x20] sm:$0xff] }
   0x4   :  { %3277 = vmatprep.subr.mxu0 %v99_v1  ;;  %v50_v9 = vld [vmem:[%s6032_s0 + $0x28] sm:$0xff]  ;;  %v51_v10 = vld [vmem:[%s6032_s0 + $0x30] sm:$0xff]  ;;  %v52_v11 = vld [vmem:[%s6032_s0 + $0x38] sm:$0xff] }
   0x5   :  { %3278 = vmatpush3.msra.mxu0 %v99_v1 }
   0x6   :  { %3279 = vmatprep.subr.mxu0 %v98_v3 }
   0x7   :  { %3280 = vmatpush3.msra.mxu0 %v98_v3 }
   0x8   :  { %3281 = vmatprep.subr.mxu0 %v97_v4 }
   0x9   :  { %3282 = vmatpush3.msra.mxu0 %v97_v4 }
   0xa   :  { %3284 = vmatmul.mubr.msk.f32.vlgmr.msra.gmra.mxu0 %vm108_vm0, %v46_v5 }
   0xb   :  { %3286 = vmatprep.mubr.msk.f32.mxu0 %vm108_vm0, %v47_v6 }
   0xe   :  { %3287 = vmatmul.mubr.msk.f32.gmra.mxu0 %vm108_vm0, %v48_v7 }
   0xf   :  { %3289 = vmatprep.mubr.msk.f32.mxu0 %vm108_vm0, %v49_v8 }
  0x12   :  { %3290 = vmatmul.mubr.msk.f32.gmra.mxu0 %vm108_vm0, %v50_v9 }
  0x13   :  { %3292 = vmatprep.mubr.msk.f32.mxu0 %vm108_vm0, %v51_v10 }
  0x14   :  { %18 = vsyncpa [#allocation5], 0  ;;  %v53_v12 = vld [vmem:[%s6032_s0 + $0x40] sm:$0xff]  ;;  %v54_v13 = vld [vmem:[%s6032_s0 + $0x48] sm:$0xff]  ;;  %v6046_v57 = vmov 0.0   ;;  %vm4011_vm1 = vmmov 0  }
  0x15   :  { %v55_v14 = vld [vmem:[%s6032_s0 + $0x50] sm:$0xff]  ;;  %v56_v15 = vld [vmem:[%s6032_s0 + $0x58] sm:$0xff]  ;;  %v57_v16 = vld [vmem:[%s6032_s0 + $0x60] sm:$0xff]  ;;  %3491 = vmatprep.subr.mxu0 %v6046_v57  ;;  %3361 = vmatprep.subr.mxu1 %v6046_v57  ;;  %vm2364_vm2 = vcmask 1040384   ;;  %vm2674_vm3 = vcmask 1041408  }
  0x16   :  { %3293 = vmatmul.mubr.msk.f32.gmra.mxu0 %vm108_vm0, %v52_v11  ;;  %v58_v17 = vld [vmem:[%s6032_s0 + $0x68] sm:$0xff]  ;;  %v59_v18 = vld [vmem:[%s6032_s0 + $0x70] sm:$0xff]  ;;  %v60_v19 = vld [vmem:[%s6032_s0 + $0x78] sm:$0xff]  ;;  %3393 = vmatprep.mubr.msk.f32.mxu1 %vm4011_vm1, %v6046_v57 }
  0x17   :  { %3295 = vmatprep.mubr.msk.f32.mxu0 %vm108_vm0, %v53_v12  ;;  %v61_v20 = vld [vmem:[%s6032_s0 + $0x80] sm:$0xff]  ;;  %v62_v21 = vld [vmem:[%s6032_s0 + $0x88] sm:$0xff]  ;;  %v63_v22 = vld [vmem:[%s6032_s0 + $0x90] sm:$0xff] }
  0x18   :  { %v64_v23 = vld [vmem:[%s6032_s0 + $0x98] sm:$0xff]  ;;  %v65_v24 = vld [vmem:[%s6032_s0 + $0xa0] sm:$0xff]  ;;  %v66_v25 = vld [vmem:[%s6032_s0 + $0xa8] sm:$0xff] }
  0x19   :  { %v67_v26 = vld [vmem:[%s6032_s0 + $0xb0] sm:$0xff]  ;;  %v68_v27 = vld [vmem:[%s6032_s0 + $0xb8] sm:$0xff]  ;;  %v69_v28 = vld [vmem:[%s6032_s0 + $0xc0] sm:$0xff] }
  0x1a   :  { %3296 = vmatmul.mubr.msk.f32.gmra.mxu0 %vm108_vm0, %v54_v13  ;;  %v70_v29 = vld [vmem:[%s6032_s0 + $0xc8] sm:$0xff]  ;;  %v71_v30 = vld [vmem:[%s6032_s0 + $0xd0] sm:$0xff]  ;;  %v72_v31 = vld [vmem:[%s6032_s0 + $0xd8] sm:$0xff] }
  0x1b   :  { %3298 = vmatprep.mubr.msk.f32.mxu0 %vm108_vm0, %v55_v14  ;;  %v73_v32 = vld [vmem:[%s6032_s0 + $0xe0] sm:$0xff]  ;;  %v74_v33 = vld [vmem:[%s6032_s0 + $0xe8] sm:$0xff]  ;;  %v75_v34 = vld [vmem:[%s6032_s0 + $0xf0] sm:$0xff] }
  0x1c   :  { %v76_v35 = vld [vmem:[%s6032_s0 + $0xf8] sm:$0xff]  ;;  %v77_v36 = vld [vmem:[%s6032_s0 + $0x100] sm:$0xff]  ;;  %v78_v37 = vld [vmem:[%s6032_s0 + $0x108] sm:$0xff] }
  0x1d   :  { %v79_v38 = vld [vmem:[%s6032_s0 + $0x110] sm:$0xff]  ;;  %v80_v39 = vld [vmem:[%s6032_s0 + $0x118] sm:$0xff]  ;;  %v81_v40 = vld [vmem:[%s6032_s0 + $0x120] sm:$0xff] }
  0x1e   :  { %3299 = vmatmul.mubr.msk.f32.gmra.mxu0 %vm108_vm0, %v56_v15  ;;  %v82_v41 = vld [vmem:[%s6032_s0 + $0x128] sm:$0xff]  ;;  %v83_v42 = vld [vmem:[%s6032_s0 + $0x130] sm:$0xff]  ;;  %v84_v43 = vld [vmem:[%s6032_s0 + $0x138] sm:$0xff] }
  0x1f   :  { %3301 = vmatprep.mubr.msk.f32.mxu0 %vm108_vm0, %v57_v16  ;;  %v85_v44 = vld [vmem:[%s6032_s0 + $0x140] sm:$0xff]  ;;  %v86_v45 = vld [vmem:[%s6032_s0 + $0x148] sm:$0xff]  ;;  %v87_v46 = vld [vmem:[%s6032_s0 + $0x150] sm:$0xff] }
  0x20   :  { %v88_v47 = vld [vmem:[%s6032_s0 + $0x158] sm:$0xff]  ;;  %v89_v48 = vld [vmem:[%s6032_s0 + $0x160] sm:$0xff]  ;;  %v90_v49 = vld [vmem:[%s6032_s0 + $0x168] sm:$0xff] }
  0x21   :  { %v91_v50 = vld [vmem:[%s6032_s0 + $0x170] sm:$0xff]  ;;  %v92_v51 = vld [vmem:[%s6032_s0 + $0x178] sm:$0xff]  ;;  %v93_v52 = vld [vmem:[%s6032_s0 + $0x180] sm:$0xff] }
  0x22   :  { %3302 = vmatmul.mubr.msk.f32.gmra.mxu0 %vm108_vm0, %v58_v17  ;;  %v94_v53 = vld [vmem:[%s6032_s0 + $0x188] sm:$0xff]  ;;  %v95_v54 = vld [vmem:[%s6032_s0 + $0x190] sm:$0xff]  ;;  %v96_v55 = vld [vmem:[%s6032_s0 + $0x198] sm:$0xff] }
  0x23   :  { %3304 = vmatprep.mubr.msk.f32.mxu0 %vm108_vm0, %v59_v18  ;;  %v2787_v56 = vld [vmem:[%s6037_s5 + $0x178] sm:$0xff]  ;;  %v2786_v58 = vld [vmem:[%s6037_s5 + $0x170] sm:$0xff]  ;;  %v2785_v59 = vld [vmem:[%s6037_s5 + $0x168] sm:$0xff] }
  0x24   :  { %3492 = vmatpush3.msra.mxu0 %v2787_v56  ;;  %v2784_v60 = vld [vmem:[%s6037_s5 + $0x160] sm:$0xff]  ;;  %v2771_v61 = vld [vmem:[%s6037_s5 + $0xf8] sm:$0xff]  ;;  %v2770_v62 = vld [vmem:[%s6037_s5 + $0xf0] sm:$0xff] }
  0x25   :  { %3493 = vmatprep.subr.mxu0 %v6046_v57  ;;  %3362 = vmatpush3.msra.mxu1 %v2771_v61  ;;  %v2769_v63 = vld [vmem:[%s6037_s5 + $0xe8] sm:$0xff]  ;;  %v2783_v0 = vld [vmem:[%s6037_s5 + $0x158] sm:$0xff]  ;;  %v2768_v1 = vld [vmem:[%s6037_s5 + $0xe0] sm:$0xff] }
  0x26   :  { %3305 = vmatmul.mubr.msk.f32.gmra.mxu0 %vm108_vm0, %v60_v19  ;;  %3363 = vmatprep.subr.mxu1 %v6046_v57  ;;  %v2767_v2 = vld [vmem:[%s6037_s5 + $0xd8] sm:$0xff]  ;;  %v2782_v3 = vld [vmem:[%s6037_s5 + $0x150] sm:$0xff]  ;;  %v2765_v5 = vld [vmem:[%s6037_s5 + $0xc8] sm:$0xff] }
  0x27   :  { %3307 = vmatprep.mubr.msk.f32.mxu0 %vm108_vm0, %v61_v20  ;;  %3494 = vmatpush3.msra.mxu0 %v2786_v58  ;;  %v2766_v4 = vld [vmem:[%s6037_s5 + $0xd0] sm:$0xff]  ;;  %v2781_v6 = vld [vmem:[%s6037_s5 + $0x148] sm:$0xff]  ;;  %v2764_v7 = vld [vmem:[%s6037_s5 + $0xc0] sm:$0xff] }
  0x28   :  { %3495 = vmatprep.subr.mxu0 %v6046_v57  ;;  %3364 = vmatpush3.msra.mxu1 %v2770_v62  ;;  %v2780_v8 = vld [vmem:[%s6037_s5 + $0x140] sm:$0xff]  ;;  %v2763_v9 = vld [vmem:[%s6037_s5 + $0xb8] sm:$0xff]  ;;  %v2762_v11 = vld [vmem:[%s6037_s5 + $0xb0] sm:$0xff] }
  0x29   :  { %3496 = vmatpush3.msra.mxu0 %v2785_v59  ;;  %3365 = vmatprep.subr.mxu1 %v6046_v57  ;;  %v2779_v10 = vld [vmem:[%s6037_s5 + $0x138] sm:$0xff]  ;;  %v2778_v12 = vld [vmem:[%s6037_s5 + $0x130] sm:$0xff]  ;;  %v2761_v13 = vld [vmem:[%s6037_s5 + $0xa8] sm:$0xff] }
  0x2a   :  { %3308 = vmatmul.mubr.msk.f32.gmra.mxu0 %vm108_vm0, %v62_v21  ;;  %3497 = vmatprep.subr.mxu0 %v6046_v57  ;;  %v2777_v14 = vld [vmem:[%s6037_s5 + $0x128] sm:$0xff]  ;;  %v2760_v15 = vld [vmem:[%s6037_s5 + $0xa0] sm:$0xff]  ;;  %v2759_v17 = vld [vmem:[%s6037_s5 + $0x98] sm:$0xff] }
  0x2b   :  { %3310 = vmatprep.mubr.msk.f32.mxu0 %vm108_vm0, %v63_v22  ;;  %3498 = vmatpush3.msra.mxu0 %v2784_v60  ;;  %v2776_v16 = vld [vmem:[%s6037_s5 + $0x120] sm:$0xff]  ;;  %v2775_v18 = vld [vmem:[%s6037_s5 + $0x118] sm:$0xff]  ;;  %v2758_v19 = vld [vmem:[%s6037_s5 + $0x90] sm:$0xff] }
  0x2c   :  { %3499 = vmatprep.subr.mxu0 %v6046_v57  ;;  %3366 = vmatpush3.msra.mxu1 %v2769_v63  ;;  %v2774_v20 = vld [vmem:[%s6037_s5 + $0x110] sm:$0xff]  ;;  %v2757_v21 = vld [vmem:[%s6037_s5 + $0x88] sm:$0xff]  ;;  %v4460_v58 = vld [vmem:[%s6035_s3] ss:$0 sm:$0xff] }
  0x2d   :  { %3500 = vmatpush3.msra.mxu0 %v2783_v0  ;;  %3367 = vmatprep.subr.mxu1 %v6046_v57  ;;  %v2773_v22 = vld [vmem:[%s6037_s5 + $0x108] sm:$0xff] }
  0x2e   :  { %3311 = vmatmul.mubr.msk.f32.gmra.mxu0 %vm108_vm0, %v64_v23  ;;  %3368 = vmatpush3.msra.mxu1 %v2768_v1  ;;  %v2756_v23 = vld [vmem:[%s6037_s5 + $0x80] sm:$0xff] }
  0x2f   :  { %3313 = vmatprep.mubr.msk.f32.mxu0 %vm108_vm0, %v65_v24  ;;  %3501 = vmatprep.subr.mxu0 %v6046_v57  ;;  %v2772_v24 = vld [vmem:[%s6037_s5 + $0x100] sm:$0xff] }
  0x30   :  { %3369 = vmatprep.subr.mxu1 %v6046_v57  ;;  %3502 = vmatpush3.msra.mxu0 %v2782_v3 }
  0x31   :  { %3370 = vmatpush3.msra.mxu1 %v2767_v2  ;;  %3503 = vmatprep.subr.mxu0 %v6046_v57 }
  0x32   :  { %3314 = vmatmul.mubr.msk.f32.gmra.mxu0 %vm108_vm0, %v66_v25  ;;  %3371 = vmatprep.subr.mxu1 %v6046_v57 }
  0x33   :  { %3316 = vmatprep.mubr.msk.f32.mxu0 %vm108_vm0, %v67_v26  ;;  %3372 = vmatpush3.msra.mxu1 %v2766_v4  ;;  %v4473_v4 = vld [vmem:[%s6036_s4] ss:$0 sm:$0xff] }
  0x34   :  { %3373 = vmatprep.subr.mxu1 %v6046_v57  ;;  %3504 = vmatpush3.msra.mxu0 %v2781_v6 }
  0x35   :  { %3374 = vmatpush3.msra.mxu1 %v2765_v5  ;;  %3505 = vmatprep.subr.mxu0 %v6046_v57 }
  0x36   :  { %3317 = vmatmul.mubr.msk.f32.gmra.mxu0 %vm108_vm0, %v68_v27  ;;  %3375 = vmatprep.subr.mxu1 %v6046_v57 }
  0x37   :  { %3319 = vmatprep.mubr.msk.f32.mxu0 %vm108_vm0, %v69_v28  ;;  %3376 = vmatpush3.msra.mxu1 %v2764_v7 }
  0x38   :  { %3506 = vmatpush3.msra.mxu0 %v2780_v8  ;;  %3377 = vmatprep.subr.mxu1 %v6046_v57 }
  0x39   :  { %3507 = vmatprep.subr.mxu0 %v6046_v57  ;;  %3378 = vmatpush3.msra.mxu1 %v2763_v9 }
  0x3a   :  { %3320 = vmatmul.mubr.msk.f32.gmra.mxu0 %vm108_vm0, %v70_v29  ;;  %3379 = vmatprep.subr.mxu1 %v6046_v57 }
  0x3b   :  { %3322 = vmatprep.mubr.msk.f32.mxu0 %vm108_vm0, %v71_v30  ;;  %3508 = vmatpush3.msra.mxu0 %v2779_v10 }
  0x3c   :  { %3509 = vmatprep.subr.mxu0 %v6046_v57  ;;  %3380 = vmatpush3.msra.mxu1 %v2762_v11 }
  0x3d   :  { %3510 = vmatpush3.msra.mxu0 %v2778_v12  ;;  %3381 = vmatprep.subr.mxu1 %v6046_v57 }
  0x3e   :  { %3323 = vmatmul.mubr.msk.f32.gmra.mxu0 %vm108_vm0, %v72_v31  ;;  %3511 = vmatprep.subr.mxu0 %v6046_v57 }
  0x3f   :  { %3325 = vmatprep.mubr.msk.f32.mxu0 %vm108_vm0, %v73_v32  ;;  %3382 = vmatpush3.msra.mxu1 %v2761_v13 }
  0x40   :  { %3512 = vmatpush3.msra.mxu0 %v2777_v14  ;;  %3383 = vmatprep.subr.mxu1 %v6046_v57 }
  0x41   :  { %3513 = vmatprep.subr.mxu0 %v6046_v57  ;;  %3384 = vmatpush3.msra.mxu1 %v2760_v15 }
  0x42   :  { %3326 = vmatmul.mubr.msk.f32.gmra.mxu0 %vm108_vm0, %v74_v33  ;;  %3385 = vmatprep.subr.mxu1 %v6046_v57 }
  0x43   :  { %3328 = vmatprep.mubr.msk.f32.mxu0 %vm108_vm0, %v75_v34  ;;  %3514 = vmatpush3.msra.mxu0 %v2776_v16 }
  0x44   :  { %3515 = vmatprep.subr.mxu0 %v6046_v57  ;;  %3386 = vmatpush3.msra.mxu1 %v2759_v17 }
  0x45   :  { %3516 = vmatpush3.msra.mxu0 %v2775_v18  ;;  %3387 = vmatprep.subr.mxu1 %v6046_v57 }
  0x46   :  { %3329 = vmatmul.mubr.msk.f32.gmra.mxu0 %vm108_vm0, %v76_v35  ;;  %3517 = vmatprep.subr.mxu0 %v6046_v57 }
  0x47   :  { %3331 = vmatprep.mubr.msk.f32.mxu0 %vm108_vm0, %v77_v36  ;;  %3388 = vmatpush3.msra.mxu1 %v2758_v19 }
  0x48   :  { %3518 = vmatpush3.msra.mxu0 %v2774_v20  ;;  %3389 = vmatprep.subr.mxu1 %v6046_v57 }
  0x49   :  { %3519 = vmatprep.subr.mxu0 %v6046_v57  ;;  %3390 = vmatpush3.msra.mxu1 %v2757_v21 }
  0x4a   :  { %3332 = vmatmul.mubr.msk.f32.gmra.mxu0 %vm108_vm0, %v78_v37  ;;  %3391 = vmatprep.subr.mxu1 %v6046_v57 }
  0x4b   :  { %3334 = vmatprep.mubr.msk.f32.mxu0 %vm108_vm0, %v79_v38  ;;  %3520 = vmatpush3.msra.mxu0 %v2773_v22 }
  0x4c   :  { %3521 = vmatprep.subr.mxu0 %v6046_v57  ;;  %3392 = vmatpush3.msra.mxu1 %v2756_v23 }
  0x4d   :  { %3426 = vmatprep.subr.mxu1 %v6046_v57  ;;  %3522 = vmatpush3.msra.mxu0 %v2772_v24 }
  0x4e   :  { %3335 = vmatmul.mubr.msk.f32.gmra.mxu0 %vm108_vm0, %v80_v39  ;;  %3621 = vmatprep.subr.mxu0 %v6046_v57 }
  0x4f   :  { %3337 = vmatprep.mubr.msk.f32.mxu0 %vm108_vm0, %v81_v40 }
  0x52   :  { %3338 = vmatmul.mubr.msk.f32.gmra.mxu0 %vm108_vm0, %v82_v41 }
  0x53   :  { %3340 = vmatprep.mubr.msk.f32.mxu0 %vm108_vm0, %v83_v42 }
  0x56   :  { %3341 = vmatmul.mubr.msk.f32.gmra.mxu0 %vm108_vm0, %v84_v43 }
  0x57   :  { %3343 = vmatprep.mubr.msk.f32.mxu0 %vm108_vm0, %v85_v44 }
  0x5a   :  { %3344 = vmatmul.mubr.msk.f32.gmra.mxu0 %vm108_vm0, %v86_v45  ;;  %v4442_v45 = vld [vmem:[%s6034_s2] ss:$0 sm:$0xff] }
  0x5b   :  { %3346 = vmatprep.mubr.msk.f32.mxu0 %vm108_vm0, %v87_v46 }
  0x5e   :  { %3347 = vmatmul.mubr.msk.f32.gmra.mxu0 %vm108_vm0, %v88_v47 }
  0x5f   :  { %3349 = vmatprep.mubr.msk.f32.mxu0 %vm108_vm0, %v89_v48 }
  0x62   :  { %3350 = vmatmul.mubr.msk.f32.gmra.mxu0 %vm108_vm0, %v90_v49 }
  0x63   :  { %3352 = vmatprep.mubr.msk.f32.mxu0 %vm108_vm0, %v91_v50 }
  0x66   :  { %3353 = vmatmul.mubr.msk.f32.gmra.mxu0 %vm108_vm0, %v92_v51 }
  0x67   :  { %3355 = vmatprep.mubr.msk.f32.mxu0 %vm108_vm0, %v93_v52 }
  0x6a   :  { %3356 = vmatmul.mubr.msk.f32.gmra.mxu0 %vm108_vm0, %v94_v53 }
  0x6b   :  { %3358 = vmatprep.mubr.msk.f32.mxu0 %vm108_vm0, %v95_v54 }
  0x6e   :  { %3359 = vmatmul.mubr.msk.f32.gmra.mxu0 %vm108_vm0, %v96_v55 }
  0x6f   :  { %3523 = vmatprep.mubr.msk.f32.mxu0 %vm4011_vm1, %v6046_v57 }
  0xca   :  { %v3285_v25 = vpop.f32.mrf.mxu0 }
  0xcb   :  { %v337_v47 = vadd.f32 %v3285_v25, %v4442_v45 }
  0xcc   :  { %v331_v26 = vpop.f32.mrf.mxu0 }
  0xcd   :  { %v332_v48 = vadd.f32 %v4442_v45, %v331_v26  ;;  %v591_v54 = vmax.f32 %v337_v47, 0.0 }
  0xce   :  { %v3288_v27 = vpop.f32.mrf.mxu0 }
  0xcf   :  { %v347_v50 = vadd.f32 %v3288_v27, %v4442_v45  ;;  %v590_v55 = vmax.f32 %v332_v48, 0.0  ;;  %v650_v1 = vmul.f32 %v4460_v58, %v591_v54 }
  0xd0   :  { %v341_v28 = vpop.f32.mrf.mxu0 }
  0xd1   :  { %v342_v51 = vadd.f32 %v4442_v45, %v341_v28  ;;  %v593_v59 = vmax.f32 %v347_v50, 0.0  ;;  %v649_v2 = vmul.f32 %v4460_v58, %v590_v55  ;;  %v4484_v14 = vadd.f32 %v4473_v4, %v650_v1 }
  0xd2   :  { %v3291_v29 = vpop.f32.mrf.mxu0 }
  0xd3   :  { %v357_v53 = vadd.f32 %v3291_v29, %v4442_v45  ;;  %v592_v60 = vmax.f32 %v342_v51, 0.0  ;;  %v652_v5 = vmul.f32 %v4460_v58, %v593_v59  ;;  %v4487_v15 = vadd.f32 %v4473_v4, %v649_v2 }
  0xd4   :  { %v351_v30 = vpop.f32.mrf.mxu0 }
  0xd5   :  { %v352_v61 = vadd.f32 %v4442_v45, %v351_v30  ;;  %v595_v0 = vmax.f32 %v357_v53, 0.0  ;;  %v651_v6 = vmul.f32 %v4460_v58, %v592_v60  ;;  %v4493_v18 = vadd.f32 %v4473_v4, %v652_v5 }
  0xd6   :  { %v3294_v31 = vpop.f32.mrf.mxu0 }
  0xd7   :  { %v367_v62 = vadd.f32 %v3294_v31, %v4442_v45  ;;  %v594_v7 = vmax.f32 %v352_v61, 0.0  ;;  %v654_v11 = vmul.f32 %v4460_v58, %v595_v0  ;;  %v4496_v19 = vadd.f32 %v4473_v4, %v651_v6 }
  0xd8   :  { %v361_v32 = vpop.f32.mrf.mxu0 }
  0xd9   :  { %v597_v8 = vmax.f32 %v367_v62, 0.0  ;;  %v362_v9 = vadd.f32 %v4442_v45, %v361_v32  ;;  %v653_v20 = vmul.f32 %v4460_v58, %v594_v7  ;;  %v4506_v27 = vadd.f32 %v4473_v4, %v654_v11 }
  0xda   :  { %v3297_v33 = vpop.f32.mrf.mxu0 }
  0xdb   :  { %v377_v12 = vadd.f32 %v3297_v33, %v4442_v45  ;;  %v656_v21 = vmul.f32 %v4460_v58, %v597_v8  ;;  %v596_v22 = vmax.f32 %v362_v9, 0.0 }
  0xdc   :  { %v371_v34 = vpop.f32.mrf.mxu0 }
  0xdd   :  { %v372_v16 = vadd.f32 %v4442_v45, %v371_v34  ;;  %v599_v28 = vmax.f32 %v377_v12, 0.0  ;;  %v655_v47 = vmul.f32 %v4460_v58, %v596_v22 }
  0xde   :  { %v4437_v35 = vpop.f32.mrf.mxu0 }
  0xdf   :  { %v598_v31 = vmax.f32 %v372_v16, 0.0  ;;  %v4536_v2 = vadd.f32 %v4473_v4, %v655_v47 }
  0xe0   :  { %v381_v36 = vpop.f32.mrf.mxu0 }
  0xe1   :  { %v382_v23 = vadd.f32 %v4442_v45, %v381_v36  ;;  %v657_v55 = vmul.f32 %v4460_v58, %v598_v31 }
  0xe2   :  { %v3303_v37 = vpop.f32.mrf.mxu0 }
  0xe3   :  { %v397_v13 = vadd.f32 %v3303_v37, %v4442_v45  ;;  %v4515_v37 = vadd.f32 %v4473_v4, %v653_v20 }
  0xe4   :  { %v391_v38 = vpop.f32.mrf.mxu0 }
  0xe5   :  { %v603_v29 = vmax.f32 %v397_v13, 0.0  ;;  %v392_v32 = vadd.f32 %v4442_v45, %v391_v38  ;;  %v600_v38 = vmax.f32 %v382_v23, 0.0 }
  0xe6   :  { %v3306_v39 = vpop.f32.mrf.mxu0 }
  0xe7   :  { %v407_v24 = vadd.f32 %v3306_v39, %v4442_v45  ;;  %v4518_v39 = vadd.f32 %v4473_v4, %v656_v21  ;;  %v662_v51 = vmul.f32 %v4460_v58, %v603_v29  ;;  %v659_v5 = vmul.f32 %v4460_v58, %v600_v38 }
  0xe8   :  { %v401_v40 = vpop.f32.mrf.mxu0 }
  0xe9   :  { %v402_v25 = vadd.f32 %v4442_v45, %v401_v40  ;;  %v387_v40 = vadd.f32 %v4437_v35, %v4442_v45  ;;  %v605_v48 = vmax.f32 %v407_v24, 0.0  ;;  %v602_v35 = vmax.f32 %v392_v32, 0.0 }
  0xea   :  { %v3309_v41 = vpop.f32.mrf.mxu0  ;;  %v4545_v9 = vadd.f32 %v4473_v4, %v662_v51 }
  0xeb   :  { %v417_v30 = vadd.f32 %v3309_v41, %v4442_v45  ;;  %v601_v61 = vmax.f32 %v387_v40, 0.0  ;;  %v661_v12 = vmul.f32 %v4460_v58, %v602_v35 }
  0xec   :  { %v411_v42 = vpop.f32.mrf.mxu0  ;;  %v760_v32 = vmax.f32 %v4487_v15, %v4545_v9 }
  0xed   :  { %v412_v33 = vadd.f32 %v4442_v45, %v411_v42  ;;  %v604_v42 = vmax.f32 %v402_v25, 0.0  ;;  %v607_v53 = vmax.f32 %v417_v30, 0.0  ;;  %v4555_v21 = vmul.f32 %v4460_v58, %v601_v61 }
  0xee   :  { %v3312_v43 = vpop.f32.mrf.mxu0  ;;  %v4559_v25 = vadd.f32 %v4473_v4, %v659_v5 }
  0xef   :  { %v427_v34 = vadd.f32 %v3312_v43, %v4442_v45  ;;  %v658_v43 = vmul.f32 %v4460_v58, %v599_v28  ;;  %v606_v59 = vmax.f32 %v412_v33, 0.0  ;;  %v663_v6 = vmul.f32 %v4460_v58, %v604_v42 }
  0xf0   :  { %v421_v44 = vpop.f32.mrf.mxu0 }
  0xf1   :  { %v422_v41 = vadd.f32 %v4442_v45, %v421_v44  ;;  %v609_v44 = vmax.f32 %v427_v34, 0.0  ;;  %v4542_v8 = vadd.f32 %v4473_v4, %v658_v43  ;;  %v665_v13 = vmul.f32 %v4460_v58, %v606_v59 }
  0xf2   :  { %v4444_v46 = vpop.f32.mrf.mxu0  ;;  %v4565_v29 = vadd.f32 %v4473_v4, %v663_v6 }
  0xf3   :  { %v437_v54 = vadd.f32 %v4444_v46, %v4442_v45  ;;  %v608_v62 = vmax.f32 %v422_v41, 0.0  ;;  %v664_v46 = vmul.f32 %v4460_v58, %v605_v48  ;;  %v668_v16 = vmul.f32 %v4460_v58, %v609_v44 }
  0xf4   :  { %v4448_v49 = vpop.f32.mrf.mxu0  ;;  %v4580_v41 = vadd.f32 %v4473_v4, %v661_v12  ;;  %v4583_v47 = vadd.f32 %v4473_v4, %v665_v13 }
  0xf5   :  { %v432_v0 = vadd.f32 %v4442_v45, %v4448_v49  ;;  %v666_v49 = vmul.f32 %v4460_v58, %v607_v53  ;;  %v611_v11 = vmax.f32 %v437_v54, 0.0  ;;  %v667_v22 = vmul.f32 %v4460_v58, %v608_v62 }
  0xf6   :  { %v4452_v52 = vpop.f32.mrf.mxu0  ;;  %v4562_v28 = vadd.f32 %v4473_v4, %v664_v46  ;;  %v761_v54 = vmax.f32 %v4484_v14, %v4565_v29  ;;  %v763_v62 = vmax.f32 %v4493_v18, %v4583_v47 }
  0xf7   :  { %v447_v1 = vadd.f32 %v4452_v52, %v4442_v45  ;;  %v4549_v52 = vadd.f32 %v4473_v4, %v657_v55  ;;  %v610_v23 = vmax.f32 %v432_v0, 0.0  ;;  %v4574_v33 = vadd.f32 %v4473_v4, %v666_v49 }
  0xf8   :  { %v4455_v56 = vpop.f32.mrf.mxu0  ;;  %v670_v34 = vmul.f32 %v4460_v58, %v611_v11  ;;  %v4593_v42 = vadd.f32 %v4473_v4, %v667_v22  ;;  %v762_v53 = vmax.f32 %v4496_v19, %v4562_v28 }
  0xf9   :  { %v613_v24 = vmax.f32 %v447_v1, 0.0  ;;  %v442_v30 = vadd.f32 %v4442_v45, %v4455_v56  ;;  %v4586_v56 = vadd.f32 %v4473_v4, %v668_v16  ;;  %v669_v43 = vmul.f32 %v4460_v58, %v610_v23 }
  0xfa   :  { %v4464_v63 = vpop.f32.mrf.mxu0  ;;  %v764_v59 = vmax.f32 %v4515_v37, %v4574_v33  ;;  %v4610_v44 = vadd.f32 %v4473_v4, %v670_v34  ;;  %v765_v46 = vmax.f32 %v4506_v27, %v4593_v42  ;;  %v837_v27 = vld [vmem:[%s6037_s5 + $0x70] sm:$0xff]  ;;  %v2819_v42 = vld [vmem:[%s6037_s5 + $0x278] sm:$0xff] }
  0xfb   :  { %v457_v40 = vadd.f32 %v4464_v63, %v4442_v45  ;;  %v672_v63 = vmul.f32 %v4460_v58, %v613_v24  ;;  %v612_v55 = vmax.f32 %v442_v30, 0.0  ;;  %v766_v0 = vmax.f32 %v4536_v2, %v4586_v56 }
  0xfc   :  { %v4468_v3 = vpop.f32.mrf.mxu0  ;;  %v4625_v6 = vadd.f32 %v4473_v4, %v669_v43  ;;  %v768_v22 = vmax.f32 %v4549_v52, %v4610_v44 }
  0xfd   :  { %v615_v61 = vmax.f32 %v457_v40, 0.0  ;;  %v671_v11 = vmul.f32 %v4460_v58, %v612_v55 }
  0xfe   :  { %v4478_v10 = vpop.f32.mrf.mxu0 }
  0xff   :  { %v467_v38 = vadd.f32 %v4478_v10, %v4442_v45  ;;  %v674_v23 = vmul.f32 %v4460_v58, %v615_v61 }
 0x100   :  { %v4490_v17 = vpop.f32.mrf.mxu0 }
 0x101   :  { %v462_v51 = vadd.f32 %v4442_v45, %v4490_v17  ;;  %v617_v1 = vmax.f32 %v467_v38, 0.0 }
 0x102   :  { %v4503_v26 = vpop.f32.mrf.mxu0 }
 0x103   :  { %v477_v10 = vadd.f32 %v4503_v26, %v4442_v45  ;;  %v452_v26 = vadd.f32 %v4442_v45, %v4468_v3  ;;  %v616_v49 = vmax.f32 %v462_v51, 0.0  ;;  %v676_v40 = vmul.f32 %v4460_v58, %v617_v1 }
 0x104   :  { %v4512_v36 = vpop.f32.mrf.mxu0 }
 0x105   :  { %v472_v17 = vadd.f32 %v4442_v45, %v4512_v36  ;;  %v4628_v36 = vadd.f32 %v4473_v4, %v672_v63  ;;  %v619_v12 = vmax.f32 %v477_v10, 0.0  ;;  %v614_v34 = vmax.f32 %v452_v26, 0.0 }
 0x106   :  { %v4524_v50 = vpop.f32.mrf.mxu0  ;;  %v675_v51 = vmul.f32 %v4460_v58, %v616_v49  ;;  %v4649_v10 = vadd.f32 %v4473_v4, %v671_v11  ;;  %v735_v11 = vadd.f32 %v4473_v4, %v676_v40 }
 0x107   :  { %v487_v13 = vadd.f32 %v4524_v50, %v4442_v45  ;;  %v618_v24 = vmax.f32 %v472_v17, 0.0  ;;  %v678_v61 = vmul.f32 %v4460_v58, %v619_v12  ;;  %v4659_v49 = vmul.f32 %v4460_v58, %v614_v34 }
 0x108   :  { %v481_v60 = vpop.f32.mrf.mxu0 }
 0x109   :  { %v482_v3 = vadd.f32 %v4442_v45, %v481_v60  ;;  %v621_v17 = vmax.f32 %v487_v13, 0.0  ;;  %v677_v1 = vmul.f32 %v4460_v58, %v618_v24  ;;  %v734_v13 = vadd.f32 %v4473_v4, %v675_v51 }
 0x10a   :  { %v3333_v7 = vpop.f32.mrf.mxu0  ;;  %v4666_v24 = vadd.f32 %v4473_v4, %v678_v61 }
 0x10b   :  { %v497_v38 = vadd.f32 %v3333_v7, %v4442_v45  ;;  %v620_v7 = vmax.f32 %v482_v3, 0.0 }
 0x10c   :  { %v491_v20 = vpop.f32.mrf.mxu0 }
 0x10d   :  { %v492_v43 = vadd.f32 %v4442_v45, %v491_v20  ;;  %v4653_v20 = vadd.f32 %v4473_v4, %v674_v23  ;;  %v679_v34 = vmul.f32 %v4460_v58, %v620_v7 }
 0x10e   :  { %v4569_v31 = vpop.f32.mrf.mxu0 }
 0x10f   :  { %v622_v50 = vmax.f32 %v492_v43, 0.0  ;;  %v507_v40 = vadd.f32 %v4569_v31, %v4442_v45  ;;  %v736_v43 = vadd.f32 %v4473_v4, %v677_v1 }
 0x110   :  { %v4590_v48 = vpop.f32.mrf.mxu0 }
 0x111   :  { %v502_v61 = vadd.f32 %v4442_v45, %v4590_v48  ;;  %v625_v48 = vmax.f32 %v507_v40, 0.0 }
 0x112   :  { %v4605_v35 = vpop.f32.mrf.mxu0 }
 0x114   :  { %v4620_v5 = vpop.f32.mrf.mxu0 }
 0x116   :  { %v3342_v16 = vpop.f32.mrf.mxu0 }
 0x117   :  { %v527_v30 = vadd.f32 %v3342_v16, %v4442_v45 }
 0x118   :  { %v4641_v63 = vpop.f32.mrf.mxu0 }
 0x119   :  { %v629_v55 = vmax.f32 %v527_v30, 0.0  ;;  %v623_v30 = vmax.f32 %v497_v38, 0.0 }
 0x11a   :  { %v3345_v26 = vpop.f32.mrf.mxu0 }
 0x11b   :  { %v688_v16 = vmul.f32 %v4460_v58, %v629_v55  ;;  %v537_v60 = vadd.f32 %v3345_v26, %v4442_v45  ;;  %v680_v55 = vmul.f32 %v4460_v58, %v621_v17 }
 0x11c   :  { %v531_v12 = vpop.f32.mrf.mxu0 }
 0x11d   :  { %v747_v3 = vadd.f32 %v4473_v4, %v688_v16  ;;  %v631_v23 = vmax.f32 %v537_v60, 0.0  ;;  %v532_v57 = vadd.f32 %v4442_v45, %v531_v12  ;;  %v682_v60 = vmul.f32 %v4460_v58, %v623_v30 }
 0x11e   :  { %v3348_v38 = vpop.f32.mrf.mxu0  ;;  %v681_v12 = vmul.f32 %v4460_v58, %v622_v50  ;;  %v4688_v30 = vadd.f32 %v4473_v4, %v680_v55  ;;  %v738_v50 = vadd.f32 %v4473_v4, %v679_v34  ;;  %v624_v55 = vmax.f32 %v502_v61, 0.0 }
 0x11f   :  { %v773_v26 = vmax.f32 %v734_v13, %v747_v3  ;;  %v690_v51 = vmul.f32 %v4460_v58, %v631_v23  ;;  %v630_v16 = vmax.f32 %v532_v57, 0.0  ;;  %v547_v17 = vadd.f32 %v3348_v38, %v4442_v45 }
 0x120   :  { %v541_v7 = vpop.f32.mrf.mxu0 }
 0x121   :  { %v4682_v31 = vmax.f32 %v760_v32, %v773_v26  ;;  %v749_v1 = vadd.f32 %v4473_v4, %v690_v51  ;;  %v689_v13 = vmul.f32 %v4460_v58, %v630_v16  ;;  %v542_v57 = vadd.f32 %v4442_v45, %v541_v7 }
 0x122   :  { %v633_v3 = vmax.f32 %v547_v17, 0.0  ;;  %v3351_v23 = vpop.f32.mrf.mxu0  ;;  %v4695_v26 = vadd.f32 %v4473_v4, %v682_v60  ;;  %v740_v51 = vadd.f32 %v4473_v4, %v681_v12  ;;  %v512_v60 = vadd.f32 %v4442_v45, %v4620_v5 }
 0x123   :  { %799 = vst [vmem:[#allocation2] sm:$0xff] %v4682_v31  ;;  %v775_v38 = vmax.f32 %v736_v43, %v749_v1  ;;  %v748_v15 = vadd.f32 %v4473_v4, %v689_v13  ;;  %v632_v9 = vmax.f32 %v542_v57, 0.0  ;;  %v557_v32 = vadd.f32 %v3351_v23, %v4442_v45 }
 0x124   :  { %v692_v16 = vmul.f32 %v4460_v58, %v633_v3  ;;  %v551_v34 = vpop.f32.mrf.mxu0  ;;  %v684_v1 = vmul.f32 %v4460_v58, %v625_v48  ;;  %v683_v5 = vmul.f32 %v4460_v58, %v624_v55  ;;  %v522_v57 = vadd.f32 %v4442_v45, %v4641_v63 }
 0x125   :  { %v4702_v40 = vmax.f32 %v762_v53, %v775_v38  ;;  %v774_v43 = vmax.f32 %v735_v11, %v748_v15  ;;  %v691_v17 = vmul.f32 %v4460_v58, %v632_v9  ;;  %v635_v7 = vmax.f32 %v557_v32, 0.0 }
 0x126   :  { %v751_v12 = vadd.f32 %v4473_v4, %v692_v16  ;;  %v552_v61 = vadd.f32 %v4442_v45, %v551_v34  ;;  %v3354_v13 = vpop.f32.mrf.mxu0  ;;  %v517_v15 = vadd.f32 %v4605_v35, %v4442_v45  ;;  %v626_v9 = vmax.f32 %v512_v60, 0.0 }
 0x127   :  { %801 = vst [vmem:[#allocation2 + $0x10] sm:$0xff] %v4702_v40  ;;  %v4714_v19 = vmax.f32 %v761_v54, %v774_v43  ;;  %v750_v28 = vadd.f32 %v4473_v4, %v691_v17  ;;  %v694_v53 = vmul.f32 %v4460_v58, %v635_v7  ;;  %v567_v11 = vadd.f32 %v3354_v13, %v4442_v45 }
 0x128   :  { %v777_v48 = vmax.f32 %v738_v50, %v751_v12  ;;  %v634_v3 = vmax.f32 %v552_v61, 0.0  ;;  %v561_v23 = vpop.f32.mrf.mxu0  ;;  %v742_v35 = vadd.f32 %v4473_v4, %v683_v5  ;;  %v628_v43 = vmax.f32 %v522_v57, 0.0 }
 0x129   :  { %800 = vst [vmem:[#allocation2 + $0x8] sm:$0xff] %v4714_v19  ;;  %v776_v14 = vmax.f32 %v4666_v24, %v750_v28  ;;  %v753_v29 = vadd.f32 %v4473_v4, %v694_v53  ;;  %v637_v54 = vmax.f32 %v567_v11, 0.0  ;;  %v562_v38 = vadd.f32 %v4442_v45, %v561_v23  ;;  %v838_v28 = vld [vmem:[%s6037_s5 + $0x78] sm:$0xff] }
 0x12a   :  { %v4731_v63 = vmax.f32 %v764_v59, %v777_v48  ;;  %v693_v50 = vmul.f32 %v4460_v58, %v634_v3  ;;  %v3357_v32 = vpop.f32.mrf.mxu0  ;;  %v743_v17 = vadd.f32 %v4473_v4, %v684_v1  ;;  %v685_v7 = vmul.f32 %v4460_v58, %v626_v9 }
 0x12b   :  { %v4737_v24 = vmax.f32 %v763_v62, %v776_v14  ;;  %v779_v55 = vmax.f32 %v740_v51, %v753_v29  ;;  %v696_v16 = vmul.f32 %v4460_v58, %v637_v54  ;;  %v636_v34 = vmax.f32 %v562_v38, 0.0 }
 0x12c   :  { %803 = vst [vmem:[#allocation2 + $0x20] sm:$0xff] %v4731_v63  ;;  %v752_v37 = vadd.f32 %v4473_v4, %v693_v50  ;;  %v577_v33 = vadd.f32 %v3357_v32, %v4442_v45  ;;  %v571_v59 = vpop.f32.mrf.mxu0  ;;  %v627_v53 = vmax.f32 %v517_v15, 0.0  ;;  %v687_v1 = vmul.f32 %v4460_v58, %v628_v43 }
 0x12d   :  { %802 = vst [vmem:[#allocation2 + $0x18] sm:$0xff] %v4737_v24  ;;  %v4748_v18 = vmax.f32 %v766_v0, %v779_v55  ;;  %v755_v47 = vadd.f32 %v4473_v4, %v696_v16  ;;  %v695_v62 = vmul.f32 %v4460_v58, %v636_v34  ;;  %v572_v51 = vadd.f32 %v4442_v45, %v571_v59  ;;  %v836_v55 = vld [vmem:[%s6037_s5 + $0x68] sm:$0xff] }
 0x12e   :  { %v778_v60 = vmax.f32 %v4688_v30, %v752_v37  ;;  %v639_v12 = vmax.f32 %v577_v33, 0.0  ;;  %v3360_v61 = vpop.f32.mrf.mxu0  ;;  %v686_v9 = vmul.f32 %v4460_v58, %v627_v53  ;;  %v746_v16 = vadd.f32 %v4473_v4, %v687_v1  ;;  %v831_v53 = vld [vmem:[%s6037_s5 + $0x40] sm:$0xff] }
 0x12f   :  { %805 = vst [vmem:[#allocation2 + $0x30] sm:$0xff] %v4748_v18  ;;  %v781_v13 = vmax.f32 %v742_v35, %v755_v47  ;;  %v754_v2 = vadd.f32 %v4473_v4, %v695_v62  ;;  %v638_v56 = vmax.f32 %v572_v51, 0.0  ;;  %v587_v0 = vadd.f32 %v3360_v61, %v4442_v45  ;;  %v833_v61 = vld [vmem:[%s6037_s5 + $0x50] sm:$0xff] }
 0x130   :  { %v4766_v30 = vmax.f32 %v765_v46, %v778_v60  ;;  %v698_v11 = vmul.f32 %v4460_v58, %v639_v12  ;;  %v581_v5 = vpop.f32.mrf.mxu0  ;;  %v839_v57 = vld [vmem:[#allocation2 + $0x1] sm:$0xff]  ;;  %v744_v46 = vadd.f32 %v4473_v4, %v685_v7  ;;  %v6050_v35 = vmax.f32 %v4559_v25, %v4628_v36 }
 0x131   :  { %v1107_v48 = vld [vmem:[#allocation2 + $0x2] sm:$0xff]  ;;  %v4772_v3 = vmax.f32 %v768_v22, %v781_v13  ;;  %v780_v23 = vmax.f32 %v4695_v26, %v754_v2  ;;  %v697_v14 = vmul.f32 %v4460_v58, %v638_v56  ;;  %v641_v29 = vmax.f32 %v587_v0, 0.0  ;;  %3394 = vmatmul.mubr.f32.vlgmr.msra.gmra.mxu1 %v839_v57  ;;  %v830_v57 = vld [vmem:[%s6037_s5 + $0x38] sm:$0xff] }
 0x132   :  { %3524 = vmatmul.mubr.f32.vlgmr.msra.gmra.mxu0 %v1107_v48  ;;  %804 = vst [vmem:[#allocation2 + $0x28] sm:$0xff] %v4766_v30  ;;  %v757_v52 = vadd.f32 %v4473_v4, %v698_v11  ;;  %v582_v44 = vadd.f32 %v4442_v45, %v581_v5  ;;  %3427 = vmatpush3.msra.mxu1 %v838_v28  ;;  %v6048_v22 = vmov 0.0   ;;  %v835_v25 = vld [vmem:[%s6037_s5 + $0x60] sm:$0xff]  ;;  %v832_v13 = vld [vmem:[%s6037_s5 + $0x48] sm:$0xff]  ;;  %v2815_v5 = vld [vmem:[%s6037_s5 + $0x258] sm:$0xff] }
 0x133   :  { %3396 = vmatprep.mubr.msk.f32.mxu1 %vm4011_vm1, %v6048_v22  ;;  %807 = vst [vmem:[#allocation2 + $0x40] sm:$0xff] %v4772_v3  ;;  %v6049_v26 = vmax.f32 %v4518_v39, %v4625_v6  ;;  %v756_v38 = vadd.f32 %v4473_v4, %v697_v14  ;;  %v700_v15 = vmul.f32 %v4460_v58, %v641_v29  ;;  %v4802_v39 = vld [vmem:[#allocation2 + $0x9] sm:$0xff]  ;;  %v2816_v28 = vld [vmem:[%s6037_s5 + $0x260] sm:$0xff] }
 0x134   :  { %3428 = vmatprep.subr.mxu1 %v6048_v22  ;;  %3526 = vmatprep.mubr.msk.f32.mxu0 %vm4011_vm1, %v6048_v22  ;;  %v769_v45 = vmax.f32 %v4542_v8, %v4649_v10  ;;  %v783_v50 = vmax.f32 %v744_v46, %v757_v52  ;;  %v640_v32 = vmax.f32 %v582_v44, 0.0  ;;  %v1108_v6 = vld [vmem:[#allocation2 + $0xa] sm:$0xff]  ;;  %v732_v10 = vadd.f32 %v4473_v4, %v4659_v49  ;;  %v1109_v49 = vld [vmem:[#allocation2 + $0x12] sm:$0xff]  ;;  %v1110_v12 = vld [vmem:[#allocation2 + $0x1a] sm:$0xff] }
 0x135   :  { %v4792_v54 = vmax.f32 %v6049_v26, %v780_v23  ;;  %3429 = vmatpush3.msra.mxu1 %v837_v27  ;;  %3622 = vmatpush3.msra.mxu0 %v2819_v42  ;;  %v782_v34 = vmax.f32 %v743_v17, %v756_v38  ;;  %v759_v8 = vadd.f32 %v4473_v4, %v700_v15  ;;  %v4855_v60 = vld [vmem:[#allocation2 + $0x19] sm:$0xff]  ;;  %v2817_v2 = vld [vmem:[%s6037_s5 + $0x268] sm:$0xff]  ;;  %v2814_v48 = vld [vmem:[%s6037_s5 + $0x250] sm:$0xff] }
 0x136   :  { %3397 = vmatmul.mubr.f32.gmra.mxu1 %v4802_v39  ;;  %3527 = vmatmul.mubr.f32.gmra.mxu0 %v1108_v6  ;;  %v4816_v43 = vmax.f32 %v6050_v35, %v783_v50  ;;  %v699_v37 = vmul.f32 %v4460_v58, %v640_v32  ;;  %v772_v33 = vmax.f32 %v4580_v41, %v4653_v20  ;;  %v4836_v20 = vld [vmem:[#allocation2 + $0x11] sm:$0xff]  ;;  %v2813_v29 = vld [vmem:[%s6037_s5 + $0x248] sm:$0xff]  ;;  %v2812_v42 = vld [vmem:[%s6037_s5 + $0x240] sm:$0xff] }
 0x137   :  { %806 = vst [vmem:[#allocation2 + $0x38] sm:$0xff] %v4792_v54  ;;  %3430 = vmatprep.subr.mxu1 %v6048_v22  ;;  %3399 = vmatprep.mubr.msk.f32.mxu1 %vm4011_vm1, %v6048_v22  ;;  %v4824_v59 = vmax.f32 %v769_v45, %v782_v34  ;;  %v785_v47 = vmax.f32 %v746_v16, %v759_v8  ;;  %v829_v14 = vld [vmem:[%s6037_s5 + $0x30] sm:$0xff]  ;;  %v828_v46 = vld [vmem:[%s6037_s5 + $0x28] sm:$0xff]  ;;  %v2811_v26 = vld [vmem:[%s6037_s5 + $0x238] sm:$0xff] }
 0x138   :  { %3431 = vmatpush3.msra.mxu1 %v836_v55  ;;  %3529 = vmatprep.mubr.msk.f32.mxu0 %vm4011_vm1, %v6048_v22  ;;  %v719_v58 = vadd.f32 %v4473_v4, %v4555_v21  ;;  %v745_v36 = vadd.f32 %v4473_v4, %v686_v9  ;;  %809 = vst [vmem:[#allocation2 + $0x50] sm:$0xff] %v4816_v43  ;;  %v834_v21 = vld [vmem:[%s6037_s5 + $0x58] sm:$0xff]  ;;  %v827_v38 = vld [vmem:[%s6037_s5 + $0x20] sm:$0xff]  ;;  %v2810_v15 = vld [vmem:[%s6037_s5 + $0x230] sm:$0xff] }
 0x139   :  { %v758_v41 = vadd.f32 %v4473_v4, %v699_v37  ;;  %3432 = vmatprep.subr.mxu1 %v6048_v22  ;;  %3623 = vmatprep.subr.mxu0 %v6048_v22  ;;  %808 = vst [vmem:[#allocation2 + $0x48] sm:$0xff] %v4824_v59  ;;  %v798_v62 = vmax.f32 %v772_v33, %v785_v47  ;;  %v2818_v4 = vld [vmem:[%s6037_s5 + $0x270] sm:$0xff]  ;;  %v4873_v56 = vld [vmem:[#allocation2 + $0x21] sm:$0xff]  ;;  %v826_v9 = vld [vmem:[%s6037_s5 + $0x18] sm:$0xff] }
 0x13a   :  { %3400 = vmatmul.mubr.f32.gmra.mxu1 %v4836_v20  ;;  %3530 = vmatmul.mubr.f32.gmra.mxu0 %v1109_v49  ;;  %v771_v51 = vmax.f32 %v719_v58, %v732_v10  ;;  %v1111_v0 = vld [vmem:[#allocation2 + $0x22] sm:$0xff]  ;;  %v1112_v11 = vld [vmem:[#allocation2 + $0x2a] sm:$0xff]  ;;  %v2807_v8 = vld [vmem:[%s6037_s5 + $0x218] sm:$0xff] }
 0x13b   :  { %v784_v17 = vmax.f32 %v745_v36, %v758_v41  ;;  %3433 = vmatpush3.msra.mxu1 %v835_v25  ;;  %3402 = vmatprep.mubr.msk.f32.mxu1 %vm4011_vm1, %v6048_v22  ;;  %811 = vst [vmem:[#allocation2 + $0x60] sm:$0xff] %v798_v62  ;;  %v4890_v1 = vld [vmem:[#allocation2 + $0x29] sm:$0xff]  ;;  %v2808_v6 = vld [vmem:[%s6037_s5 + $0x220] sm:$0xff]  ;;  %v2803_v36 = vld [vmem:[%s6037_s5 + $0x1f8] sm:$0xff] }
 0x13c   :  { %3434 = vmatprep.subr.mxu1 %v6048_v22  ;;  %3532 = vmatprep.mubr.msk.f32.mxu0 %vm4011_vm1, %v6048_v22  ;;  %v2809_v50 = vld [vmem:[%s6037_s5 + $0x228] sm:$0xff]  ;;  %v825_v55 = vld [vmem:[%s6037_s5 + $0x10] sm:$0xff]  ;;  %v823_v25 = vld [vmem:[%s6037_s5] sm:$0xff] }
 0x13d   :  { %v4853_v7 = vmax.f32 %v771_v51, %v784_v17  ;;  %3435 = vmatpush3.msra.mxu1 %v834_v21  ;;  %3624 = vmatpush3.msra.mxu0 %v2818_v4  ;;  %v824_v10 = vld [vmem:[%s6037_s5 + $0x8] sm:$0xff]  ;;  %v2806_v35 = vld [vmem:[%s6037_s5 + $0x210] sm:$0xff]  ;;  %v2804_v58 = vld [vmem:[%s6037_s5 + $0x200] sm:$0xff] }
 0x13e   :  { %3403 = vmatmul.mubr.f32.gmra.mxu1 %v4855_v60  ;;  %3533 = vmatmul.mubr.f32.gmra.mxu0 %v1110_v12  ;;  %v4909_v23 = vld [vmem:[#allocation2 + $0x31] sm:$0xff]  ;;  %v4932_v52 = vld [vmem:[#allocation2 + $0x39] sm:$0xff]  ;;  %v2805_v37 = vld [vmem:[%s6037_s5 + $0x208] sm:$0xff] }
 0x13f   :  { %810 = vst [vmem:[#allocation2 + $0x58] sm:$0xff] %v4853_v7  ;;  %3436 = vmatprep.subr.mxu1 %v6048_v22  ;;  %3405 = vmatprep.mubr.msk.f32.mxu1 %vm4011_vm1, %v6048_v22  ;;  %v1113_v27 = vld [vmem:[#allocation2 + $0x32] sm:$0xff]  ;;  %v1114_v44 = vld [vmem:[#allocation2 + $0x3a] sm:$0xff]  ;;  %v2801_v49 = vld [vmem:[%s6037_s5 + $0x1e8] sm:$0xff] }
 0x140   :  { %3437 = vmatpush3.msra.mxu1 %v833_v61  ;;  %3535 = vmatprep.mubr.msk.f32.mxu0 %vm4011_vm1, %v6048_v22  ;;  %v4951_v45 = vld [vmem:[#allocation2 + $0x41] sm:$0xff]  ;;  %v4974_v16 = vld [vmem:[#allocation2 + $0x49] sm:$0xff]  ;;  %v2847_v17 = vld [vmem:[%s6037_s5 + $0x358] sm:$0xff] }
 0x141   :  { %3438 = vmatprep.subr.mxu1 %v6048_v22  ;;  %3625 = vmatprep.subr.mxu0 %v6048_v22  ;;  %v1115_v32 = vld [vmem:[#allocation2 + $0x42] sm:$0xff]  ;;  %v1116_v34 = vld [vmem:[#allocation2 + $0x4a] sm:$0xff]  ;;  %v2795_v12 = vld [vmem:[%s6037_s5 + $0x1b8] sm:$0xff] }
 0x142   :  { %3406 = vmatmul.mubr.f32.gmra.mxu1 %v4873_v56  ;;  %3536 = vmatmul.mubr.f32.gmra.mxu0 %v1111_v0  ;;  %v2802_v41 = vld [vmem:[%s6037_s5 + $0x1f0] sm:$0xff]  ;;  %v2800_v62 = vld [vmem:[%s6037_s5 + $0x1e0] sm:$0xff]  ;;  %v2849_v4 = vld [vmem:[%s6037_s5 + $0x368] sm:$0xff] }
 0x143   :  { %3439 = vmatpush3.msra.mxu1 %v832_v13  ;;  %3626 = vmatpush3.msra.mxu0 %v2817_v2  ;;  %v2798_v21 = vld [vmem:[%s6037_s5 + $0x1d0] sm:$0xff]  ;;  %v2848_v51 = vld [vmem:[%s6037_s5 + $0x360] sm:$0xff]  ;;  %v2845_v13 = vld [vmem:[%s6037_s5 + $0x348] sm:$0xff] }
 0x144   :  { %3627 = vmatprep.subr.mxu0 %v6048_v22  ;;  %3408 = vmatprep.mubr.msk.f32.mxu1 %vm4011_vm1, %v6048_v22  ;;  %v2846_v61 = vld [vmem:[%s6037_s5 + $0x350] sm:$0xff]  ;;  %v2844_v2 = vld [vmem:[%s6037_s5 + $0x340] sm:$0xff]  ;;  %v2843_v0 = vld [vmem:[%s6037_s5 + $0x338] sm:$0xff] }
 0x145   :  { %3440 = vmatprep.subr.mxu1 %v6048_v22  ;;  %3538 = vmatprep.mubr.msk.f32.mxu0 %vm4011_vm1, %v6048_v22 }
 0x146   :  { %3628 = vmatpush3.msra.mxu0 %v2816_v28  ;;  %3409 = vmatmul.mubr.f32.gmra.mxu1 %v4890_v1  ;;  %v4996_v33 = vld [vmem:[#allocation2 + $0x51] sm:$0xff]  ;;  %v2792_v28 = vld [vmem:[%s6037_s5 + $0x1a0] sm:$0xff] }
 0x147   :  { %3441 = vmatpush3.msra.mxu1 %v831_v53  ;;  %3539 = vmatmul.mubr.f32.gmra.mxu0 %v1112_v11  ;;  %v1117_v47 = vld [vmem:[#allocation2 + $0x52] sm:$0xff]  ;;  %v2841_v11 = vld [vmem:[%s6037_s5 + $0x328] sm:$0xff] }
 0x148   :  { %3629 = vmatprep.subr.mxu0 %v6048_v22  ;;  %3442 = vmatprep.subr.mxu1 %v6048_v22  ;;  %v2842_v53 = vld [vmem:[%s6037_s5 + $0x330] sm:$0xff] }
 0x149   :  { %3630 = vmatpush3.msra.mxu0 %v2815_v5  ;;  %3443 = vmatpush3.msra.mxu1 %v830_v57  ;;  %v2840_v5 = vld [vmem:[%s6037_s5 + $0x320] sm:$0xff]  ;;  %v2839_v57 = vld [vmem:[%s6037_s5 + $0x318] sm:$0xff] }
 0x14a   :  { %3631 = vmatprep.subr.mxu0 %v6048_v22  ;;  %3411 = vmatprep.mubr.msk.f32.mxu1 %vm4011_vm1, %v6048_v22 }
 0x14b   :  { %3541 = vmatprep.mubr.msk.f32.mxu0 %vm4011_vm1, %v6048_v22  ;;  %3632 = vmatpush3.msra.mxu0 %v2814_v48  ;;  %v2789_v48 = vld [vmem:[%s6037_s5 + $0x188] sm:$0xff] }
 0x14c   :  { %3412 = vmatmul.mubr.f32.gmra.mxu1 %v4909_v23  ;;  %3444 = vmatprep.subr.mxu1 %v6048_v22 }
 0x14d   :  { %3542 = vmatmul.mubr.f32.gmra.mxu0 %v1113_v27  ;;  %3633 = vmatprep.subr.mxu0 %v6048_v22  ;;  %v2836_v27 = vld [vmem:[%s6037_s5 + $0x300] sm:$0xff] }
 0x14e   :  { %3445 = vmatpush3.msra.mxu1 %v829_v14  ;;  %3634 = vmatpush3.msra.mxu0 %v2813_v29  ;;  %v2838_v14 = vld [vmem:[%s6037_s5 + $0x310] sm:$0xff]  ;;  %v2788_v29 = vld [vmem:[%s6037_s5 + $0x180] sm:$0xff] }
 0x14f   :  { %3635 = vmatprep.subr.mxu0 %v6048_v22  ;;  %3414 = vmatprep.mubr.msk.f32.mxu1 %vm4011_vm1, %v6048_v22 }
 0x150   :  { %3446 = vmatprep.subr.mxu1 %v6048_v22  ;;  %3544 = vmatprep.mubr.msk.f32.mxu0 %vm4011_vm1, %v6048_v22 }
 0x151   :  { %3636 = vmatpush3.msra.mxu0 %v2812_v42  ;;  %3415 = vmatmul.mubr.f32.gmra.mxu1 %v4932_v52  ;;  %v1743_v42 = vld [vmem:[#allocation2 + $0xe] sm:$0xff] }
 0x152   :  { %3447 = vmatpush3.msra.mxu1 %v828_v46  ;;  %3545 = vmatmul.mubr.f32.gmra.mxu0 %v1114_v44  ;;  %v2834_v46 = vld [vmem:[%s6037_s5 + $0x2f0] sm:$0xff]  ;;  %v2833_v44 = vld [vmem:[%s6037_s5 + $0x2e8] sm:$0xff] }
 0x153   :  { %3637 = vmatprep.subr.mxu0 %v6048_v22  ;;  %3448 = vmatprep.subr.mxu1 %v6048_v22 }
 0x154   :  { %3638 = vmatpush3.msra.mxu0 %v2811_v26  ;;  %3417 = vmatprep.mubr.msk.f32.mxu1 %vm4011_vm1, %v6048_v22  ;;  %v5221_v26 = vld [vmem:[#allocation2 + $0xf] sm:$0xff] }
 0x155   :  { %3639 = vmatprep.subr.mxu0 %v6048_v22  ;;  %3449 = vmatpush3.msra.mxu1 %v827_v38  ;;  %v1744_v38 = vld [vmem:[#allocation2 + $0x16] sm:$0xff] }
 0x156   :  { %3547 = vmatprep.mubr.msk.f32.mxu0 %vm4011_vm1, %v6048_v22  ;;  %3640 = vmatpush3.msra.mxu0 %v2810_v15  ;;  %v2883_v15 = vld [vmem:[%s6037_s5 + $0x478] sm:$0xff] }
 0x157   :  { %3418 = vmatmul.mubr.f32.gmra.mxu1 %v4951_v45  ;;  %3450 = vmatprep.subr.mxu1 %v6048_v22 }
 0x158   :  { %3548 = vmatmul.mubr.f32.gmra.mxu0 %v1115_v32  ;;  %3641 = vmatprep.subr.mxu0 %v6048_v22  ;;  %v1745_v32 = vld [vmem:[#allocation2 + $0x1e] sm:$0xff] }
 0x159   :  { %3451 = vmatpush3.msra.mxu1 %v826_v9  ;;  %3642 = vmatpush3.msra.mxu0 %v2809_v50  ;;  %v2832_v9 = vld [vmem:[%s6037_s5 + $0x2e0] sm:$0xff]  ;;  %v5235_v50 = vld [vmem:[#allocation2 + $0x17] sm:$0xff] }
 0x15a   :  { %3643 = vmatprep.subr.mxu0 %v6048_v22  ;;  %3420 = vmatprep.mubr.msk.f32.mxu1 %vm4011_vm1, %v6048_v22 }
 0x15b   :  { %3452 = vmatprep.subr.mxu1 %v6048_v22  ;;  %3550 = vmatprep.mubr.msk.f32.mxu0 %vm4011_vm1, %v6048_v22 }
 0x15c   :  { %3644 = vmatpush3.msra.mxu0 %v2808_v6  ;;  %3421 = vmatmul.mubr.f32.gmra.mxu1 %v4974_v16  ;;  %v2831_v6 = vld [vmem:[%s6037_s5 + $0x2d8] sm:$0xff] }
 0x15d   :  { %3453 = vmatpush3.msra.mxu1 %v825_v55  ;;  %3551 = vmatmul.mubr.f32.gmra.mxu0 %v1116_v34  ;;  %v2830_v55 = vld [vmem:[%s6037_s5 + $0x2d0] sm:$0xff]  ;;  %v5251_v34 = vld [vmem:[#allocation2 + $0x1f] sm:$0xff] }
 0x15e   :  { %3645 = vmatprep.subr.mxu0 %v6048_v22  ;;  %3454 = vmatprep.subr.mxu1 %v6048_v22 }
 0x15f   :  { %3646 = vmatpush3.msra.mxu0 %v2807_v8  ;;  %3423 = vmatprep.mubr.msk.f32.mxu1 %vm4011_vm1, %v6048_v22  ;;  %v1746_v8 = vld [vmem:[#allocation2 + $0x26] sm:$0xff] }
 0x160   :  { %3647 = vmatprep.subr.mxu0 %v6048_v22  ;;  %3455 = vmatpush3.msra.mxu1 %v824_v10  ;;  %v2882_v10 = vld [vmem:[%s6037_s5 + $0x470] sm:$0xff] }
 0x161   :  { %3553 = vmatprep.mubr.msk.f32.mxu0 %vm4011_vm1, %v6048_v22  ;;  %3648 = vmatpush3.msra.mxu0 %v2806_v35  ;;  %v5263_v35 = vld [vmem:[#allocation2 + $0x27] sm:$0xff] }
 0x162   :  { %3424 = vmatmul.mubr.f32.gmra.mxu1 %v4996_v33  ;;  %3554 = vmatmul.mubr.f32.gmra.mxu0 %v1117_v47  ;;  %v2881_v47 = vld [vmem:[%s6037_s5 + $0x468] sm:$0xff] }
 0x163   :  { %3649 = vmatprep.subr.mxu0 %v6048_v22  ;;  %3456 = vmatprep.subr.mxu1 %v6048_v22 }
 0x164   :  { %3650 = vmatpush3.msra.mxu0 %v2805_v37  ;;  %3457 = vmatpush3.msra.mxu1 %v823_v25  ;;  %v2829_v37 = vld [vmem:[%s6037_s5 + $0x2c8] sm:$0xff] }
 0x165   :  { %3651 = vmatprep.subr.mxu0 %v6048_v22  ;;  %3458 = vmatprep.mubr.msk.f32.mxu1 %vm4011_vm1, %v6048_v22  ;;  %v1747_v25 = vld [vmem:[#allocation2 + $0x2e] sm:$0xff] }
 0x166   :  { %3556 = vmatprep.subr.mxu1 %v6048_v22  ;;  %3652 = vmatpush3.msra.mxu0 %v2804_v58  ;;  %v2880_v58 = vld [vmem:[%s6037_s5 + $0x460] sm:$0xff] }
 0x167   :  { %3653 = vmatprep.mubr.msk.f32.mxu0 %vm4011_vm1, %v6048_v22  ;;  %3459 = vmatmul.mubr.f32.vlgmr.msra.gmra.mxu1 %v4682_v31  ;;  %v2851_v31 = vld [vmem:[%s6037_s5 + $0x378] sm:$0xff] }
 0x168   :  { %3557 = vmatpush3.msra.mxu1 %v2803_v36  ;;  %3654 = vmatmul.mubr.f32.vlgmr.msra.gmra.mxu0 %v4714_v19  ;;  %v2828_v36 = vld [vmem:[%s6037_s5 + $0x2c0] sm:$0xff] }
 0x169   :  { %3558 = vmatprep.subr.mxu1 %v6048_v22  ;;  %3461 = vmatprep.mubr.msk.f32.mxu1 %vm4011_vm1, %v6048_v22 }
 0x16a   :  { %3559 = vmatpush3.msra.mxu1 %v2802_v41  ;;  %3656 = vmatprep.mubr.msk.f32.mxu0 %vm4011_vm1, %v6048_v22  ;;  %v5286_v41 = vld [vmem:[#allocation2 + $0x2f] sm:$0xff] }
 0x16b   :  { %3462 = vmatmul.mubr.f32.gmra.mxu1 %v4714_v19  ;;  %3560 = vmatprep.subr.mxu1 %v6048_v22  ;;  %v2799_v19 = vld [vmem:[%s6037_s5 + $0x1d8] sm:$0xff] }
 0x16c   :  { %3657 = vmatmul.mubr.f32.gmra.mxu0 %v4702_v40  ;;  %3561 = vmatpush3.msra.mxu1 %v2801_v49  ;;  %v1748_v49 = vld [vmem:[#allocation2 + $0x36] sm:$0xff] }
 0x16d   :  { %3464 = vmatprep.mubr.msk.f32.mxu1 %vm4011_vm1, %v6048_v22  ;;  %3659 = vmatprep.mubr.msk.f32.mxu0 %vm4011_vm1, %v6048_v22 }
 0x16e   :  { %3562 = vmatprep.subr.mxu1 %v6048_v22  ;;  %3751 = vmatprep.subr.mxu0 %v6048_v22 }
 0x16f   :  { %3465 = vmatmul.mubr.f32.gmra.mxu1 %v4702_v40  ;;  %3752 = vmatpush3.msra.mxu0 %v2851_v31  ;;  %v2850_v40 = vld [vmem:[%s6037_s5 + $0x370] sm:$0xff]  ;;  %v2879_v31 = vld [vmem:[%s6037_s5 + $0x458] sm:$0xff] }
 0x170   :  { %3660 = vmatmul.mubr.f32.gmra.mxu0 %v4737_v24  ;;  %3563 = vmatpush3.msra.mxu1 %v2800_v62  ;;  %v2827_v62 = vld [vmem:[%s6037_s5 + $0x2b8] sm:$0xff] }
 0x171   :  { %3564 = vmatprep.subr.mxu1 %v6048_v22  ;;  %3467 = vmatprep.mubr.msk.f32.mxu1 %vm4011_vm1, %v6048_v22 }
 0x172   :  { %3565 = vmatpush3.msra.mxu1 %v2799_v19  ;;  %3662 = vmatprep.mubr.msk.f32.mxu0 %vm4011_vm1, %v6048_v22  ;;  %v2878_v19 = vld [vmem:[%s6037_s5 + $0x450] sm:$0xff] }
 0x173   :  { %3468 = vmatmul.mubr.f32.gmra.mxu1 %v4737_v24  ;;  %3566 = vmatprep.subr.mxu1 %v6048_v22  ;;  %v2797_v24 = vld [vmem:[%s6037_s5 + $0x1c8] sm:$0xff] }
 0x174   :  { %3663 = vmatmul.mubr.f32.gmra.mxu0 %v4731_v63  ;;  %3567 = vmatpush3.msra.mxu1 %v2798_v21  ;;  %v5305_v21 = vld [vmem:[#allocation2 + $0x37] sm:$0xff] }
 0x175   :  { %3753 = vmatprep.subr.mxu0 %v6048_v22  ;;  %3470 = vmatprep.mubr.msk.f32.mxu1 %vm4011_vm1, %v6048_v22 }
 0x176   :  { %3665 = vmatprep.mubr.msk.f32.mxu0 %vm4011_vm1, %v6048_v22  ;;  %3754 = vmatpush3.msra.mxu0 %v2850_v40  ;;  %v2826_v40 = vld [vmem:[%s6037_s5 + $0x2b0] sm:$0xff] }
 0x177   :  { %3471 = vmatmul.mubr.f32.gmra.mxu1 %v4731_v63  ;;  %3568 = vmatprep.subr.mxu1 %v6048_v22  ;;  %v2796_v63 = vld [vmem:[%s6037_s5 + $0x1c0] sm:$0xff] }
 0x178   :  { %3666 = vmatmul.mubr.f32.gmra.mxu0 %v4766_v30  ;;  %3755 = vmatprep.subr.mxu0 %v6048_v22 }
 0x179   :  { %3569 = vmatpush3.msra.mxu1 %v2797_v24  ;;  %3756 = vmatpush3.msra.mxu0 %v2849_v4  ;;  %v2877_v24 = vld [vmem:[%s6037_s5 + $0x448] sm:$0xff]  ;;  %v1749_v4 = vld [vmem:[#allocation2 + $0x3e] sm:$0xff] }
 0x17a   :  { %3757 = vmatprep.subr.mxu0 %v6048_v22  ;;  %3473 = vmatprep.mubr.msk.f32.mxu1 %vm4011_vm1, %v6048_v22 }
 0x17b   :  { %3570 = vmatprep.subr.mxu1 %v6048_v22  ;;  %3668 = vmatprep.mubr.msk.f32.mxu0 %vm4011_vm1, %v6048_v22 }
 0x17c   :  { %3758 = vmatpush3.msra.mxu0 %v2848_v51  ;;  %3474 = vmatmul.mubr.f32.gmra.mxu1 %v4766_v30  ;;  %v2794_v30 = vld [vmem:[%s6037_s5 + $0x1b0] sm:$0xff]  ;;  %v2876_v51 = vld [vmem:[%s6037_s5 + $0x440] sm:$0xff] }
 0x17d   :  { %3571 = vmatpush3.msra.mxu1 %v2796_v63  ;;  %3669 = vmatmul.mubr.f32.gmra.mxu0 %v4748_v18  ;;  %v2825_v63 = vld [vmem:[%s6037_s5 + $0x2a8] sm:$0xff] }
 0x17e   :  { %3759 = vmatprep.subr.mxu0 %v6048_v22  ;;  %3572 = vmatprep.subr.mxu1 %v6048_v22 }
 0x17f   :  { %3760 = vmatpush3.msra.mxu0 %v2847_v17  ;;  %3573 = vmatpush3.msra.mxu1 %v2795_v12  ;;  %v5328_v17 = vld [vmem:[#allocation2 + $0x3f] sm:$0xff] }
 0x180   :  { %3761 = vmatprep.subr.mxu0 %v6048_v22  ;;  %3476 = vmatprep.mubr.msk.f32.mxu1 %vm4011_vm1, %v6048_v22  ;;  %v1750_v12 = vld [vmem:[#allocation2 + $0x46] sm:$0xff] }
 0x181   :  { %3671 = vmatprep.mubr.msk.f32.mxu0 %vm4011_vm1, %v6048_v22  ;;  %3762 = vmatpush3.msra.mxu0 %v2846_v61  ;;  %v2875_v61 = vld [vmem:[%s6037_s5 + $0x438] sm:$0xff] }
 0x182   :  { %3477 = vmatmul.mubr.f32.gmra.mxu1 %v4748_v18  ;;  %3574 = vmatprep.subr.mxu1 %v6048_v22  ;;  %v2793_v18 = vld [vmem:[%s6037_s5 + $0x1a8] sm:$0xff] }
 0x183   :  { %3672 = vmatmul.mubr.f32.gmra.mxu0 %v4792_v54  ;;  %3763 = vmatprep.subr.mxu0 %v6048_v22 }
 0x184   :  { %3575 = vmatpush3.msra.mxu1 %v2794_v30  ;;  %3764 = vmatpush3.msra.mxu0 %v2845_v13  ;;  %v2824_v30 = vld [vmem:[%s6037_s5 + $0x2a0] sm:$0xff]  ;;  %v2874_v13 = vld [vmem:[%s6037_s5 + $0x430] sm:$0xff] }
 0x185   :  { %3765 = vmatprep.subr.mxu0 %v6048_v22  ;;  %3479 = vmatprep.mubr.msk.f32.mxu1 %vm4011_vm1, %v6048_v22 }
 0x186   :  { %3576 = vmatprep.subr.mxu1 %v6048_v22  ;;  %3674 = vmatprep.mubr.msk.f32.mxu0 %vm4011_vm1, %v6048_v22 }
 0x187   :  { %3766 = vmatpush3.msra.mxu0 %v2844_v2  ;;  %3480 = vmatmul.mubr.f32.gmra.mxu1 %v4792_v54  ;;  %v2791_v54 = vld [vmem:[%s6037_s5 + $0x198] sm:$0xff]  ;;  %v5347_v2 = vld [vmem:[#allocation2 + $0x47] sm:$0xff] }
 0x188   :  { %3577 = vmatpush3.msra.mxu1 %v2793_v18  ;;  %3675 = vmatmul.mubr.f32.gmra.mxu0 %v4772_v3  ;;  %v2823_v18 = vld [vmem:[%s6037_s5 + $0x298] sm:$0xff] }
 0x189   :  { %3767 = vmatprep.subr.mxu0 %v6048_v22  ;;  %3578 = vmatprep.subr.mxu1 %v6048_v22 }
 0x18a   :  { %3768 = vmatpush3.msra.mxu0 %v2843_v0  ;;  %3482 = vmatprep.mubr.msk.f32.mxu1 %vm4011_vm1, %v6048_v22  ;;  %v2873_v0 = vld [vmem:[%s6037_s5 + $0x428] sm:$0xff] }
 0x18b   :  { %3769 = vmatprep.subr.mxu0 %v6048_v22  ;;  %3579 = vmatpush3.msra.mxu1 %v2792_v28  ;;  %v1751_v28 = vld [vmem:[#allocation2 + $0x4e] sm:$0xff] }
 0x18c   :  { %3677 = vmatprep.mubr.msk.f32.mxu0 %vm4011_vm1, %v6048_v22  ;;  %3770 = vmatpush3.msra.mxu0 %v2842_v53  ;;  %v2872_v53 = vld [vmem:[%s6037_s5 + $0x420] sm:$0xff] }
 0x18d   :  { %3483 = vmatmul.mubr.f32.gmra.mxu1 %v4772_v3  ;;  %3580 = vmatprep.subr.mxu1 %v6048_v22  ;;  %v2790_v3 = vld [vmem:[%s6037_s5 + $0x190] sm:$0xff] }
 0x18e   :  { %3678 = vmatmul.mubr.f32.gmra.mxu0 %v4824_v59  ;;  %3771 = vmatprep.subr.mxu0 %v6048_v22 }
 0x18f   :  { %3581 = vmatpush3.msra.mxu1 %v2791_v54  ;;  %3772 = vmatpush3.msra.mxu0 %v2841_v11  ;;  %v2822_v54 = vld [vmem:[%s6037_s5 + $0x290] sm:$0xff] }
 0x190   :  { %3773 = vmatprep.subr.mxu0 %v6048_v22  ;;  %3485 = vmatprep.mubr.msk.f32.mxu1 %vm4011_vm1, %v6048_v22  ;;  %v5370_v11 = vld [vmem:[#allocation2 + $0x4f] sm:$0xff] }
 0x191   :  { %3582 = vmatprep.subr.mxu1 %v6048_v22  ;;  %3680 = vmatprep.mubr.msk.f32.mxu0 %vm4011_vm1, %v6048_v22 }
 0x192   :  { %3774 = vmatpush3.msra.mxu0 %v2840_v5  ;;  %3486 = vmatmul.mubr.f32.gmra.mxu1 %v4824_v59  ;;  %v2837_v59 = vld [vmem:[%s6037_s5 + $0x308] sm:$0xff]  ;;  %v1752_v5 = vld [vmem:[#allocation2 + $0x56] sm:$0xff] }
 0x193   :  { %3583 = vmatpush3.msra.mxu1 %v2790_v3  ;;  %3681 = vmatmul.mubr.f32.gmra.mxu0 %v4816_v43  ;;  %v2871_v3 = vld [vmem:[%s6037_s5 + $0x418] sm:$0xff] }
 0x194   :  { %3775 = vmatprep.subr.mxu0 %v6048_v22  ;;  %3584 = vmatprep.subr.mxu1 %v6048_v22 }
 0x195   :  { %3776 = vmatpush3.msra.mxu0 %v2839_v57  ;;  %3488 = vmatprep.mubr.msk.f32.mxu1 %vm4011_vm1, %v6048_v22  ;;  %v2821_v57 = vld [vmem:[%s6037_s5 + $0x288] sm:$0xff] }
 0x196   :  { %3777 = vmatprep.subr.mxu0 %v6048_v22  ;;  %3585 = vmatpush3.msra.mxu1 %v2789_v48  ;;  %v2870_v48 = vld [vmem:[%s6037_s5 + $0x410] sm:$0xff] }
 0x197   :  { %3683 = vmatprep.mubr.msk.f32.mxu0 %vm4011_vm1, %v6048_v22  ;;  %3778 = vmatpush3.msra.mxu0 %v2838_v14  ;;  %v5387_v14 = vld [vmem:[#allocation2 + $0x57] sm:$0xff] }
 0x198   :  { %3489 = vmatmul.mubr.f32.gmra.mxu1 %v4816_v43  ;;  %3684 = vmatmul.mubr.f32.gmra.mxu0 %v4853_v7  ;;  %v2835_v43 = vld [vmem:[%s6037_s5 + $0x2f8] sm:$0xff]  ;;  %v1266_v7 = vld [vmem:[#allocation2 + $0x7] sm:$0xff] }
 0x199   :  { %3779 = vmatprep.subr.mxu0 %v6048_v22  ;;  %3586 = vmatprep.subr.mxu1 %v6048_v22 }
 0x19a   :  { %3780 = vmatpush3.msra.mxu0 %v2837_v59  ;;  %3587 = vmatpush3.msra.mxu1 %v2788_v29  ;;  %v1753_v59 = vld [vmem:[#allocation2 + $0x5e] sm:$0xff]  ;;  %v2869_v29 = vld [vmem:[%s6037_s5 + $0x408] sm:$0xff] }
 0x19b   :  { %3781 = vmatprep.subr.mxu0 %v6048_v22  ;;  %3588 = vmatprep.mubr.msk.f32.mxu1 %vm4011_vm1, %v6048_v22 }
 0x19c   :  { %3686 = vmatprep.subr.mxu1 %v6048_v22  ;;  %3782 = vmatpush3.msra.mxu0 %v2836_v27  ;;  %v2820_v27 = vld [vmem:[%s6037_s5 + $0x280] sm:$0xff] }
 0x19d   :  { %3783 = vmatprep.mubr.msk.f32.mxu0 %vm4011_vm1, %v6048_v22  ;;  %3589 = vmatmul.mubr.f32.vlgmr.msra.gmra.mxu1 %v1266_v7  ;;  %v2867_v7 = vld [vmem:[%s6037_s5 + $0x3f8] sm:$0xff] }
 0x19e   :  { %3687 = vmatpush3.msra.mxu1 %v2835_v43  ;;  %3784 = vmatmul.mubr.f32.vlgmr.msra.gmra.mxu0 %v1743_v42  ;;  %v2868_v43 = vld [vmem:[%s6037_s5 + $0x400] sm:$0xff]  ;;  %v2061_v42 = vld [vmem:[#allocation2 + $0x10] sm:$0xff] }
 0x19f   :  { %3688 = vmatprep.subr.mxu1 %v6048_v22  ;;  %3591 = vmatprep.mubr.msk.f32.mxu1 %vm4011_vm1, %v6048_v22 }
 0x1a0   :  { %3689 = vmatpush3.msra.mxu1 %v2834_v46  ;;  %3786 = vmatprep.mubr.msk.f32.mxu0 %vm4011_vm1, %v6048_v22  ;;  %v2866_v46 = vld [vmem:[%s6037_s5 + $0x3f0] sm:$0xff] }
 0x1a1   :  { %3592 = vmatmul.mubr.f32.gmra.mxu1 %v5221_v26  ;;  %3690 = vmatprep.subr.mxu1 %v6048_v22 }
 0x1a2   :  { %3787 = vmatmul.mubr.f32.gmra.mxu0 %v1744_v38  ;;  %3691 = vmatpush3.msra.mxu1 %v2833_v44  ;;  %v2865_v44 = vld [vmem:[%s6037_s5 + $0x3e8] sm:$0xff]  ;;  %v2864_v38 = vld [vmem:[%s6037_s5 + $0x3e0] sm:$0xff] }
 0x1a3   :  { %3594 = vmatprep.mubr.msk.f32.mxu1 %vm4011_vm1, %v6048_v22  ;;  %3789 = vmatprep.mubr.msk.f32.mxu0 %vm4011_vm1, %v6048_v22 }
 0x1a4   :  { %3692 = vmatprep.subr.mxu1 %v6048_v22  ;;  %3881 = vmatprep.subr.mxu0 %v6048_v22 }
 0x1a5   :  { %3595 = vmatmul.mubr.f32.gmra.mxu1 %v5235_v50  ;;  %3882 = vmatpush3.msra.mxu0 %v2883_v15  ;;  %v2863_v15 = vld [vmem:[%s6037_s5 + $0x3d8] sm:$0xff] }
 0x1a6   :  { %3790 = vmatmul.mubr.f32.gmra.mxu0 %v1745_v32  ;;  %3693 = vmatpush3.msra.mxu1 %v2832_v9  ;;  %v2862_v9 = vld [vmem:[%s6037_s5 + $0x3d0] sm:$0xff]  ;;  %v2861_v32 = vld [vmem:[%s6037_s5 + $0x3c8] sm:$0xff] }
 0x1a7   :  { %3694 = vmatprep.subr.mxu1 %v6048_v22  ;;  %3597 = vmatprep.mubr.msk.f32.mxu1 %vm4011_vm1, %v6048_v22 }
 0x1a8   :  { %3695 = vmatpush3.msra.mxu1 %v2831_v6  ;;  %3792 = vmatprep.mubr.msk.f32.mxu0 %vm4011_vm1, %v6048_v22  ;;  %v2860_v6 = vld [vmem:[%s6037_s5 + $0x3c0] sm:$0xff] }
 0x1a9   :  { %3598 = vmatmul.mubr.f32.gmra.mxu1 %v5251_v34  ;;  %3696 = vmatprep.subr.mxu1 %v6048_v22 }
 0x1aa   :  { %3793 = vmatmul.mubr.f32.gmra.mxu0 %v1746_v8  ;;  %3697 = vmatpush3.msra.mxu1 %v2830_v55  ;;  %v2859_v55 = vld [vmem:[%s6037_s5 + $0x3b8] sm:$0xff]  ;;  %v2858_v8 = vld [vmem:[%s6037_s5 + $0x3b0] sm:$0xff] }
 0x1ab   :  { %3883 = vmatprep.subr.mxu0 %v6048_v22  ;;  %3600 = vmatprep.mubr.msk.f32.mxu1 %vm4011_vm1, %v6048_v22 }
 0x1ac   :  { %3795 = vmatprep.mubr.msk.f32.mxu0 %vm4011_vm1, %v6048_v22  ;;  %3884 = vmatpush3.msra.mxu0 %v2882_v10  ;;  %v2857_v10 = vld [vmem:[%s6037_s5 + $0x3a8] sm:$0xff] }
 0x1ad   :  { %3601 = vmatmul.mubr.f32.gmra.mxu1 %v5263_v35  ;;  %3698 = vmatprep.subr.mxu1 %v6048_v22 }
 0x1ae   :  { %3796 = vmatmul.mubr.f32.gmra.mxu0 %v1747_v25  ;;  %3885 = vmatprep.subr.mxu0 %v6048_v22 }
 0x1af   :  { %3699 = vmatpush3.msra.mxu1 %v2829_v37  ;;  %3886 = vmatpush3.msra.mxu0 %v2881_v47  ;;  %v2068_v37 = vld [vmem:[#allocation2 + $0x48] sm:$0xff]  ;;  %v2855_v47 = vld [vmem:[%s6037_s5 + $0x398] sm:$0xff] }
 0x1b0   :  { %3887 = vmatprep.subr.mxu0 %v6048_v22  ;;  %3603 = vmatprep.mubr.msk.f32.mxu1 %vm4011_vm1, %v6048_v22 }
 0x1b1   :  { %3700 = vmatprep.subr.mxu1 %v6048_v22  ;;  %3798 = vmatprep.mubr.msk.f32.mxu0 %vm4011_vm1, %v6048_v22 }
 0x1b2   :  { %3888 = vmatpush3.msra.mxu0 %v2880_v58  ;;  %3604 = vmatmul.mubr.f32.gmra.mxu1 %v5286_v41  ;;  %v2069_v58 = vld [vmem:[#allocation2 + $0x50] sm:$0xff] }
 0x1b3   :  { %3701 = vmatpush3.msra.mxu1 %v2828_v36  ;;  %3799 = vmatmul.mubr.f32.gmra.mxu0 %v1748_v49  ;;  %v2854_v36 = vld [vmem:[%s6037_s5 + $0x390] sm:$0xff] }
 0x1b4   :  { %3889 = vmatprep.subr.mxu0 %v6048_v22  ;;  %3702 = vmatprep.subr.mxu1 %v6048_v22 }
 0x1b5   :  { %3890 = vmatpush3.msra.mxu0 %v2879_v31  ;;  %3703 = vmatpush3.msra.mxu1 %v2827_v62 }
 0x1b6   :  { %3891 = vmatprep.subr.mxu0 %v6048_v22  ;;  %3606 = vmatprep.mubr.msk.f32.mxu1 %vm4011_vm1, %v6048_v22 }
 0x1b7   :  { %3801 = vmatprep.mubr.msk.f32.mxu0 %vm4011_vm1, %v6048_v22  ;;  %3892 = vmatpush3.msra.mxu0 %v2878_v19 }
 0x1b8   :  { %3607 = vmatmul.mubr.f32.gmra.mxu1 %v5305_v21  ;;  %3704 = vmatprep.subr.mxu1 %v6048_v22 }
 0x1b9   :  { %3802 = vmatmul.mubr.f32.gmra.mxu0 %v1749_v4  ;;  %3893 = vmatprep.subr.mxu0 %v6048_v22 }
 0x1ba   :  { %3705 = vmatpush3.msra.mxu1 %v2826_v40  ;;  %3894 = vmatpush3.msra.mxu0 %v2877_v24  ;;  %v2070_v40 = vld [vmem:[#allocation2 + $0x58] sm:$0xff] }
 0x1bb   :  { %3895 = vmatprep.subr.mxu0 %v6048_v22  ;;  %3609 = vmatprep.mubr.msk.f32.mxu1 %vm4011_vm1, %v6048_v22 }
 0x1bc   :  { %3706 = vmatprep.subr.mxu1 %v6048_v22  ;;  %3804 = vmatprep.mubr.msk.f32.mxu0 %vm4011_vm1, %v6048_v22 }
 0x1bd   :  { %3896 = vmatpush3.msra.mxu0 %v2876_v51  ;;  %3610 = vmatmul.mubr.f32.gmra.mxu1 %v5328_v17  ;;  %v2852_v51 = vld [vmem:[%s6037_s5 + $0x380] sm:$0xff] }
 0x1be   :  { %3707 = vmatpush3.msra.mxu1 %v2825_v63  ;;  %3805 = vmatmul.mubr.f32.gmra.mxu0 %v1750_v12  ;;  %v1594_v63 = vld [vmem:[#allocation2 + $0x59] sm:$0xff] }
 0x1bf   :  { %3897 = vmatprep.subr.mxu0 %v6048_v22  ;;  %3708 = vmatprep.subr.mxu1 %v6048_v22 }
 0x1c0   :  { %3898 = vmatpush3.msra.mxu0 %v2875_v61  ;;  %3612 = vmatprep.mubr.msk.f32.mxu1 %vm4011_vm1, %v6048_v22  ;;  %v2071_v61 = vld [vmem:[#allocation2 + $0x60] sm:$0xff] }
 0x1c1   :  { %3899 = vmatprep.subr.mxu0 %v6048_v22  ;;  %3709 = vmatpush3.msra.mxu1 %v2824_v30 }
 0x1c2   :  { %3807 = vmatprep.mubr.msk.f32.mxu0 %vm4011_vm1, %v6048_v22  ;;  %3900 = vmatpush3.msra.mxu0 %v2874_v13 }
 0x1c3   :  { %3613 = vmatmul.mubr.f32.gmra.mxu1 %v5347_v2  ;;  %3710 = vmatprep.subr.mxu1 %v6048_v22 }
 0x1c4   :  { %3808 = vmatmul.mubr.f32.gmra.mxu0 %v1751_v28  ;;  %3901 = vmatprep.subr.mxu0 %v6048_v22 }
 0x1c5   :  { %3711 = vmatpush3.msra.mxu1 %v2823_v18  ;;  %3902 = vmatpush3.msra.mxu0 %v2873_v0 }
 0x1c6   :  { %3903 = vmatprep.subr.mxu0 %v6048_v22  ;;  %3615 = vmatprep.mubr.msk.f32.mxu1 %vm4011_vm1, %v6048_v22 }
 0x1c7   :  { %3712 = vmatprep.subr.mxu1 %v6048_v22  ;;  %3810 = vmatprep.mubr.msk.f32.mxu0 %vm4011_vm1, %v6048_v22 }
 0x1c8   :  { %3904 = vmatpush3.msra.mxu0 %v2872_v53  ;;  %3616 = vmatmul.mubr.f32.gmra.mxu1 %v5370_v11 }
 0x1c9   :  { %3713 = vmatpush3.msra.mxu1 %v2822_v54  ;;  %3811 = vmatmul.mubr.f32.gmra.mxu0 %v1752_v5 }
 0x1ca   :  { %3905 = vmatprep.subr.mxu0 %v6048_v22  ;;  %3714 = vmatprep.subr.mxu1 %v6048_v22 }
 0x1cb   :  { %3906 = vmatpush3.msra.mxu0 %v2871_v3  ;;  %3618 = vmatprep.mubr.msk.f32.mxu1 %vm4011_vm1, %v6048_v22 }
 0x1cc   :  { %3907 = vmatprep.subr.mxu0 %v6048_v22  ;;  %3715 = vmatpush3.msra.mxu1 %v2821_v57 }
 0x1cd   :  { %3813 = vmatprep.mubr.msk.f32.mxu0 %vm4011_vm1, %v6048_v22  ;;  %3908 = vmatpush3.msra.mxu0 %v2870_v48 }
 0x1ce   :  { %3619 = vmatmul.mubr.f32.gmra.mxu1 %v5387_v14  ;;  %3814 = vmatmul.mubr.f32.gmra.mxu0 %v1753_v59 }
 0x1cf   :  { %3909 = vmatprep.subr.mxu0 %v6048_v22  ;;  %3716 = vmatprep.subr.mxu1 %v6048_v22 }
 0x1d0   :  { %3910 = vmatpush3.msra.mxu0 %v2869_v29  ;;  %3717 = vmatpush3.msra.mxu1 %v2820_v27 }
 0x1d1   :  { %3911 = vmatprep.subr.mxu0 %v6048_v22  ;;  %3718 = vmatprep.mubr.msk.f32.mxu1 %vm4011_vm1, %v6048_v22 }
 0x1d2   :  { %3816 = vmatprep.subr.mxu1 %v6048_v22  ;;  %3912 = vmatpush3.msra.mxu0 %v2868_v43 }
 0x1d3   :  { %3913 = vmatprep.mubr.msk.f32.mxu0 %vm4011_vm1, %v6048_v22  ;;  %3719 = vmatmul.mubr.f32.vlgmr.msra.gmra.mxu1 %v4802_v39  ;;  %v2062_v39 = vld [vmem:[#allocation2 + $0x18] sm:$0xff] }
 0x1d4   :  { %3817 = vmatpush3.msra.mxu1 %v2867_v7  ;;  %3914 = vmatmul.mubr.f32.vlgmr.msra.gmra.mxu0 %v2061_v42 }
 0x1d5   :  { %3818 = vmatprep.subr.mxu1 %v6048_v22  ;;  %3721 = vmatprep.mubr.msk.f32.mxu1 %vm4011_vm1, %v6048_v22 }
 0x1d6   :  { %3819 = vmatpush3.msra.mxu1 %v2866_v46  ;;  %3916 = vmatprep.mubr.msk.f32.mxu0 %vm4011_vm1, %v6048_v22 }
 0x1d7   :  { %3722 = vmatmul.mubr.f32.gmra.mxu1 %v4836_v20  ;;  %3820 = vmatprep.subr.mxu1 %v6048_v22  ;;  %v2063_v20 = vld [vmem:[#allocation2 + $0x20] sm:$0xff] }
 0x1d8   :  { %3917 = vmatmul.mubr.f32.gmra.mxu0 %v2062_v39  ;;  %3821 = vmatpush3.msra.mxu1 %v2865_v44 }
 0x1d9   :  { %3724 = vmatprep.mubr.msk.f32.mxu1 %vm4011_vm1, %v6048_v22  ;;  %3919 = vmatprep.mubr.msk.f32.mxu0 %vm4011_vm1, %v6048_v22 }
 0x1da   :  { %3822 = vmatprep.subr.mxu1 %v6048_v22  ;;  %3946 = vmatprep.subr.mxu0 %v6048_v22 }
 0x1db   :  { %3725 = vmatmul.mubr.f32.gmra.mxu1 %v4855_v60  ;;  %v2064_v60 = vld [vmem:[#allocation2 + $0x28] sm:$0xff] }
 0x1dc   :  { %3920 = vmatmul.mubr.f32.gmra.mxu0 %v2063_v20  ;;  %3823 = vmatpush3.msra.mxu1 %v2864_v38 }
 0x1dd   :  { %3824 = vmatprep.subr.mxu1 %v6048_v22  ;;  %3727 = vmatprep.mubr.msk.f32.mxu1 %vm4011_vm1, %v6048_v22 }
 0x1de   :  { %3825 = vmatpush3.msra.mxu1 %v2863_v15  ;;  %3922 = vmatprep.mubr.msk.f32.mxu0 %vm4011_vm1, %v6048_v22 }
 0x1df   :  { %3728 = vmatmul.mubr.f32.gmra.mxu1 %v4873_v56  ;;  %3826 = vmatprep.subr.mxu1 %v6048_v22  ;;  %v2065_v56 = vld [vmem:[#allocation2 + $0x30] sm:$0xff] }
 0x1e0   :  { %3923 = vmatmul.mubr.f32.gmra.mxu0 %v2064_v60  ;;  %3827 = vmatpush3.msra.mxu1 %v2862_v9 }
 0x1e1   :  { %3730 = vmatprep.mubr.msk.f32.mxu1 %vm4011_vm1, %v6048_v22  ;;  %3925 = vmatprep.mubr.msk.f32.mxu0 %vm4011_vm1, %v6048_v22 }
 0x1e2   :  { %3828 = vmatprep.subr.mxu1 %v6048_v22 }
 0x1e3   :  { %3731 = vmatmul.mubr.f32.gmra.mxu1 %v4890_v1  ;;  %v2066_v1 = vld [vmem:[#allocation2 + $0x38] sm:$0xff] }
 0x1e4   :  { %3926 = vmatmul.mubr.f32.gmra.mxu0 %v2065_v56  ;;  %3829 = vmatpush3.msra.mxu1 %v2861_v32  ;;  %v1912_v56 = vld [vmem:[#allocation2 + $0x5f] sm:$0xff] }
 0x1e5   :  { %3733 = vmatprep.mubr.msk.f32.mxu1 %vm4011_vm1, %v6048_v22  ;;  %3830 = vmatprep.subr.mxu1 %v6048_v22 }
 0x1e6   :  { %3928 = vmatprep.mubr.msk.f32.mxu0 %vm4011_vm1, %v6048_v22  ;;  %3831 = vmatpush3.msra.mxu1 %v2860_v6 }
 0x1e7   :  { %3734 = vmatmul.mubr.f32.gmra.mxu1 %v4909_v23  ;;  %3832 = vmatprep.subr.mxu1 %v6048_v22  ;;  %v2067_v23 = vld [vmem:[#allocation2 + $0x40] sm:$0xff] }
 0x1e8   :  { %3929 = vmatmul.mubr.f32.gmra.mxu0 %v2066_v1  ;;  %3833 = vmatpush3.msra.mxu1 %v2859_v55 }
 0x1e9   :  { %3736 = vmatprep.mubr.msk.f32.mxu1 %vm4011_vm1, %v6048_v22  ;;  %3931 = vmatprep.mubr.msk.f32.mxu0 %vm4011_vm1, %v6048_v22 }
 0x1ea   :  { %3834 = vmatprep.subr.mxu1 %v6048_v22 }
 0x1eb   :  { %3737 = vmatmul.mubr.f32.gmra.mxu1 %v4932_v52  ;;  %v2856_v52 = vld [vmem:[%s6037_s5 + $0x3a0] sm:$0xff] }
 0x1ec   :  { %3932 = vmatmul.mubr.f32.gmra.mxu0 %v2067_v23  ;;  %3835 = vmatpush3.msra.mxu1 %v2858_v8 }
 0x1ed   :  { %3739 = vmatprep.mubr.msk.f32.mxu1 %vm4011_vm1, %v6048_v22  ;;  %3836 = vmatprep.subr.mxu1 %v6048_v22 }
 0x1ee   :  { %3934 = vmatprep.mubr.msk.f32.mxu0 %vm4011_vm1, %v6048_v22  ;;  %3837 = vmatpush3.msra.mxu1 %v2857_v10 }
 0x1ef   :  { %3740 = vmatmul.mubr.f32.gmra.mxu1 %v4951_v45  ;;  %3838 = vmatprep.subr.mxu1 %v6048_v22 }
 0x1f0   :  { %3935 = vmatmul.mubr.f32.gmra.mxu0 %v2068_v37  ;;  %3742 = vmatprep.mubr.msk.f32.mxu1 %vm4011_vm1, %v6048_v22 }
 0x1f1   :  { %3839 = vmatpush3.msra.mxu1 %v2856_v52  ;;  %3937 = vmatprep.mubr.msk.f32.mxu0 %vm4011_vm1, %v6048_v22  ;;  %v5501_v25 = vpop.f32.mrf.mxu1 }
 0x1f2   :  { %3840 = vmatprep.subr.mxu1 %v6048_v22  ;;  %v5503_v45 = vpop.f32.mrf.mxu0 }
 0x1f3   :  { %3743 = vmatmul.mubr.f32.gmra.mxu1 %v4974_v16  ;;  %v3395_v49 = vpop.f32.mrf.mxu1  ;;  %v2853_v16 = vld [vmem:[%s6037_s5 + $0x388] sm:$0xff] }
 0x1f4   :  { %3938 = vmatmul.mubr.f32.gmra.mxu0 %v2069_v58  ;;  %3841 = vmatpush3.msra.mxu1 %v2855_v47  ;;  %v3525_v31 = vpop.f32.mrf.mxu0 }
 0x1f5   :  { %3745 = vmatprep.mubr.msk.f32.mxu1 %vm4011_vm1, %v6048_v22  ;;  %3842 = vmatprep.subr.mxu1 %v6048_v22 }
 0x1f6   :  { %3940 = vmatprep.mubr.msk.f32.mxu0 %vm4011_vm1, %v6048_v22  ;;  %3843 = vmatpush3.msra.mxu1 %v2854_v36  ;;  %v5517_v62 = vpop.f32.mrf.mxu1  ;;  %v5519_v19 = vpop.f32.mrf.mxu0 }
 0x1f7   :  { %3746 = vmatmul.mubr.f32.gmra.mxu1 %v4996_v33  ;;  %3844 = vmatprep.subr.mxu1 %v6048_v22 }
 0x1f8   :  { %3941 = vmatmul.mubr.f32.gmra.mxu0 %v2070_v40  ;;  %3748 = vmatprep.mubr.msk.f32.mxu1 %vm4011_vm1, %v6048_v22  ;;  %v3398_v24 = vpop.f32.mrf.mxu1  ;;  %v3528_v4 = vpop.f32.mrf.mxu0 }
 0x1f9   :  { %3845 = vmatpush3.msra.mxu1 %v2853_v16  ;;  %3943 = vmatprep.mubr.msk.f32.mxu0 %vm4011_vm1, %v6048_v22 }
 0x1fa   :  { %3846 = vmatprep.subr.mxu1 %v6048_v22  ;;  %v5531_v33 = vpop.f32.mrf.mxu1  ;;  %v5533_v12 = vpop.f32.mrf.mxu0 }
 0x1fb   :  { %3749 = vmatmul.mubr.f32.gmra.mxu1 %v1594_v63 }
 0x1fc   :  { %3944 = vmatmul.mubr.f32.gmra.mxu0 %v2071_v61  ;;  %3847 = vmatpush3.msra.mxu1 %v2852_v51  ;;  %v3401_v30 = vpop.f32.mrf.mxu1  ;;  %v3531_v13 = vpop.f32.mrf.mxu0 }
 0x1fd   :  { %3848 = vmatprep.mubr.msk.f32.mxu1 %vm4011_vm1, %v6048_v22  ;;  %3978 = vmatprep.mubr.msk.f32.mxu0 %vm4011_vm1, %v6048_v22 }
 0x1fe   :  { %v5539_v18 = vpop.f32.mrf.mxu1  ;;  %v5541_v0 = vpop.f32.mrf.mxu0 }
 0x1ff   :  { %3849 = vmatmul.mubr.f32.vlgmr.msra.gmra.mxu1 %v5221_v26 }
 0x200   :  { %3851 = vmatprep.mubr.msk.f32.mxu1 %vm4011_vm1, %v6048_v22  ;;  %v3404_v28 = vpop.f32.mrf.mxu1  ;;  %v3534_v53 = vpop.f32.mrf.mxu0 }
 0x202   :  { %v953_v54 = vpop.f32.mrf.mxu1  ;;  %v1221_v5 = vpop.f32.mrf.mxu0 }
 0x203   :  { %3852 = vmatmul.mubr.f32.gmra.mxu1 %v5235_v50 }
 0x204   :  { %3854 = vmatprep.mubr.msk.f32.mxu1 %vm4011_vm1, %v6048_v22  ;;  %v3407_v3 = vpop.f32.mrf.mxu1  ;;  %v3537_v57 = vpop.f32.mrf.mxu0 }
 0x206   :  { %v958_v48 = vpop.f32.mrf.mxu1 }
 0x207   :  { %3855 = vmatmul.mubr.f32.gmra.mxu1 %v5251_v34  ;;  %v1226_v59 = vpop.f32.mrf.mxu0 }
 0x208   :  { %3857 = vmatprep.mubr.msk.f32.mxu1 %vm4011_vm1, %v6048_v22  ;;  %v3410_v26 = vpop.f32.mrf.mxu1 }
 0x209   :  { %v3540_v29 = vpop.f32.mrf.mxu0 }
 0x20b   :  { %3858 = vmatmul.mubr.f32.gmra.mxu1 %v5263_v35 }
 0x20c   :  { %3860 = vmatprep.mubr.msk.f32.mxu1 %vm4011_vm1, %v6048_v22  ;;  %v5555_v50 = vpop.f32.mrf.mxu1 }
 0x20d   :  { %v5557_v27 = vpop.f32.mrf.mxu0 }
 0x20e   :  { %v3413_v43 = vpop.f32.mrf.mxu1 }
 0x20f   :  { %3861 = vmatmul.mubr.f32.gmra.mxu1 %v5286_v41  ;;  %v3543_v7 = vpop.f32.mrf.mxu0 }
 0x210   :  { %3863 = vmatprep.mubr.msk.f32.mxu1 %vm4011_vm1, %v6048_v22 }
 0x211   :  { %v5562_v34 = vpop.f32.mrf.mxu1 }
 0x212   :  { %v5564_v42 = vpop.f32.mrf.mxu0 }
 0x213   :  { %3864 = vmatmul.mubr.f32.gmra.mxu1 %v5305_v21  ;;  %v3416_v35 = vpop.f32.mrf.mxu1 }
 0x214   :  { %3866 = vmatprep.mubr.msk.f32.mxu1 %vm4011_vm1, %v6048_v22  ;;  %v3546_v46 = vpop.f32.mrf.mxu0 }
 0x217   :  { %3867 = vmatmul.mubr.f32.gmra.mxu1 %v5328_v17  ;;  %v5570_v44 = vpop.f32.mrf.mxu1 }
 0x218   :  { %3869 = vmatprep.mubr.msk.f32.mxu1 %vm4011_vm1, %v6048_v22  ;;  %v5574_v41 = vpop.f32.mrf.mxu0 }
 0x219   :  { %v3419_v39 = vpop.f32.mrf.mxu1 }
 0x21a   :  { %v3549_v38 = vpop.f32.mrf.mxu0 }
 0x21b   :  { %3870 = vmatmul.mubr.f32.gmra.mxu1 %v5347_v2 }
 0x21c   :  { %3872 = vmatprep.mubr.msk.f32.mxu1 %vm4011_vm1, %v6048_v22  ;;  %v5579_v21 = vpop.f32.mrf.mxu1 }
 0x21d   :  { %v5581_v20 = vpop.f32.mrf.mxu0 }
 0x21e   :  { %v3422_v15 = vpop.f32.mrf.mxu1 }
 0x21f   :  { %3873 = vmatmul.mubr.f32.gmra.mxu1 %v5370_v11  ;;  %v3552_v17 = vpop.f32.mrf.mxu0 }
 0x220   :  { %3875 = vmatprep.mubr.msk.f32.mxu1 %vm4011_vm1, %v6048_v22 }
 0x222   :  { %v983_v9 = vpop.f32.mrf.mxu1  ;;  %v1251_v60 = vpop.f32.mrf.mxu0 }
 0x223   :  { %3876 = vmatmul.mubr.f32.gmra.mxu1 %v5387_v14 }
 0x224   :  { %3878 = vmatprep.mubr.msk.f32.mxu1 %vm4011_vm1, %v6048_v22  ;;  %v3425_v2 = vpop.f32.mrf.mxu1  ;;  %v3555_v32 = vpop.f32.mrf.mxu0 }
 0x227   :  { %3879 = vmatmul.mubr.f32.gmra.mxu1 %v1912_v56  ;;  %v1053_v6 = vpop.f32.mrf.mxu1 }
 0x228   :  { %v1054_v55 = vadd.f32 %v1053_v6, %v5501_v25  ;;  %v5590_v1 = vpop.f32.mrf.mxu0 }
 0x229   :  { %v3460_v11 = vpop.f32.mrf.mxu1 }
 0x22a   :  { %v3655_v8 = vpop.f32.mrf.mxu0  ;;  %v5593_v23 = vadd.f32 %v5503_v45, %v1054_v55  ;;  %v2398_v55 = vld [vmem:[%s6041_s9 + $0xe8] sm:$0xff] }
 0x22b   :  { %v1058_v10 = vpop.f32.mrf.mxu1  ;;  %v2382_v11 = vld [vmem:[%s6041_s9 + $0x68] sm:$0xff] }
 0x22c   :  { %v1059_v14 = vadd.f32 %v1058_v10, %v5517_v62  ;;  %v5596_v52 = vpop.f32.mrf.mxu0  ;;  %v2397_v10 = vld [vmem:[%s6041_s9 + $0xe0] sm:$0xff] }
 0x22d   :  { %v3463_v37 = vpop.f32.mrf.mxu1 }
 0x22e   :  { %v3658_v47 = vpop.f32.mrf.mxu0  ;;  %v5599_v58 = vadd.f32 %v5519_v19, %v1059_v14 }
 0x22f   :  { %v1063_v36 = vpop.f32.mrf.mxu1  ;;  %v2381_v47 = vld [vmem:[%s6041_s9 + $0x60] sm:$0xff] }
 0x230   :  { %v1064_v25 = vadd.f32 %v1063_v36, %v5531_v33  ;;  %v5602_v49 = vpop.f32.mrf.mxu0 }
 0x231   :  { %v3466_v31 = vpop.f32.mrf.mxu1 }
 0x232   :  { %v3661_v16 = vpop.f32.mrf.mxu0  ;;  %v5605_v45 = vadd.f32 %v5533_v12, %v1064_v25  ;;  %v2396_v25 = vld [vmem:[%s6041_s9 + $0xd8] sm:$0xff] }
 0x233   :  { %v1068_v40 = vpop.f32.mrf.mxu1 }
 0x234   :  { %v1069_v62 = vadd.f32 %v1068_v40, %v5539_v18  ;;  %v5608_v24 = vpop.f32.mrf.mxu0 }
 0x235   :  { %v3469_v4 = vpop.f32.mrf.mxu1 }
 0x236   :  { %v3664_v51 = vpop.f32.mrf.mxu0  ;;  %v5611_v19 = vadd.f32 %v5541_v0, %v1069_v62  ;;  %v2395_v62 = vld [vmem:[%s6041_s9 + $0xd0] sm:$0xff] }
 0x237   :  { %v1073_v63 = vpop.f32.mrf.mxu1 }
 0x238   :  { %v1539_v61 = vpop.f32.mrf.mxu0 }
 0x239   :  { %v3472_v33 = vpop.f32.mrf.mxu1  ;;  %v2394_v61 = vld [vmem:[%s6041_s9 + $0xc8] sm:$0xff] }
 0x23a   :  { %v3667_v30 = vpop.f32.mrf.mxu0 }
 0x23c   :  { %v1078_v13 = vpop.f32.mrf.mxu1 }
 0x23d   :  { %v1544_v28 = vpop.f32.mrf.mxu0 }
 0x23e   :  { %v3475_v53 = vpop.f32.mrf.mxu1  ;;  %v2393_v28 = vld [vmem:[%s6041_s9 + $0xc0] sm:$0xff] }
 0x23f   :  { %v3670_v54 = vpop.f32.mrf.mxu0 }
 0x242   :  { %v1083_v12 = vpop.f32.mrf.mxu1 }
 0x243   :  { %v1084_v5 = vadd.f32 %v1083_v12, %v5555_v50  ;;  %v5614_v3 = vpop.f32.mrf.mxu0 }
 0x244   :  { %v3478_v18 = vpop.f32.mrf.mxu1 }
 0x245   :  { %v3673_v57 = vpop.f32.mrf.mxu0  ;;  %v5617_v48 = vadd.f32 %v5557_v27, %v1084_v5  ;;  %v2392_v5 = vld [vmem:[%s6041_s9 + $0xb8] sm:$0xff] }
 0x247   :  { %v1088_v0 = vpop.f32.mrf.mxu1 }
 0x248   :  { %v1089_v59 = vadd.f32 %v1088_v0, %v5562_v34  ;;  %v5620_v26 = vpop.f32.mrf.mxu0 }
 0x249   :  { %v3481_v29 = vpop.f32.mrf.mxu1 }
 0x24a   :  { %v3676_v43 = vpop.f32.mrf.mxu0  ;;  %v5623_v7 = vadd.f32 %v5564_v42, %v1089_v59  ;;  %v2391_v59 = vld [vmem:[%s6041_s9 + $0xb0] sm:$0xff] }
 0x24d   :  { %v1093_v35 = vpop.f32.mrf.mxu1 }
 0x24e   :  { %v1094_v50 = vadd.f32 %v1093_v35, %v5570_v44  ;;  %v5626_v46 = vpop.f32.mrf.mxu0  ;;  %v2400_v44 = vld [vmem:[%s6041_s9 + $0xf8] sm:$0xff] }
 0x24f   :  { %v3484_v39 = vpop.f32.mrf.mxu1  ;;  %3188 = vmatprep.subr.mxu1 %v2400_v44 }
 0x250   :  { %v3679_v38 = vpop.f32.mrf.mxu0  ;;  %v5629_v27 = vadd.f32 %v5574_v41, %v1094_v50  ;;  %v2384_v41 = vld [vmem:[%s6041_s9 + $0x78] sm:$0xff]  ;;  %v2390_v50 = vld [vmem:[%s6041_s9 + $0xa8] sm:$0xff] }
 0x251   :  { %3189 = vmatpush3.msra.mxu1 %v2384_v41  ;;  %v2387_v41 = vld [vmem:[%s6041_s9 + $0x90] sm:$0xff] }
 0x252   :  { %v1098_v15 = vpop.f32.mrf.mxu1 }
 0x253   :  { %v1099_v34 = vadd.f32 %v1098_v15, %v5579_v21  ;;  %v5632_v17 = vpop.f32.mrf.mxu0  ;;  %v2399_v21 = vld [vmem:[%s6041_s9 + $0xf0] sm:$0xff] }
 0x254   :  { %v3487_v9 = vpop.f32.mrf.mxu1  ;;  %3190 = vmatprep.subr.mxu1 %v2399_v21 }
 0x255   :  { %v3682_v60 = vpop.f32.mrf.mxu0  ;;  %v5635_v42 = vadd.f32 %v5581_v20, %v1099_v34  ;;  %v2383_v20 = vld [vmem:[%s6041_s9 + $0x70] sm:$0xff]  ;;  %v2389_v34 = vld [vmem:[%s6041_s9 + $0xa0] sm:$0xff] }
 0x256   :  { %3191 = vmatpush3.msra.mxu1 %v2383_v20  ;;  %v2373_v60 = vld [vmem:[%s6041_s9 + $0x20] sm:$0xff]  ;;  %v2386_v20 = vld [vmem:[%s6041_s9 + $0x88] sm:$0xff] }
 0x257   :  { %3192 = vmatprep.subr.mxu1 %v2398_v55 }
 0x258   :  { %v1103_v2 = vpop.f32.mrf.mxu1  ;;  %v1569_v32 = vpop.f32.mrf.mxu0  ;;  %3193 = vmatpush3.msra.mxu1 %v2382_v11  ;;  %v2370_v11 = vld [vmem:[%s6041_s9 + $0x8] sm:$0xff] }
 0x259   :  { %3194 = vmatprep.subr.mxu1 %v2397_v10  ;;  %v2372_v32 = vld [vmem:[%s6041_s9 + $0x18] sm:$0xff]  ;;  %v2369_v10 = vld [vmem:[%s6041_s9] sm:$0xff] }
 0x25a   :  { %v3490_v56 = vpop.f32.mrf.mxu1  ;;  %v3685_v6 = vpop.f32.mrf.mxu0  ;;  %3195 = vmatpush3.msra.mxu1 %v2381_v47  ;;  %v2432_v47 = vld [vmem:[%s6041_s9 + $0x1f8] sm:$0xff] }
 0x25b   :  { %3196 = vmatprep.subr.mxu1 %v2396_v25  ;;  %v2371_v56 = vld [vmem:[%s6041_s9 + $0x10] sm:$0xff] }
 0x25d   :  { %v1360_v8 = vpop.f32.mrf.mxu1 }
 0x25e   :  { %v1414_v14 = vadd.f32 %v1360_v8, %v5593_v23  ;;  %v5659_v37 = vpop.f32.mrf.mxu0  ;;  %v2380_v23 = vld [vmem:[%s6041_s9 + $0x58] sm:$0xff]  ;;  %v2385_v8 = vld [vmem:[%s6041_s9 + $0x80] sm:$0xff] }
 0x25f   :  { %v3590_v36 = vpop.f32.mrf.mxu1  ;;  %3197 = vmatpush3.msra.mxu1 %v2380_v23 }
 0x260   :  { %v3785_v31 = vpop.f32.mrf.mxu0  ;;  %v5668_v16 = vadd.f32 %v5590_v1, %v1414_v14  ;;  %3198 = vmatprep.subr.mxu1 %v2395_v62  ;;  %v2379_v1 = vld [vmem:[%s6041_s9 + $0x50] sm:$0xff] }
 0x261   :  { %v1365_v40 = vpop.f32.mrf.mxu1  ;;  %3199 = vmatpush3.msra.mxu1 %v2379_v1 }
 0x262   :  { %v1415_v4 = vadd.f32 %v1365_v40, %v5599_v58  ;;  %v5677_v51 = vpop.f32.mrf.mxu0  ;;  %3200 = vmatprep.subr.mxu1 %v2394_v61  ;;  %v2378_v58 = vld [vmem:[%s6041_s9 + $0x48] sm:$0xff] }
 0x263   :  { %v3593_v63 = vpop.f32.mrf.mxu1  ;;  %3201 = vmatpush3.msra.mxu1 %v2378_v58 }
 0x264   :  { %v3788_v33 = vpop.f32.mrf.mxu0  ;;  %v5686_v30 = vadd.f32 %v5596_v52, %v1415_v4  ;;  %3202 = vmatprep.subr.mxu1 %v2393_v28  ;;  %v2377_v52 = vld [vmem:[%s6041_s9 + $0x40] sm:$0xff] }
 0x265   :  { %v1370_v13 = vpop.f32.mrf.mxu1  ;;  %3203 = vmatpush3.msra.mxu1 %v2377_v52 }
 0x266   :  { %v1416_v53 = vadd.f32 %v1370_v13, %v5605_v45  ;;  %v5695_v54 = vpop.f32.mrf.mxu0  ;;  %3204 = vmatprep.subr.mxu1 %v2392_v5  ;;  %v2376_v45 = vld [vmem:[%s6041_s9 + $0x38] sm:$0xff] }
 0x267   :  { %v3596_v12 = vpop.f32.mrf.mxu1  ;;  %3205 = vmatpush3.msra.mxu1 %v2376_v45 }
 0x268   :  { %v3791_v18 = vpop.f32.mrf.mxu0  ;;  %v5704_v57 = vadd.f32 %v5602_v49, %v1416_v53  ;;  %3206 = vmatprep.subr.mxu1 %v2391_v59  ;;  %v2375_v49 = vld [vmem:[%s6041_s9 + $0x30] sm:$0xff] }
 0x269   :  { %v1375_v0 = vpop.f32.mrf.mxu1  ;;  %3207 = vmatpush3.msra.mxu1 %v2375_v49 }
 0x26a   :  { %v1417_v29 = vadd.f32 %v1375_v0, %v5611_v19  ;;  %v5713_v43 = vpop.f32.mrf.mxu0  ;;  %3208 = vmatprep.subr.mxu1 %v2390_v50  ;;  %v2374_v19 = vld [vmem:[%s6041_s9 + $0x28] sm:$0xff] }
 0x26b   :  { %v3599_v35 = vpop.f32.mrf.mxu1  ;;  %3209 = vmatpush3.msra.mxu1 %v2374_v19 }
 0x26c   :  { %v3794_v39 = vpop.f32.mrf.mxu0  ;;  %v5722_v38 = vadd.f32 %v5608_v24, %v1417_v29  ;;  %3210 = vmatprep.subr.mxu1 %v2389_v34  ;;  %v2388_v24 = vld [vmem:[%s6041_s9 + $0x98] sm:$0xff] }
 0x26d   :  { %v1380_v15 = vpop.f32.mrf.mxu1  ;;  %3211 = vmatpush3.msra.mxu1 %v2373_v60 }
 0x26e   :  { %v1857_v9 = vpop.f32.mrf.mxu0  ;;  %3212 = vmatprep.subr.mxu1 %v2388_v24 }
 0x26f   :  { %v3602_v44 = vpop.f32.mrf.mxu1  ;;  %3213 = vmatpush3.msra.mxu1 %v2372_v32  ;;  %v2595_v9 = vld [vmem:[%s6043_s11 + $0x70] sm:$0xff] }
 0x270   :  { %v3797_v2 = vpop.f32.mrf.mxu0  ;;  %3214 = vmatprep.subr.mxu1 %v2387_v41 }
 0x271   :  { %3215 = vmatpush3.msra.mxu1 %v2371_v56 }
 0x272   :  { %v1385_v21 = vpop.f32.mrf.mxu1  ;;  %3216 = vmatprep.subr.mxu1 %v2386_v20 }
 0x273   :  { %v1862_v6 = vpop.f32.mrf.mxu0  ;;  %3217 = vmatpush3.msra.mxu1 %v2370_v11 }
 0x274   :  { %v3605_v55 = vpop.f32.mrf.mxu1  ;;  %3218 = vmatprep.subr.mxu1 %v2385_v8 }
 0x275   :  { %v3800_v14 = vpop.f32.mrf.mxu0  ;;  %3219 = vmatpush3.msra.mxu1 %v2369_v10 }
 0x276   :  { %3223 = vmatprep.subr.mxu1 %v2432_v47 }
 0x278   :  { %v1390_v36 = vpop.f32.mrf.mxu1 }
 0x279   :  { %v1420_v25 = vadd.f32 %v1390_v36, %v5617_v48  ;;  %v5761_v31 = vpop.f32.mrf.mxu0 }
 0x27a   :  { %v3608_v23 = vpop.f32.mrf.mxu1 }
 0x27b   :  { %v3803_v40 = vpop.f32.mrf.mxu0  ;;  %v1579_v62 = vadd.f32 %v5614_v3, %v1420_v25 }
 0x27d   :  { %v1395_v4 = vpop.f32.mrf.mxu1 }
 0x27e   :  { %v1421_v1 = vadd.f32 %v1395_v4, %v5623_v7  ;;  %v5765_v63 = vpop.f32.mrf.mxu0 }
 0x27f   :  { %v3611_v61 = vpop.f32.mrf.mxu1 }
 0x280   :  { %v3806_v33 = vpop.f32.mrf.mxu0  ;;  %v1580_v58 = vadd.f32 %v5620_v26, %v1421_v1 }
 0x283   :  { %v1400_v13 = vpop.f32.mrf.mxu1 }
 0x284   :  { %v1422_v28 = vadd.f32 %v1400_v13, %v5629_v27  ;;  %v5769_v53 = vpop.f32.mrf.mxu0 }
 0x285   :  { %v3614_v48 = vpop.f32.mrf.mxu1 }
 0x286   :  { %v3809_v52 = vpop.f32.mrf.mxu0  ;;  %v1581_v12 = vadd.f32 %v5626_v46, %v1422_v28 }
 0x288   :  { %v1405_v5 = vpop.f32.mrf.mxu1 }
 0x289   :  { %v1423_v3 = vadd.f32 %v1405_v5, %v5635_v42  ;;  %v5773_v18 = vpop.f32.mrf.mxu0 }
 0x28a   :  { %v3617_v7 = vpop.f32.mrf.mxu1 }
 0x28b   :  { %v3812_v45 = vpop.f32.mrf.mxu0  ;;  %v1582_v0 = vadd.f32 %v5632_v17, %v1423_v3  ;;  %v2596_v17 = vld [vmem:[%s6043_s11 + $0x78] sm:$0xff] }
 0x28c   :  { %3947 = vmatpush3.msra.mxu0 %v2596_v17 }
 0x28d   :  { %3948 = vmatprep.subr.mxu0 %v6048_v22 }
 0x28e   :  { %v1410_v59 = vpop.f32.mrf.mxu1  ;;  %v1887_v26 = vpop.f32.mrf.mxu0  ;;  %3949 = vmatpush3.msra.mxu0 %v2595_v9 }
 0x28f   :  { %3950 = vmatprep.subr.mxu0 %v6048_v22 }
 0x290   :  { %v3620_v29 = vpop.f32.mrf.mxu1  ;;  %v3815_v49 = vpop.f32.mrf.mxu0 }
 0x293   :  { %v1678_v27 = vpop.f32.mrf.mxu1 }
 0x294   :  { %v1732_v35 = vadd.f32 %v1678_v27, %v5668_v16  ;;  %v5777_v50 = vpop.f32.mrf.mxu0 }
 0x295   :  { %v3720_v39 = vpop.f32.mrf.mxu1 }
 0x296   :  { %v3915_v46 = vpop.f32.mrf.mxu0  ;;  %v1891_v19 = vadd.f32 %v5659_v37, %v1732_v35 }
 0x297   :  { %v1683_v42 = vpop.f32.mrf.mxu1 }
 0x298   :  { %v1733_v15 = vadd.f32 %v1683_v42, %v5686_v30  ;;  %v5781_v34 = vpop.f32.mrf.mxu0 }
 0x299   :  { %v3723_v16 = vpop.f32.mrf.mxu1 }
 0x29a   :  { %v3918_v60 = vpop.f32.mrf.mxu0  ;;  %v1892_v44 = vadd.f32 %v5677_v51, %v1733_v15 }
 0x29b   :  { %v1688_v37 = vpop.f32.mrf.mxu1 }
 0x29c   :  { %v1734_v30 = vadd.f32 %v1688_v37, %v5704_v57  ;;  %v5792_v24 = vpop.f32.mrf.mxu0  ;;  %v5836_v37 = vld [vmem:[%s6040_s8] ss:$0 sm:$0xff] }
 0x29d   :  { %v3726_v2 = vpop.f32.mrf.mxu1 }
 0x29e   :  { %v3921_v32 = vpop.f32.mrf.mxu0  ;;  %v1893_v41 = vadd.f32 %v5695_v54, %v1734_v30 }
 0x29f   :  { %v1693_v21 = vpop.f32.mrf.mxu1 }
 0x2a0   :  { %v1735_v56 = vadd.f32 %v1693_v21, %v5722_v38  ;;  %v5797_v6 = vpop.f32.mrf.mxu0 }
 0x2a1   :  { %v3729_v51 = vpop.f32.mrf.mxu1 }
 0x2a2   :  { %v3924_v20 = vpop.f32.mrf.mxu0  ;;  %v1894_v55 = vadd.f32 %v5713_v43, %v1735_v56 }
 0x2a3   :  { %v1698_v11 = vpop.f32.mrf.mxu1 }
 0x2a4   :  { %v2175_v8 = vpop.f32.mrf.mxu0 }
 0x2a5   :  { %v3732_v57 = vpop.f32.mrf.mxu1 }
 0x2a6   :  { %v3927_v10 = vpop.f32.mrf.mxu0 }
 0x2a7   :  { %v1703_v14 = vpop.f32.mrf.mxu1 }
 0x2a8   :  { %v2180_v47 = vpop.f32.mrf.mxu0 }
 0x2a9   :  { %v3735_v36 = vpop.f32.mrf.mxu1 }
 0x2aa   :  { %v3930_v25 = vpop.f32.mrf.mxu0 }
 0x2ab   :  { %v1708_v23 = vpop.f32.mrf.mxu1 }
 0x2ac   :  { %v1738_v40 = vadd.f32 %v1708_v23, %v1579_v62  ;;  %v5800_v54 = vpop.f32.mrf.mxu0 }
 0x2ad   :  { %v3738_v4 = vpop.f32.mrf.mxu1 }
 0x2ae   :  { %v3933_v38 = vpop.f32.mrf.mxu0  ;;  %v5803_v1 = vadd.f32 %v5761_v31, %v1738_v40 }
 0x2af   :  { %v1713_v61 = vpop.f32.mrf.mxu1 }
 0x2b0   :  { %v1739_v33 = vadd.f32 %v1713_v61, %v1580_v58  ;;  %v5805_v43 = vpop.f32.mrf.mxu0 }
 0x2b1   :  { %v3741_v13 = vpop.f32.mrf.mxu1 }
 0x2b2   :  { %v3936_v28 = vpop.f32.mrf.mxu0  ;;  %v5808_v48 = vadd.f32 %v5765_v63, %v1739_v33 }
 0x2b3   :  { %v1718_v52 = vpop.f32.mrf.mxu1 }
 0x2b4   :  { %v1740_v5 = vadd.f32 %v1718_v52, %v1581_v12  ;;  %v5810_v3 = vpop.f32.mrf.mxu0 }
 0x2b5   :  { %v3744_v62 = vpop.f32.mrf.mxu1 }
 0x2b6   :  { %v3939_v7 = vpop.f32.mrf.mxu0  ;;  %v5813_v45 = vadd.f32 %v5769_v53, %v1740_v5  ;;  %v5823_v53 = vld [vmem:[%s6038_s6] ss:$0 sm:$0xff] }
 0x2b7   :  { %v1723_v31 = vpop.f32.mrf.mxu1 }
 0x2b8   :  { %v1741_v59 = vadd.f32 %v1723_v31, %v1582_v0  ;;  %v5815_v26 = vpop.f32.mrf.mxu0 }
 0x2b9   :  { %v3747_v58 = vpop.f32.mrf.mxu1 }
 0x2ba   :  { %v3942_v29 = vpop.f32.mrf.mxu0  ;;  %v5818_v49 = vadd.f32 %v5773_v18, %v1741_v59  ;;  %v5830_v18 = vld [vmem:[%s6039_s7] ss:$0 sm:$0xff] }
 0x2bb   :  { %v1728_v63 = vpop.f32.mrf.mxu1 }
 0x2bc   :  { %v2205_v27 = vpop.f32.mrf.mxu0 }
 0x2bd   :  { %v3750_v35 = vpop.f32.mrf.mxu1 }
 0x2be   :  { %v3945_v12 = vpop.f32.mrf.mxu0 }
 0x2bf   :  { %v1996_v39 = vpop.f32.mrf.mxu1 }
 0x2c0   :  { %v2050_v46 = vadd.f32 %v1996_v39, %v1891_v19 }
 0x2c1   :  { %v3850_v42 = vpop.f32.mrf.mxu1 }
 0x2c2   :  { %v2209_v0 = vadd.f32 %v5777_v50, %v2050_v46 }
 0x2c3   :  { %v2001_v15 = vpop.f32.mrf.mxu1 }
 0x2c4   :  { %v2227_v17 = vadd.f32 %v5823_v53, %v2209_v0  ;;  %v2051_v9 = vadd.f32 %v2001_v15, %v1892_v44 }
 0x2c5   :  { %v3853_v16 = vpop.f32.mrf.mxu1 }
 0x2c6   :  { %v2238_v60 = vmax.f32 %v2227_v17, 0.0  ;;  %v2210_v19 = vadd.f32 %v5781_v34, %v2051_v9 }
 0x2c7   :  { %v2006_v30 = vpop.f32.mrf.mxu1 }
 0x2c8   :  { %v2256_v50 = vmul.f32 %v5830_v18, %v2238_v60  ;;  %v2228_v2 = vadd.f32 %v5823_v53, %v2210_v19  ;;  %v2052_v44 = vadd.f32 %v2006_v30, %v1893_v41 }
 0x2c9   :  { %v3856_v32 = vpop.f32.mrf.mxu1 }
 0x2ca   :  { %v2274_v21 = vadd.f32 %v5836_v37, %v2256_v50  ;;  %v2239_v56 = vmax.f32 %v2228_v2, 0.0  ;;  %v2211_v51 = vadd.f32 %v5792_v24, %v2052_v44 }
 0x2cb   :  { %v2011_v20 = vpop.f32.mrf.mxu1 }
 0x2cc   :  { %2285 = vst [vmem:[#allocation3] sm:$0xff] %v2274_v21  ;;  %v2257_v34 = vmul.f32 %v5830_v18, %v2239_v56  ;;  %v2229_v11 = vadd.f32 %v5823_v53, %v2211_v51  ;;  %v2053_v8 = vadd.f32 %v2011_v20, %v1894_v55 }
 0x2cd   :  { %v3859_v57 = vpop.f32.mrf.mxu1 }
 0x2ce   :  { %v2275_v10 = vadd.f32 %v5836_v37, %v2257_v34  ;;  %v2240_v14 = vmax.f32 %v2229_v11, 0.0  ;;  %v2212_v47 = vadd.f32 %v5797_v6, %v2053_v8 }
 0x2cf   :  { %v2016_v41 = vpop.f32.mrf.mxu1 }
 0x2d0   :  { %2286 = vst [vmem:[#allocation3 + $0x8] sm:$0xff] %v2275_v10  ;;  %v2258_v36 = vmul.f32 %v5830_v18, %v2240_v14  ;;  %v2230_v25 = vadd.f32 %v5823_v53, %v2212_v47 }
 0x2d1   :  { %v3862_v24 = vpop.f32.mrf.mxu1 }
 0x2d2   :  { %v2276_v23 = vadd.f32 %v5836_v37, %v2258_v36  ;;  %v2241_v40 = vmax.f32 %v2230_v25, 0.0 }
 0x2d3   :  { %v2021_v4 = vpop.f32.mrf.mxu1  ;;  %v2303_v2 = vld [vmem:[#allocation3 + $0x2] sm:$0x1]  ;;  %v2304_v44 = vld [vmem:[#allocation3 + $0x3] sm:$0x1]  ;;  %v2296_v51 = vld [vmem:[#allocation3] sm:$0x1] }
 0x2d4   :  { %2287 = vst [vmem:[#allocation3 + $0x10] sm:$0xff] %v2276_v23  ;;  %v2259_v55 = vmul.f32 %v5830_v18, %v2241_v40  ;;  %v2299_v47 = vld [vmem:[#allocation3 + $0x7] sm:$0x1]  ;;  %v2305_v23 = vmax.f32 %v2303_v2, %v2304_v44  ;;  %v2408_v2 = vld [vmem:[%s6041_s9 + $0x138] sm:$0xff]  ;;  %v2423_v44 = vld [vmem:[%s6041_s9 + $0x1b0] sm:$0xff] }
 0x2d5   :  { %v3865_v38 = vpop.f32.mrf.mxu1 }
 0x2d6   :  { %v2277_v61 = vadd.f32 %v5836_v37, %v2259_v55 }
 0x2d7   :  { %v2026_v33 = vpop.f32.mrf.mxu1  ;;  %v2307_v50 = vld [vmem:[#allocation3 + $0xa] sm:$0x1] }
 0x2d8   :  { %2288 = vst [vmem:[#allocation3 + $0x18] sm:$0xff] %v2277_v61  ;;  %v2056_v6 = vadd.f32 %v2026_v33, %v5803_v1 }
 0x2d9   :  { %v3868_v13 = vpop.f32.mrf.mxu1 }
 0x2da   :  { %v2215_v28 = vadd.f32 %v5800_v54, %v2056_v6  ;;  %v2416_v13 = vld [vmem:[%s6041_s9 + $0x178] sm:$0xff] }
 0x2db   :  { %v2031_v52 = vpop.f32.mrf.mxu1 }
 0x2dc   :  { %v2233_v5 = vadd.f32 %v5823_v53, %v2215_v28  ;;  %v2057_v62 = vadd.f32 %v2031_v52, %v5808_v48 }
 0x2dd   :  { %v3871_v7 = vpop.f32.mrf.mxu1 }
 0x2de   :  { %v2244_v31 = vmax.f32 %v2233_v5, 0.0  ;;  %v2216_v59 = vadd.f32 %v5805_v43, %v2057_v62  ;;  %v2431_v62 = vld [vmem:[%s6041_s9 + $0x1f0] sm:$0xff]  ;;  %v2317_v7 = vld [vmem:[#allocation3 + $0x10] sm:$0x1] }
 0x2df   :  { %v2036_v58 = vpop.f32.mrf.mxu1  ;;  %v2321_v61 = vld [vmem:[#allocation3 + $0x18] sm:$0x1] }
 0x2e0   :  { %v2262_v29 = vmul.f32 %v5830_v18, %v2244_v31  ;;  %v2234_v63 = vadd.f32 %v5823_v53, %v2216_v59  ;;  %v2058_v27 = vadd.f32 %v2036_v58, %v5813_v45  ;;  %v2318_v31 = vld [vmem:[#allocation3 + $0x11] sm:$0x1]  ;;  %v2320_v58 = vld [vmem:[#allocation3 + $0x17] sm:$0x1] }
 0x2e1   :  { %v3874_v1 = vpop.f32.mrf.mxu1 }
 0x2e2   :  { %v2280_v35 = vadd.f32 %v5836_v37, %v2262_v29  ;;  %v2245_v54 = vmax.f32 %v2234_v63, 0.0  ;;  %v2217_v12 = vadd.f32 %v5810_v3, %v2058_v27  ;;  %v2415_v27 = vld [vmem:[%s6041_s9 + $0x170] sm:$0xff]  ;;  %v2322_v1 = vmax.f32 %v2320_v58, %v2321_v61 }
 0x2e3   :  { %v2041_v39 = vpop.f32.mrf.mxu1  ;;  %v2587_v58 = vld [vmem:[%s6043_s11 + $0x30] sm:$0xff] }
 0x2e4   :  { %2291 = vst [vmem:[#allocation3 + $0x30] sm:$0xff] %v2280_v35  ;;  %v2263_v48 = vmul.f32 %v5830_v18, %v2245_v54  ;;  %v2235_v46 = vadd.f32 %v5823_v53, %v2217_v12  ;;  %v2059_v43 = vadd.f32 %v2041_v39, %v5818_v49  ;;  %v2306_v49 = vld [vmem:[#allocation3 + $0x9] sm:$0x1]  ;;  %v2430_v12 = vld [vmem:[%s6041_s9 + $0x1e8] sm:$0xff] }
 0x2e5   :  { %v3877_v42 = vpop.f32.mrf.mxu1  ;;  %v2308_v57 = vmax.f32 %v2306_v49, %v2307_v50  ;;  %v2414_v39 = vld [vmem:[%s6041_s9 + $0x168] sm:$0xff]  ;;  %v2409_v49 = vld [vmem:[%s6041_s9 + $0x140] sm:$0xff]  ;;  %v2424_v50 = vld [vmem:[%s6041_s9 + $0x1b8] sm:$0xff] }
 0x2e6   :  { %v2281_v0 = vadd.f32 %v5836_v37, %v2263_v48  ;;  %v2246_v15 = vmax.f32 %v2235_v46, 0.0  ;;  %v2218_v45 = vadd.f32 %v5815_v26, %v2059_v43  ;;  %v2300_v26 = vld [vmem:[#allocation3 + $0x8] sm:$0x1]  ;;  %v2319_v48 = vmax.f32 %v2317_v7, %v2318_v31  ;;  %v2429_v43 = vld [vmem:[%s6041_s9 + $0x1e0] sm:$0xff]  ;;  %v2590_v7 = vld [vmem:[%s6043_s11 + $0x48] sm:$0xff] }
 0x2e7   :  { %v2046_v17 = vpop.f32.mrf.mxu1  ;;  %v2301_v36 = vmax.f32 %v2299_v47, %v2300_v26  ;;  %v2309_v55 = vmax.f32 %v2305_v23, %v2308_v57  ;;  %v2413_v42 = vld [vmem:[%s6041_s9 + $0x160] sm:$0xff]  ;;  %v2314_v47 = vld [vmem:[#allocation3 + $0x16] sm:$0x1]  ;;  %v2311_v23 = vld [vmem:[#allocation3 + $0xf] sm:$0x1] }
 0x2e8   :  { %2292 = vst [vmem:[#allocation3 + $0x38] sm:$0xff] %v2281_v0  ;;  %v2264_v9 = vmul.f32 %v5830_v18, %v2246_v15  ;;  %v2236_v3 = vadd.f32 %v5823_v53, %v2218_v45  ;;  %v2323_v0 = vmax.f32 %v2319_v48, %v2322_v1  ;;  %v2428_v45 = vld [vmem:[%s6041_s9 + $0x1d8] sm:$0xff]  ;;  %v2405_v57 = vld [vmem:[%s6041_s9 + $0x120] sm:$0xff]  ;;  %v2583_v1 = vld [vmem:[%s6043_s11 + $0x10] sm:$0xff] }
 0x2e9   :  { %v3880_v16 = vpop.f32.mrf.mxu1  ;;  %v2589_v31 = vld [vmem:[%s6043_s11 + $0x40] sm:$0xff] }
 0x2ea   :  { %v2282_v60 = vadd.f32 %v5836_v37, %v2264_v9  ;;  %v2247_v19 = vmax.f32 %v2236_v3, 0.0  ;;  %v2412_v9 = vld [vmem:[%s6041_s9 + $0x158] sm:$0xff]  ;;  %v2427_v3 = vld [vmem:[%s6041_s9 + $0x1d0] sm:$0xff] }
 0x2eb   :  { %v2331_v32 = vld [vmem:[#allocation3 + $0x33] sm:$0x1]  ;;  %v2332_v21 = vld [vmem:[#allocation3 + $0x34] sm:$0x1]  ;;  %v2324_v20 = vld [vmem:[#allocation3 + $0x31] sm:$0x1] }
 0x2ec   :  { %2293 = vst [vmem:[#allocation3 + $0x40] sm:$0xff] %v2282_v60  ;;  %v2265_v30 = vmul.f32 %v5830_v18, %v2247_v19  ;;  %v2325_v34 = vld [vmem:[#allocation3 + $0x32] sm:$0x1]  ;;  %v2333_v10 = vmax.f32 %v2331_v32, %v2332_v21  ;;  %v2297_v18 = vld [vmem:[#allocation3 + $0x1] sm:$0x1]  ;;  %v2411_v16 = vld [vmem:[%s6041_s9 + $0x150] sm:$0xff] }
 0x2ed   :  { %v2326_v25 = vmax.f32 %v2324_v20, %v2325_v34  ;;  %v2426_v60 = vld [vmem:[%s6041_s9 + $0x1c8] sm:$0xff]  ;;  %v2407_v32 = vld [vmem:[%s6041_s9 + $0x130] sm:$0xff] }
 0x2ee   :  { %v2283_v56 = vadd.f32 %v5836_v37, %v2265_v30  ;;  %v2298_v37 = vmax.f32 %v2296_v51, %v2297_v18  ;;  %v2410_v19 = vld [vmem:[%s6041_s9 + $0x148] sm:$0xff]  ;;  %v2425_v30 = vld [vmem:[%s6041_s9 + $0x1c0] sm:$0xff]  ;;  %v2313_v18 = vld [vmem:[#allocation3 + $0x15] sm:$0x1] }
 0x2ef   :  { %v2334_v53 = vld [vmem:[#allocation3 + $0x3a] sm:$0x1]  ;;  %v2335_v11 = vld [vmem:[#allocation3 + $0x3b] sm:$0x1]  ;;  %v2327_v8 = vld [vmem:[#allocation3 + $0x38] sm:$0x1] }
 0x2f0   :  { %2294 = vst [vmem:[#allocation3 + $0x48] sm:$0xff] %v2283_v56  ;;  %v2336_v14 = vmax.f32 %v2334_v53, %v2335_v11  ;;  %v2328_v41 = vld [vmem:[#allocation3 + $0x39] sm:$0x1]  ;;  %v2302_v33 = vmax.f32 %v2298_v37, %v2301_v36  ;;  %v2422_v51 = vld [vmem:[%s6041_s9 + $0x1a8] sm:$0xff]  ;;  %v2338_v34 = vld [vmem:[#allocation3 + $0x3f] sm:$0x1]  ;;  %v2315_v37 = vmax.f32 %v2313_v18, %v2314_v47 }
 0x2f1   :  { %v2329_v24 = vmax.f32 %v2327_v8, %v2328_v41  ;;  %v2406_v20 = vld [vmem:[%s6041_s9 + $0x128] sm:$0xff]  ;;  %v2421_v53 = vld [vmem:[%s6041_s9 + $0x1a0] sm:$0xff]  ;;  %v2419_v41 = vld [vmem:[%s6041_s9 + $0x190] sm:$0xff] }
 0x2f2   :  { %v2337_v40 = vmax.f32 %v2333_v10, %v2336_v14  ;;  %v2420_v10 = vld [vmem:[%s6041_s9 + $0x198] sm:$0xff] }
 0x2f3   :  { %v2330_v4 = vmax.f32 %v2326_v25, %v2329_v24  ;;  %v2345_v28 = vld [vmem:[#allocation3 + $0x41] sm:$0x1]  ;;  %v2346_v52 = vld [vmem:[#allocation3 + $0x42] sm:$0x1]  ;;  %v2339_v21 = vld [vmem:[#allocation3 + $0x40] sm:$0x1] }
 0x2f4   :  { %v2357_v38 = vrot.slane %v2337_v40, 7  ;;  %v2347_v35 = vmax.f32 %v2345_v28, %v2346_v52  ;;  %v2341_v26 = vld [vmem:[#allocation3 + $0x46] sm:$0x1]  ;;  %v2342_v56 = vld [vmem:[#allocation3 + $0x47] sm:$0x1]  ;;  %v2340_v11 = vmax.f32 %v2338_v34, %v2339_v21  ;;  %v2404_v14 = vld [vmem:[%s6041_s9 + $0x118] sm:$0xff] }
 0x2f5   :  { %v2356_v6 = vrot.slane %v2330_v4, 7  ;;  %v2343_v8 = vmax.f32 %v2341_v26, %v2342_v56  ;;  %v2403_v25 = vld [vmem:[%s6041_s9 + $0x110] sm:$0xff]  ;;  %v2418_v40 = vld [vmem:[%s6041_s9 + $0x188] sm:$0xff]  ;;  %v2593_v52 = vld [vmem:[%s6043_s11 + $0x60] sm:$0xff] }
 0x2f6   :  { %v2366_v5 = vsel %vm2364_vm2, %v2309_v55, %v2357_v38  ;;  %v2310_v24 = vld [vmem:[#allocation3 + $0xe] sm:$0x1]  ;;  %v2402_v4 = vld [vmem:[%s6041_s9 + $0x108] sm:$0xff]  ;;  %v2417_v55 = vld [vmem:[%s6041_s9 + $0x180] sm:$0xff] }
 0x2f7   :  { %2504 = vmatprep.mubr.f32.mxu1 %v2366_v5  ;;  %v2365_v59 = vsel %vm2364_vm2, %v2302_v33, %v2356_v6  ;;  %v2348_v29 = vld [vmem:[#allocation3 + $0x48] sm:$0x1]  ;;  %v2349_v63 = vld [vmem:[#allocation3 + $0x49] sm:$0x1]  ;;  %v2344_v36 = vmax.f32 %v2340_v11, %v2343_v8  ;;  %v2312_v38 = vmax.f32 %v2310_v24, %v2311_v23  ;;  %v2401_v33 = vld [vmem:[%s6041_s9 + $0x100] sm:$0xff] }
 0x2f8   :  { %2505 = vmatmul.mubr.f32.vlgmr.msra.gmra.mxu1 %v2365_v59  ;;  %v2350_v54 = vmax.f32 %v2348_v29, %v2349_v63  ;;  %v2594_v28 = vld [vmem:[%s6043_s11 + $0x68] sm:$0xff]  ;;  %v2592_v5 = vld [vmem:[%s6043_s11 + $0x58] sm:$0xff]  ;;  %v2585_v63 = vld [vmem:[%s6043_s11 + $0x20] sm:$0xff] }
 0x2f9   :  { %3224 = vmatpush3.msra.mxu1 %v2416_v13  ;;  %v2358_v61 = vrot.slane %v2344_v36, 7  ;;  %v2316_v6 = vmax.f32 %v2312_v38, %v2315_v37  ;;  %3951 = vmatpush3.msra.mxu0 %v2594_v28  ;;  %v2588_v59 = vld [vmem:[%s6043_s11 + $0x38] sm:$0xff]  ;;  %v2586_v29 = vld [vmem:[%s6043_s11 + $0x28] sm:$0xff] }
 0x2fa   :  { %3225 = vmatprep.subr.mxu1 %v2431_v62  ;;  %v2351_v46 = vmax.f32 %v2347_v35, %v2350_v54  ;;  %3952 = vmatprep.subr.mxu0 %v6048_v22  ;;  %v2591_v62 = vld [vmem:[%s6043_s11 + $0x50] sm:$0xff]  ;;  %v2582_v35 = vld [vmem:[%s6043_s11 + $0x8] sm:$0xff]  ;;  %v2581_v54 = vld [vmem:[%s6043_s11] sm:$0xff] }
 0x2fb   :  { %3226 = vmatpush3.msra.mxu1 %v2415_v27  ;;  %v2367_v13 = vsel %vm2364_vm2, %v2316_v6, %v2358_v61  ;;  %3953 = vmatpush3.msra.mxu0 %v2593_v52  ;;  %v2584_v27 = vld [vmem:[%s6043_s11 + $0x18] sm:$0xff] }
 0x2fc   :  { %3227 = vmatprep.subr.mxu1 %v2430_v12  ;;  %v2359_v15 = vrot.slane %v2351_v46, 7  ;;  %3954 = vmatprep.subr.mxu0 %v6048_v22  ;;  %v2887_v46 = vld [vmem:[%s6042_s10] ss:$0 sm:$0xff]  ;;  %s4012_s10 = smov [#allocation4]  }
 0x2fd   :  { %3228 = vmatpush3.msra.mxu1 %v2414_v39  ;;  %3955 = vmatpush3.msra.mxu0 %v2592_v5  ;;  %s2693_s11 = sshll.u32 %s4012_s10, 4  ;;  %s2694_s11 = int_to_ptr.vmem [resolvable:$true] %s2693_s11 }
 0x2fe   :  { %3229 = vmatprep.subr.mxu1 %v2429_v43  ;;  %v2368_v17 = vsel %vm2364_vm2, %v2323_v0, %v2359_v15  ;;  %3956 = vmatprep.subr.mxu0 %v6048_v22  ;;  %p3993_p1 = scmp.lt.s32.totalorder %s2694_s11, %s2694_s11 }
 0x2ff   :  { %3230 = vmatpush3.msra.mxu1 %v2413_v42  ;;  %2574 = vmatprep.mubr.f32.mxu1 %v2368_v17 }
 0x300   :  { %3231 = vmatprep.subr.mxu1 %v2428_v45  ;;  %3957 = vmatpush3.msra.mxu0 %v2591_v62 }
 0x301   :  { %3232 = vmatpush3.msra.mxu1 %v2412_v9  ;;  %3958 = vmatprep.subr.mxu0 %v6048_v22 }
 0x302   :  { %3233 = vmatprep.subr.mxu1 %v2427_v3  ;;  %3959 = vmatpush3.msra.mxu0 %v2590_v7 }
 0x303   :  { %3234 = vmatpush3.msra.mxu1 %v2411_v16  ;;  %3960 = vmatprep.subr.mxu0 %v6048_v22 }
 0x304   :  { %3235 = vmatprep.subr.mxu1 %v2426_v60  ;;  %3961 = vmatpush3.msra.mxu0 %v2589_v31 }
 0x305   :  { %3236 = vmatpush3.msra.mxu1 %v2410_v19  ;;  %3962 = vmatprep.subr.mxu0 %v6048_v22 }
 0x306   :  { %3237 = vmatprep.subr.mxu1 %v2425_v30  ;;  %3963 = vmatpush3.msra.mxu0 %v2588_v59 }
 0x307   :  { %3238 = vmatpush3.msra.mxu1 %v2409_v49  ;;  %3964 = vmatprep.subr.mxu0 %v6048_v22 }
 0x308   :  { %3239 = vmatprep.subr.mxu1 %v2424_v50  ;;  %3965 = vmatpush3.msra.mxu0 %v2587_v58 }
 0x309   :  { %3240 = vmatpush3.msra.mxu1 %v2408_v2  ;;  %3966 = vmatprep.subr.mxu0 %v6048_v22 }
 0x30a   :  { %3241 = vmatprep.subr.mxu1 %v2423_v44  ;;  %3967 = vmatpush3.msra.mxu0 %v2586_v29 }
 0x30b   :  { %3242 = vmatpush3.msra.mxu1 %v2407_v32  ;;  %3968 = vmatprep.subr.mxu0 %v6048_v22 }
 0x30c   :  { %3243 = vmatprep.subr.mxu1 %v2422_v51  ;;  %3969 = vmatpush3.msra.mxu0 %v2585_v63 }
 0x30d   :  { %3244 = vmatpush3.msra.mxu1 %v2406_v20  ;;  %3970 = vmatprep.subr.mxu0 %v6048_v22 }
 0x30e   :  { %3245 = vmatprep.subr.mxu1 %v2421_v53  ;;  %3971 = vmatpush3.msra.mxu0 %v2584_v27 }
 0x30f   :  { %3246 = vmatpush3.msra.mxu1 %v2405_v57  ;;  %3972 = vmatprep.subr.mxu0 %v6048_v22 }
 0x310   :  { %3247 = vmatprep.subr.mxu1 %v2420_v10  ;;  %3973 = vmatpush3.msra.mxu0 %v2583_v1 }
 0x311   :  { %3248 = vmatpush3.msra.mxu1 %v2404_v14  ;;  %3974 = vmatprep.subr.mxu0 %v6048_v22 }
 0x312   :  { %3249 = vmatprep.subr.mxu1 %v2419_v41  ;;  %3975 = vmatpush3.msra.mxu0 %v2582_v35 }
 0x313   :  { %3250 = vmatpush3.msra.mxu1 %v2403_v25  ;;  %3976 = vmatprep.subr.mxu0 %v6048_v22  ;;  %v2888_v22 = vld [vmem:[%s6044_s12] ss:$0 sm:$0xff]  ;;  %s3988_s12 = scalar_lea.vmem %s2694_s11, 32 }
 0x314   :  { %3251 = vmatprep.subr.mxu1 %v2418_v40  ;;  %3977 = vmatpush3.msra.mxu0 %v2581_v54  ;;  %p3989_p0 = scmp.ne.s32.totalorder %s2694_s11, %s3988_s12  ;;  %p3994_p2 = scmp.lt.s32.totalorder %s3988_s12, %s3988_s12 }
 0x315   :  { %3252 = vmatpush3.msra.mxu1 %v2402_v4 }
 0x316   :  { %3253 = vmatprep.subr.mxu1 %v2417_v55  ;;  %p3995_p3 = por %p3994_p2, %p3993_p1 }
 0x317   :  { %3254 = vmatpush3.msra.mxu1 %v2401_v33 }
 0x318   :  { %2575 = vmatmul.mubr.f32.vlgmr.msra.gmra.mxu1 %v2367_v13  ;;  %p3996_p4 = pnand %p3995_p3, %p3989_p0 }
 0x3b8   :  { %v3220_v12 = vpop.f32.mrf.mxu1 }
 0x3ba   :  { %v3221_v39 = vpop.f32.mrf.mxu1 }
 0x3bb   :  { %v3222_v48 = vadd.f32 %v3221_v39, %v3220_v12 }
 0x3bd   :  { %v2507_v0 = vadd.f32 %v3222_v48, %v2887_v46 }
 0x3d8   :  { %v3255_v43 = vpop.f32.mrf.mxu1 }
 0x3da   :  { %v3256_v42 = vpop.f32.mrf.mxu1 }
 0x3db   :  { %v3257_v15 = vadd.f32 %v3256_v42, %v3255_v43 }
 0x3dd   :  { %v2577_v45 = vadd.f32 %v3257_v15, %v2507_v0 }
 0x3df   :  { %v2580_v17 = vmax.f32 %v2577_v45, 0.0 }
 0x3e1   :  { %3979 = vmatmul.mubr.f32.vlgmr.msra.gmra.mxu0 %v2580_v17 }
 0x4a1   :  { %v2670_v9 = vpop.f32.mrf.mxu0 }
 0x4a2   :  { %v2671_v3 = vadd.f32 %v2888_v22, %v2670_v9 }
 0x4a3   :  { %v3980_v16 = vpop.f32.mrf.mxu0 }
 0x4a4   :  { %v2675_v60 = vsel %vm2674_vm3, %v2671_v3, -inf }
 0x4a5   :  { %2676 = vmax.xlane.f32.xlu0 %v2675_v60 }
 0x52e   :  { %v2677_v19 = vpop.xlane.xlu0 %2676 }
 0x52f   :  { %v2678_v30 = vsub.f32 %v2671_v3, %v2677_v19 }
 0x531   :  { %v2679_v49 = vmul.f32 1.442695, %v2678_v30 }
 0x533   :  { %3984 = vpow2.f32 %v2679_v49 }
 0x540   :  { %v3985_v50 = vpop.eup %3984 }
 0x541   :  { %v2681_v2 = vsel %vm2674_vm3, %v3985_v50, 0.0 }
 0x542   :  { %2682 = vadd.xlane.f32.xlu0 %v2681_v2 }
 0x5cb   :  { %v2683_v44 = vpop.xlane.xlu0 %2682 }
 0x5cc   :  { %3986 = vrcp.f32 %v2683_v44 }
 0x5d9   :  { %v3987_v32 = vpop.eup %3986 }
 0x5da   :  { %v2685_v21 = vmul.f32 %v3987_v32, %v3985_v50 }
 0x5dc   :  { %2686 = vst [vmem:[#allocation4] sm:$0x3] %v2685_v21 }
 0x5dd   :  { %3999 = shalt.err (!%p3996_p4)
}
 0x5de   :  { %2696 = dma.vmem_to_hbm [thread:$0]  %s2694_s11, 32, %s6045_s13, [#allocation5]  }
 0x5df   :  { %4008 = dma.done.wait [#allocation5], 32  }
 0x5e0   :  { %4009 = vsyncadd [#allocation5], 4294967264 }
 0x5e1   :  { %2700 = vsyncpa [#allocation5], 1 }

</bundles_post_ra>
